<compile_context>
chip_gen: v6e
topology: v6e:2x2x1
jax: 0.10.0
libtpu: 0.0.40
codegen_flags: <defaults>
</compile_context>

<pallas_src>
import math

import jax
import jax.numpy as jnp
from jax.experimental import pallas as pl
from jax.experimental.pallas import tpu as pltpu

# ---------------- model hyperparameters (small, consistent with module) -----
IN_FEATURES = 2          # coordinate dimension
ENC_FEATURES = 32        # FourierFeatureMap out_features (must be even)
NUM_FREQ = ENC_FEATURES // 2
HIDDEN = 32              # mlp_hidden_features
HIDDEN_LAYERS = 2        # mlp_hidden_layers
OUT_FEATURES = 2         # ExpertMLP output dim (hard-coded 2 in Fullmodel)
OMEGA_0 = 30.0
COORD_SCALES = (1.0, 1.0)
SQRT2 = math.sqrt(2.0)

DESIRED_TM = 4096        # target rows per tile for large N
MIN_TILES = 4            # keep >=4 grid steps so v7x megacore has work


# ---------------- Pallas kernel ---------------------------------------------


def fullmodel_kernel(x_ref, bt_ref, w1_ref, b1_ref,
                     wh_ref, bh_ref, wf_ref, bf_ref, o_ref):
    # x_ref: (IN_FEATURES, tm) feature-major tile — rows live on the lane axis.
    x = x_ref[...]                                      # (Din, tm)
    bt = bt_ref[...]                                    # (NUM_FREQ, Din), scales folded

    # Fourier projection: contraction depth is only IN_FEATURES=2, so use
    # broadcast multiply-adds on the VPU instead of an underfilled MXU matmul.
    proj = bt[:, 0:1] * x[0:1, :]                       # (NUM_FREQ, tm)
    for d in range(1, IN_FEATURES):
        proj = proj + bt[:, d:d + 1] * x[d:d + 1, :]

    # sin/cos stacked along sublanes (16-row, i.e. 2-sublane-tile aligned —
    # a pure sublane-offset copy, no lane movement).  sqrt(2)*omega_0 is
    # pre-folded into W1 and omega_0 into b1, so the first layer is a single
    # K=ENC_FEATURES MXU matmul.
    enc = jnp.concatenate([jnp.sin(proj), jnp.cos(proj)], axis=0)   # (32, tm)

    pre = jnp.dot(w1_ref[...], enc, preferred_element_type=jnp.float32) + b1_ref[...]
    h = jnp.sin(pre)                                    # (HIDDEN, tm)

    # Hidden sine layers (statically unrolled): sin(W @ h + b).
    for l in range(HIDDEN_LAYERS):
        h = jnp.sin(jnp.dot(wh_ref[l], h, preferred_element_type=jnp.float32)
                    + bh_ref[l])

    # Final linear layer; (OUT_FEATURES, tm) output -> lane-dense store.
    out = jnp.dot(wf_ref[...], h, preferred_element_type=jnp.float32) + bf_ref[...]
    o_ref[...] = out.astype(o_ref.dtype)


def _choose_tm(n_rows, desired=DESIRED_TM, min_tiles=MIN_TILES):
    """Lane-dense row tile: as large as possible (amortize per-step overhead)
    while keeping >= min_tiles grid steps when N allows (v7x megacore)."""
    n128 = pl.cdiv(n_rows, 128) * 128
    if n128 >= min_tiles * 128:
        cap = (n128 // min_tiles) // 128 * 128
    else:
        cap = 128
    return max(128, min(desired, cap))


def fullmodel_forward(x_rows, kernel_params, *, tm=None):
    """x_rows: (N, IN_FEATURES) row-major coords. Returns (N, OUT_FEATURES)."""
    bt, w1, b1, wh, bh, wf, bf = kernel_params

    N = x_rows.shape[0]
    if tm is None:
        tm = _choose_tm(N)
    assert tm % 128 == 0, "tm must be lane-dense (multiple of 128)"
    n_pad = pl.cdiv(N, tm) * tm

    # Wrapper-side transpose/pad kept: callers hand row-major coords.
    # TODO(synk): drop x_rows.T / pad / out.T if the caller can produce and
    # consume feature-major buffers directly (only matters for tiny N).
    x_fm = x_rows.T                                     # (IN_FEATURES, N)
    if n_pad != N:                                      # remainder tile via padding
        x_fm = jnp.pad(x_fm, ((0, 0), (0, n_pad - N)))

    full = lambda *shape: pl.BlockSpec(shape, lambda i: (0,) * len(shape))

    out_fm = pl.pallas_call(
        fullmodel_kernel,
        out_shape=jax.ShapeDtypeStruct((OUT_FEATURES, n_pad), jnp.float32),
        grid_spec=pltpu.PrefetchScalarGridSpec(
            num_scalar_prefetch=0,
            grid=(n_pad // tm,),
            in_specs=[
                pl.BlockSpec((IN_FEATURES, tm), lambda i: (0, i)),   # x tile
                full(NUM_FREQ, IN_FEATURES),                         # B^T (scaled)
                full(HIDDEN, ENC_FEATURES),                          # W1 packed (sin|cos)
                full(HIDDEN, 1),                                     # b1 column
                full(HIDDEN_LAYERS, HIDDEN, HIDDEN),                 # Wh stack
                full(HIDDEN_LAYERS, HIDDEN, 1),                      # bh columns
                full(OUT_FEATURES, HIDDEN),                          # Wf
                full(OUT_FEATURES, 1),                               # bf column
            ],
            out_specs=pl.BlockSpec((OUT_FEATURES, tm), lambda i: (0, i)),
        ),
        compiler_params=pltpu.CompilerParams(
            dimension_semantics=("parallel",)),
    )(x_fm, bt, w1, b1, wh, bh, wf, bf)

    return out_fm[:, :N].T                              # back to (N, OUT_FEATURES)


# ---------------- deterministic parameter construction ----------------------


def init_raw_params(key):
    """Raw parameters in PyTorch layout: weights [out, in], biases 1-D."""
    ks = jax.random.split(key, 8)
    scales = jnp.asarray(COORD_SCALES, jnp.float32).reshape(1, IN_FEATURES)
    # FourierFeatureMap: B ~ Normal(0, 3) * 10.
    B = jax.random.normal(ks[0], (IN_FEATURES, NUM_FREQ), jnp.float32) * 3.0 * 10.0

    # First sine layer: SIREN first-layer init, default PyTorch bias init.
    w1 = jax.random.uniform(ks[1], (HIDDEN, ENC_FEATURES), jnp.float32,
                            minval=-1.0 / ENC_FEATURES, maxval=1.0 / ENC_FEATURES)
    b1 = jax.random.uniform(ks[2], (HIDDEN,), jnp.float32,
                            minval=-1.0 / math.sqrt(ENC_FEATURES),
                            maxval=1.0 / math.sqrt(ENC_FEATURES))

    lim = math.sqrt(6.0 / HIDDEN)
    wh = jax.random.uniform(ks[3], (HIDDEN_LAYERS, HIDDEN, HIDDEN), jnp.float32,
                            minval=-lim, maxval=lim)
    bh = jax.random.uniform(ks[4], (HIDDEN_LAYERS, HIDDEN), jnp.float32,
                            minval=-1.0 / math.sqrt(HIDDEN),
                            maxval=1.0 / math.sqrt(HIDDEN))

    lim_f = 1.0 / math.sqrt(HIDDEN)
    wf = jax.random.uniform(ks[5], (OUT_FEATURES, HIDDEN), jnp.float32,
                            minval=-lim_f, maxval=lim_f)
    bf = jax.random.uniform(ks[6], (OUT_FEATURES,), jnp.float32,
                            minval=-lim_f, maxval=lim_f)
    return scales, B, w1, b1, wh, bh, wf, bf


def pack_kernel_params(raw):
    """Fold constants and repack raw params into the kernel's feature-major layout."""
    scales, B, w1, b1, wh, bh, wf, bf = raw
    bt = (B * scales.reshape(IN_FEATURES, 1)).T          # (NUM_FREQ, Din), scales folded
    # sqrt(2)*omega_0 folded into the packed (sin | cos) first-layer weight.
    w1k = (OMEGA_0 * SQRT2) * w1                          # (HIDDEN, ENC_FEATURES)
    b1k = (OMEGA_0 * b1).reshape(HIDDEN, 1)
    bhk = bh.reshape(HIDDEN_LAYERS, HIDDEN, 1)
    bfk = bf.reshape(OUT_FEATURES, 1)
    return bt, w1k, b1k, wh, bhk, wf, bfk


def reference_forward(x_rows, raw):
    """Pure-JAX row-major reference matching the PyTorch module."""
    scales, B, w1, b1, wh, bh, wf, bf = raw
    proj = (x_rows * scales) @ B
    enc = jnp.concatenate([SQRT2 * jnp.sin(proj), SQRT2 * jnp.cos(proj)], axis=-1)
    h = jnp.sin(OMEGA_0 * (enc @ w1.T + b1))
    for l in range(HIDDEN_LAYERS):
        h = jnp.sin(h @ wh[l].T + bh[l])
    return h @ wf.T + bf


# ---------------- main -------------------------------------------------------

if __name__ == "__main__":
    key = jax.random.PRNGKey(0)
    kx, kp = jax.random.split(key)

    N = 1024  # number of coordinate points (rows); auto tm=256 -> 4 grid steps
    x = jax.random.uniform(kx, (N, IN_FEATURES), jnp.float32, minval=-1.0, maxval=1.0)

    raw = init_raw_params(kp)
    kparams = pack_kernel_params(raw)

    out = fullmodel_forward(x, kparams)     # tm auto-chosen (4096 cap, >=4 tiles)
    out = jax.block_until_ready(out)

    ref = reference_forward(x, raw)
    assert out.shape == (N, OUT_FEATURES)
    max_err = float(jnp.max(jnp.abs(out - ref)))
    assert jnp.allclose(out, ref, atol=1e-3, rtol=1e-3), (
        f"mismatch vs reference: max abs diff = {max_err}")

    print("KERNEL_OK")
</pallas_src>

<mosaic_0001>
module attributes {stable_mosaic.version = 11 : i64} {
  func.func @fullmodel_kernel(%arg0: i32, %arg1: memref<2x256xf32, #tpu.memory_space<vmem>>, %arg2: memref<16x2xf32, #tpu.memory_space<vmem>>, %arg3: memref<32x32xf32, #tpu.memory_space<vmem>>, %arg4: memref<32x1xf32, #tpu.memory_space<vmem>>, %arg5: memref<2x32x32xf32, #tpu.memory_space<vmem>>, %arg6: memref<2x32x1xf32, #tpu.memory_space<vmem>>, %arg7: memref<2x32xf32, #tpu.memory_space<vmem>>, %arg8: memref<2x1xf32, #tpu.memory_space<vmem>>, %arg9: memref<2x256xf32, #tpu.memory_space<vmem>>) attributes {dimension_semantics = [#tpu.dimension_semantics<parallel>], iteration_bounds = array<i64: 4>, scalar_prefetch = 0 : i64, scratch_operands = 0 : i64, tpu.core_type = #tpu.core_type<tc>, window_params = [{transform_indices = @transform_0, window_bounds = array<i64: 2, 256>}, {pipeline_mode = #tpu.pipeline_mode<synchronous>, transform_indices = @transform_1, window_bounds = array<i64: 16, 2>}, {pipeline_mode = #tpu.pipeline_mode<synchronous>, transform_indices = @transform_2, window_bounds = array<i64: 32, 32>}, {pipeline_mode = #tpu.pipeline_mode<synchronous>, transform_indices = @transform_3, window_bounds = array<i64: 32, 1>}, {pipeline_mode = #tpu.pipeline_mode<synchronous>, transform_indices = @transform_4, window_bounds = array<i64: 2, 32, 32>}, {pipeline_mode = #tpu.pipeline_mode<synchronous>, transform_indices = @transform_5, window_bounds = array<i64: 2, 32, 1>}, {pipeline_mode = #tpu.pipeline_mode<synchronous>, transform_indices = @transform_6, window_bounds = array<i64: 2, 32>}, {pipeline_mode = #tpu.pipeline_mode<synchronous>, transform_indices = @transform_7, window_bounds = array<i64: 2, 1>}, {transform_indices = @transform_8, window_bounds = array<i64: 2, 256>}]} {
    %c0 = arith.constant 0 : index
    %c0_0 = arith.constant 0 : index
    %0 = vector.load %arg1[%c0, %c0_0] : memref<2x256xf32, #tpu.memory_space<vmem>>, vector<2x256xf32>
    %c0_1 = arith.constant 0 : index
    %c0_2 = arith.constant 0 : index
    %1 = vector.load %arg2[%c0_1, %c0_2] : memref<16x2xf32, #tpu.memory_space<vmem>>, vector<16x2xf32>
    %2 = vector.extract_strided_slice %1 {offsets = [0, 0], sizes = [16, 1], strides = [1, 1]} : vector<16x2xf32> to vector<16x1xf32>
    %3 = vector.extract_strided_slice %0 {offsets = [0, 0], sizes = [1, 256], strides = [1, 1]} : vector<2x256xf32> to vector<1x256xf32>
    %4 = vector.broadcast %2 : vector<16x1xf32> to vector<16x256xf32>
    %5 = vector.broadcast %3 : vector<1x256xf32> to vector<16x256xf32>
    %6 = arith.mulf %4, %5 : vector<16x256xf32>
    %7 = vector.extract_strided_slice %1 {offsets = [0, 1], sizes = [16, 1], strides = [1, 1]} : vector<16x2xf32> to vector<16x1xf32>
    %8 = vector.extract_strided_slice %0 {offsets = [1, 0], sizes = [1, 256], strides = [1, 1]} : vector<2x256xf32> to vector<1x256xf32>
    %9 = vector.broadcast %7 : vector<16x1xf32> to vector<16x256xf32>
    %10 = vector.broadcast %8 : vector<1x256xf32> to vector<16x256xf32>
    %11 = arith.mulf %9, %10 : vector<16x256xf32>
    %12 = arith.addf %6, %11 : vector<16x256xf32>
    %13 = math.sin %12 : vector<16x256xf32>
    %14 = math.cos %12 : vector<16x256xf32>
    %15 = tpu.concatenate %13, %14 in 0 : vector<16x256xf32>, vector<16x256xf32> -> vector<32x256xf32>
    %c0_3 = arith.constant 0 : index
    %c0_4 = arith.constant 0 : index
    %16 = vector.load %arg3[%c0_3, %c0_4] : memref<32x32xf32, #tpu.memory_space<vmem>>, vector<32x32xf32>
    %cst = arith.constant dense<0.000000e+00> : vector<32x256xf32>
    %17 = tpu.matmul %16, %15, %cst {dimension_numbers = #tpu.dot_dimension_numbers<[1], [0], [0], [1], [0, 0, 1, 1], [], []>} : vector<32x32xf32>, vector<32x256xf32>, vector<32x256xf32> -> vector<32x256xf32>
    %c0_5 = arith.constant 0 : index
    %c0_6 = arith.constant 0 : index
    %18 = vector.load %arg4[%c0_5, %c0_6] : memref<32x1xf32, #tpu.memory_space<vmem>>, vector<32x1xf32>
    %19 = vector.broadcast %18 : vector<32x1xf32> to vector<32x256xf32>
    %20 = arith.addf %17, %19 : vector<32x256xf32>
    %21 = math.sin %20 : vector<32x256xf32>
    %c0_7 = arith.constant 0 : index
    %c0_8 = arith.constant 0 : index
    %c0_9 = arith.constant 0 : index
    %22 = vector.load %arg5[%c0_7, %c0_8, %c0_9] : memref<2x32x32xf32, #tpu.memory_space<vmem>>, vector<1x32x32xf32>
    %23 = vector.shape_cast %22 : vector<1x32x32xf32> to vector<32x32xf32>
    %cst_10 = arith.constant dense<0.000000e+00> : vector<32x256xf32>
    %24 = tpu.matmul %23, %21, %cst_10 {dimension_numbers = #tpu.dot_dimension_numbers<[1], [0], [0], [1], [0, 0, 1, 1], [], []>} : vector<32x32xf32>, vector<32x256xf32>, vector<32x256xf32> -> vector<32x256xf32>
    %c0_11 = arith.constant 0 : index
    %c0_12 = arith.constant 0 : index
    %c0_13 = arith.constant 0 : index
    %25 = vector.load %arg6[%c0_11, %c0_12, %c0_13] : memref<2x32x1xf32, #tpu.memory_space<vmem>>, vector<1x32x1xf32>
    %26 = vector.shape_cast %25 : vector<1x32x1xf32> to vector<32x1xf32>
    %27 = vector.broadcast %26 : vector<32x1xf32> to vector<32x256xf32>
    %28 = arith.addf %24, %27 : vector<32x256xf32>
    %29 = math.sin %28 : vector<32x256xf32>
    %c1 = arith.constant 1 : index
    %c0_14 = arith.constant 0 : index
    %c0_15 = arith.constant 0 : index
    %30 = vector.load %arg5[%c1, %c0_14, %c0_15] : memref<2x32x32xf32, #tpu.memory_space<vmem>>, vector<1x32x32xf32>
    %31 = vector.shape_cast %30 : vector<1x32x32xf32> to vector<32x32xf32>
    %cst_16 = arith.constant dense<0.000000e+00> : vector<32x256xf32>
    %32 = tpu.matmul %31, %29, %cst_16 {dimension_numbers = #tpu.dot_dimension_numbers<[1], [0], [0], [1], [0, 0, 1, 1], [], []>} : vector<32x32xf32>, vector<32x256xf32>, vector<32x256xf32> -> vector<32x256xf32>
    %c1_17 = arith.constant 1 : index
    %c0_18 = arith.constant 0 : index
    %c0_19 = arith.constant 0 : index
    %33 = vector.load %arg6[%c1_17, %c0_18, %c0_19] : memref<2x32x1xf32, #tpu.memory_space<vmem>>, vector<1x32x1xf32>
    %34 = vector.shape_cast %33 : vector<1x32x1xf32> to vector<32x1xf32>
    %35 = vector.broadcast %34 : vector<32x1xf32> to vector<32x256xf32>
    %36 = arith.addf %32, %35 : vector<32x256xf32>
    %37 = math.sin %36 : vector<32x256xf32>
    %c0_20 = arith.constant 0 : index
    %c0_21 = arith.constant 0 : index
    %38 = vector.load %arg7[%c0_20, %c0_21] : memref<2x32xf32, #tpu.memory_space<vmem>>, vector<2x32xf32>
    %cst_22 = arith.constant dense<0.000000e+00> : vector<2x256xf32>
    %39 = tpu.matmul %38, %37, %cst_22 {dimension_numbers = #tpu.dot_dimension_numbers<[1], [0], [0], [1], [0, 0, 1, 1], [], []>} : vector<2x32xf32>, vector<32x256xf32>, vector<2x256xf32> -> vector<2x256xf32>
    %c0_23 = arith.constant 0 : index
    %c0_24 = arith.constant 0 : index
    %40 = vector.load %arg8[%c0_23, %c0_24] : memref<2x1xf32, #tpu.memory_space<vmem>>, vector<2x1xf32>
    %41 = vector.broadcast %40 : vector<2x1xf32> to vector<2x256xf32>
    %42 = arith.addf %39, %41 : vector<2x256xf32>
    %c0_25 = arith.constant 0 : index
    %c0_26 = arith.constant 0 : index
    %43 = vector.load %arg9[%c0_25, %c0_26] : memref<2x256xf32, #tpu.memory_space<vmem>>, vector<2x256xf32>
    tpu.vector_store %arg9[%c0_25, %c0_26], %42 {strides = array<i32>} : memref<2x256xf32, #tpu.memory_space<vmem>>, vector<2x256xf32>,
    return
  }
  func.func @transform_0(%arg0: i32) -> (i32, i32) {
    %c0_i32 = arith.constant 0 : i32
    %c0_i32_0 = arith.constant 0 : i32
    return %c0_i32, %arg0 : i32, i32
  }
  func.func @transform_1(%arg0: i32) -> (i32, i32) {
    %c0_i32 = arith.constant 0 : i32
    %c0_i32_0 = arith.constant 0 : i32
    %c0_i32_1 = arith.constant 0 : i32
    return %c0_i32, %c0_i32_0 : i32, i32
  }
  func.func @transform_2(%arg0: i32) -> (i32, i32) {
    %c0_i32 = arith.constant 0 : i32
    %c0_i32_0 = arith.constant 0 : i32
    %c0_i32_1 = arith.constant 0 : i32
    return %c0_i32, %c0_i32_0 : i32, i32
  }
  func.func @transform_3(%arg0: i32) -> (i32, i32) {
    %c0_i32 = arith.constant 0 : i32
    %c0_i32_0 = arith.constant 0 : i32
    %c0_i32_1 = arith.constant 0 : i32
    return %c0_i32, %c0_i32_0 : i32, i32
  }
  func.func @transform_4(%arg0: i32) -> (i32, i32, i32) {
    %c0_i32 = arith.constant 0 : i32
    %c0_i32_0 = arith.constant 0 : i32
    %c0_i32_1 = arith.constant 0 : i32
    %c0_i32_2 = arith.constant 0 : i32
    return %c0_i32, %c0_i32_0, %c0_i32_1 : i32, i32, i32
  }
  func.func @transform_5(%arg0: i32) -> (i32, i32, i32) {
    %c0_i32 = arith.constant 0 : i32
    %c0_i32_0 = arith.constant 0 : i32
    %c0_i32_1 = arith.constant 0 : i32
    %c0_i32_2 = arith.constant 0 : i32
    return %c0_i32, %c0_i32_0, %c0_i32_1 : i32, i32, i32
  }
  func.func @transform_6(%arg0: i32) -> (i32, i32) {
    %c0_i32 = arith.constant 0 : i32
    %c0_i32_0 = arith.constant 0 : i32
    %c0_i32_1 = arith.constant 0 : i32
    return %c0_i32, %c0_i32_0 : i32, i32
  }
  func.func @transform_7(%arg0: i32) -> (i32, i32) {
    %c0_i32 = arith.constant 0 : i32
    %c0_i32_0 = arith.constant 0 : i32
    %c0_i32_1 = arith.constant 0 : i32
    return %c0_i32, %c0_i32_0 : i32, i32
  }
  func.func @transform_8(%arg0: i32) -> (i32, i32) {
    %c0_i32 = arith.constant 0 : i32
    %c0_i32_0 = arith.constant 0 : i32
    return %c0_i32, %arg0 : i32, i32
  }
}

</mosaic_0001>

<bundles_post_ra>
// kernel: tpu_custom_call.1
= control target key start
LH: loop header
LB: loop body
LE: loop exit
PB: predicated region body
PF: predicated region fallthrough
CT: control target
= control target key end

     0   :  { %13 = vsyncpa [#allocation3], 0  ;;  %s7721_s0 = inlined_call_operand.vmem [shape: f32[2,1024], index: 0, kind: input, shape index: {}]   ;;  %s7722_s1 = inlined_call_operand.vmem [shape: f32[16,2], index: 1, kind: input, shape index: {}]   ;;  %s7723_s2 = inlined_call_operand.vmem [shape: f32[32,32], index: 2, kind: input, shape index: {}]   ;;  %s7724_s3 = inlined_call_operand.vmem [shape: f32[32,1], index: 3, kind: input, shape index: {}]   ;;  %s7725_s4 = inlined_call_operand.vmem [shape: f32[2,32,32], index: 4, kind: input, shape index: {}]   ;;  %s7726_s5 = inlined_call_operand.vmem [shape: f32[2,32,1], index: 5, kind: input, shape index: {}]   ;;  %s7727_s6 = inlined_call_operand.vmem [shape: f32[2,32], index: 6, kind: input, shape index: {}]   ;;  %s7728_s7 = inlined_call_operand.vmem [shape: f32[2,1], index: 7, kind: input, shape index: {}]   ;;  %s7729_s8 = inlined_call_operand.hbm [shape: f32[2,1024], index: 8, kind: output, shape index: {}]  }
   0x1   :  { %15 = vsyncpa [#allocation3 + $0x1], 0  ;;  %s4824_s27 = smov 0   ;;  %s4826_s28 = smov 0  }
   0x2   :  { %s4828_s29 = smov 0   ;;  %s4830_s30 = smov 0  }
   0x3 LB: > { %s4845_s9 = sadd.s32 4294967295, %s4767_s30   ;;  %s4258_s10 = sadd.s32 4294967294, %s4767_s30   ;;  %s4767_s30 = sphi %s4830_s30, %s7912_s30   ;;  %s4763_s29 = sphi %s4828_s29, %s7911_s29   ;;  %s4759_s28 = sphi %s4826_s28, %s7910_s28   ;;  %s4755_s27 = sphi %s4824_s27, %s7909_s27  }
   0x4   : > { %s4849_s11 = sadd.s32 1, %s4767_s30   ;;  %s201_s12 = sadd.s32 1, %s4763_s29 }
   0x5   : > { %s198_s13 = ssub.s32 %s4767_s30, %s4849_s11  ;;  %p211_p0 = scmp.ne.s32.totalorder %s4763_s29, %s4759_s28 }
   0x6   : > { %p199_p1 = scmp.eq.s32.totalorder %s198_s13, 0  ;;  %p212_p2 = scmp.eq.s32.totalorder %s4845_s9, 3 }
   0x7   : > { %p217_p3 = scmp.ne.s32.totalorder %s4759_s28, %s4755_s27  ;;  %p218_p4 = scmp.eq.s32.totalorder %s4258_s10, 3 }
   0x8   : > { %s4860_s14 = scalar_select %p199_p1, %s4763_s29, %s201_s12  }
   0x9   : > { %p4862_p5 = por %p212_p2, %p211_p0  ;;  %p4866_p6 = por %p218_p4, %p217_p3 }
   0xa   : > { %p4261_p7 = scmp.ge.s32.totalorder %s4767_s30, 1  ;;  %p266_p8 = scmp.lt.s32.totalorder %s4767_s30, 5 }
   0xc   : > { %p267_p9 = pnand %p4261_p7, %p266_p8 }
   0xe   : > { %270 = sbr.rel (%p267_p9) target bundleno = 1718 (0x6b6), region = 52 }
  0x13   : > { %v309_v0 = vld [vmem:[%s7722_s1 + $0x8] sm:$0xff]  ;;  %v308_v1 = vld [vmem:[%s7722_s1] sm:$0xff]  ;;  %v4769_v2 = vmov 0   ;;  %v4770_v3 = vmov 1   ;;  %s4263_s21 = sshll.u32 %s4845_s9, 1  ;;  %v321_v4 = vlaneseq  ;;  %s297_s26 = sand.u32 1, %s4759_s28  }
  0x14   : > { %4591 = vset.pattern.permute.xlu1 %v4769_v2  ;;  %4589 = vset.pattern.permute.xlu0 %v4769_v2  ;;  %p301_p10 = scmp.lt.s32.totalorder %s4263_s21, 7  ;;  %s4262_s10 = sshll.u32 %s297_s26, 2 }
  0x15   : > { %317 = vperm.xlu0 %4589, %v309_v0   ;;  %312 = vperm.xlu1 %4591, %v308_v1   ;;  %v322_v5 = vshrl.u32 %v321_v4, 7  ;;  %s4420_s12 = sshll.u32 %s4845_s9, 6  ;;  %s299_s13 = scalar_lea.vmem [#allocation2], %s4262_s10 }
  0x16   : > { %s7914_s21 = smov (!%p301_p10, %s4263_s21), 7  ;;  %s4199_s17 = sshll.u32 %s299_s13, 4  ;;  %s4200_s17 = int_to_ptr.vmem [resolvable:$true] %s4199_s17 }
  0x17   : > { %s4264_s22 = sshll.u32 %s7914_s21, 1  ;;  %v323_v6 = vsub.s32 0, %v322_v5  ;;  %v327_v7 = vsub.s32 2, %v322_v5  ;;  %v353_v9 = vsub.s32 1, %v322_v5  ;;  %v357_v10 = vsub.s32 3, %v322_v5  ;;  %s4197_s20 = scalar_lea.hbm %s7729_s8, %s4420_s12 }
  0x18   : > { %s304_s25 = scalar_lea.vmem %s7721_s0, %s4264_s22  ;;  %v7749_v5 = vmov 2475754826   ;;  %s4185_s21 = scalar_lea.sflag [#allocation3], %s297_s26 }
  0x19   : > { %4590 = vset.pattern.permute.xlu0 %v4770_v3  ;;  %4592 = vset.pattern.permute.xlu1 %v4770_v3  ;;  %v307_v8 = vld [vmem:[%s304_s25] sm:$0xf]  ;;  %v7747_v3 = vmov 683565275   ;;  %s4707_s22 = scalar_lea.vmem %s4200_s17, 64  ;;  %s4778_s23 = smov [#allocation2]  }
  0x1a   : > { %348 = vperm.xlu0 %4590, %v309_v0   ;;  %344 = vperm.xlu1 %4592, %v308_v1   ;;  %v324_v11 = vrot.slane %v307_v8, %v323_v6  ;;  %v328_v12 = vrot.slane %v307_v8, %v327_v7  ;;  %v354_v13 = vrot.slane %v307_v8, %v353_v9  ;;  %v7739_v7 = vmov 2131351028   ;;  %p4708_p11 = scmp.ne.s32.totalorder %s4200_s17, %s4707_s22  ;;  %s4711_s24 = sshll.u32 %s4778_s23, 4  ;;  %s4712_s24 = int_to_ptr.vmem [resolvable:$false] %s4711_s24 }
  0x1b   : > { %v358_v14 = vrot.slane %v307_v8, %v357_v10  ;;  %s4713_s9 = scalar_lea.vmem %s4712_s24, 128  ;;  %p4714_p0 = scmp.lt.s32.totalorder %s4200_s17, %s4712_s24 }
  0x1c   : > { %v334_v17 = vrot.slane %v324_v11, %v323_v6  ;;  %v338_v18 = vrot.slane %v328_v12, %v323_v6  ;;  %v364_v19 = vrot.slane %v354_v13, %v353_v9  ;;  %v7745_v11 = vmov 2102212464   ;;  %p4709_p12 = pnand %p4708_p11, %p4862_p5  ;;  %p4715_p1 = scmp.lt.s32.totalorder %s4713_s9, %s4707_s22 }
  0x1d   : > { %v368_v20 = vrot.slane %v358_v14, %v353_v9 }
  0x1e   : > { %4593 = vset.pattern.permute.xlu1 %v4769_v2  ;;  %4594 = vset.pattern.permute.xlu0 %v4769_v2  ;;  %p4710_p13 = pneg %p4709_p12  ;;  %p4716_p2 = por %p4715_p1, %p4714_p0 }
  0x20   : > { %p4717_p3 = pnand %p4716_p2, %p4710_p13 }
  0x90   : > { %v318_v15 = vpop.permute.xlu0 %317  ;;  %v313_v16 = vpop.permute.xlu1 %312 }
  0x91   : > { %v341_v21 = vmul.f32 %v334_v17, %v318_v15  ;;  %v342_v22 = vmul.f32 %v338_v18, %v318_v15  ;;  %v339_v23 = vmul.f32 %v334_v17, %v313_v16  ;;  %v340_v24 = vmul.f32 %v338_v18, %v313_v16 }
  0x92   : > { %v7743_v15 = vmov 920167782   ;;  %v7741_v18 = vmov 1326507024  }
  0x95   : > { %v349_v25 = vpop.permute.xlu0 %348  ;;  %v345_v26 = vpop.permute.xlu1 %344 }
  0x96   : > { %v371_v27 = vmul.f32 %v364_v19, %v349_v25  ;;  %v372_v28 = vmul.f32 %v368_v20, %v349_v25  ;;  %v369_v29 = vmul.f32 %v364_v19, %v345_v26  ;;  %v370_v30 = vmul.f32 %v368_v20, %v345_v26 }
  0x98   : > { %v4882_v31 = vadd.f32 %v371_v27, %v341_v21  ;;  %v4884_v32 = vadd.f32 %v372_v28, %v342_v22  ;;  %v4886_v33 = vadd.f32 %v369_v29, %v339_v23  ;;  %v4888_v34 = vadd.f32 %v370_v30, %v340_v24 }
  0x9a   : > { %v588_v35 = vand.u32 2139095040, %v4882_v31  ;;  %v692_v36 = vand.u32 2139095040, %v4884_v32  ;;  %v380_v37 = vand.u32 2139095040, %v4886_v33  ;;  %v484_v38 = vand.u32 2139095040, %v4888_v34 }
  0x9b   : > { %v689_v39 = vand.u32 2147483647, %v4884_v32  ;;  %v585_v45 = vand.u32 2147483647, %v4882_v31  ;;  %vm691_vm14 = vcmp.lt.s32.totalorder %v4884_v32, 0 }
  0x9c   : > { %v589_v40 = vshrl.u32 %v588_v35, 23  ;;  %v693_v41 = vshrl.u32 %v692_v36, 23  ;;  %v485_v42 = vshrl.u32 %v484_v38, 23  ;;  %v381_v43 = vshrl.u32 %v380_v37, 23 }
  0x9d   : > { %v696_v44 = vand.u32 8388607, %v689_v39  ;;  %v4900_v54 = vand.u32 8388607, %v585_v45 }
  0x9e   : > { %v4273_v46 = vadd.s32 4294967169, %v589_v40  ;;  %v4277_v47 = vadd.s32 4294967169, %v693_v41  ;;  %v4269_v48 = vadd.s32 4294967169, %v485_v42  ;;  %v4265_v52 = vadd.s32 4294967169, %v381_v43  ;;  %v1212_v41 = vld [vmem:[%s7724_s3 + $0x18] sm:$0xff] }
  0x9f   : > { %v697_v53 = vor.u32 8388608, %v696_v44  ;;  %v593_v61 = vor.u32 8388608, %v4900_v54  ;;  %1230 = vperm.xlu1 %4593, %v1212_v41   ;;  %v4376_v54 = vld [vmem:[%s7726_s5 + $0x38] sm:$0xff] }
  0xa0   : > { %v595_v49 = vadd.s32 1, %v4273_v46  ;;  %v699_v50 = vadd.s32 1, %v4277_v47  ;;  %v491_v51 = vadd.s32 1, %v4269_v48  ;;  %v4904_v59 = vadd.s32 1, %v4265_v52  ;;  %v1211_v47 = vld [vmem:[%s7724_s3 + $0x10] sm:$0xff]  ;;  %v1210_v52 = vld [vmem:[%s7724_s3 + $0x8] sm:$0xff] }
  0xa1   : > { %v4906_v60 = vshll.u32 %v697_v53, 8  ;;  %1225 = vperm.xlu0 %4594, %v1211_v47  }
  0xa2   : > { %vm596_vm0 = vcmp.gt.s32.totalorder %v595_v49, 0  ;;  %vm700_vm1 = vcmp.gt.s32.totalorder %v699_v50, 0  ;;  %vm492_vm2 = vcmp.gt.s32.totalorder %v491_v51, 0  ;;  %vm388_vm12 = vcmp.gt.s32.totalorder %v4904_v59, 0 }
  0xa3   : > { %v597_v55 = vsel %vm596_vm0, %v595_v49, 0  ;;  %v701_v56 = vsel %vm700_vm1, %v699_v50, 0  ;;  %v4911_v1 = vsel %vm492_vm2, %v491_v51, 0  ;;  %1220 = vperm.xlu1 %4593, %v1210_v52   ;;  %v5026_v52 = vsel %vm388_vm12, %v4904_v59, 0 }
  0xa4   : > { %v4902_v57 = vand.u32 31, %v597_v55  ;;  %v703_v58 = vand.u32 31, %v701_v56  ;;  %v4909_v62 = vshrl.u32 %v597_v55, 5  ;;  %v702_v63 = vshrl.u32 %v701_v56, 5 }
  0xa5   : > { %v4928_v36 = vand.u32 31, %v4911_v1 }
  0xa6   : > { %v704_v0 = vsub.s32 32, %v703_v58  ;;  %v4914_v2 = vsub.s32 32, %v4902_v57  ;;  %v706_v4 = vshll.u32 %v7747_v3, %v703_v58  ;;  %v709_v6 = vshll.u32 %v7749_v5, %v703_v58 }
  0xa7   : > { %v712_v8 = vshll.u32 %v7739_v7, %v703_v58  ;;  %v715_v13 = vshll.u32 %v7745_v11, %v703_v58  ;;  %v718_v17 = vshll.u32 %v7743_v15, %v703_v58  ;;  %vm721_vm3 = vcmp.lt.s32.totalorder %v702_v63, 1 }
  0xa8   : > { %v707_v9 = vshrl.u32 %v7749_v5, %v704_v0  ;;  %v710_v10 = vshrl.u32 %v7739_v7, %v704_v0  ;;  %v713_v12 = vshrl.u32 %v7745_v11, %v704_v0  ;;  %v705_v14 = vshrl.u32 %v7747_v3, %v704_v0 }
  0xa9   : > { %v716_v16 = vshrl.u32 %v7743_v15, %v704_v0  ;;  %v719_v19 = vshrl.u32 %v7741_v18, %v704_v0  ;;  %vm723_vm4 = vcmp.lt.s32.totalorder %v702_v63, 3  ;;  %vm724_vm5 = vcmp.lt.s32.totalorder %v702_v63, 4 }
  0xaa   : > { %v708_v20 = vor.u32 %v707_v9, %v706_v4  ;;  %v711_v21 = vor.u32 %v710_v10, %v709_v6  ;;  %v714_v22 = vor.u32 %v713_v12, %v712_v8  ;;  %vm722_vm6 = vcmp.lt.s32.totalorder %v702_v63, 2  ;;  %v2174_v63 = vld [vmem:[%s7726_s5 + $0x18] sm:$0xff] }
  0xab   : > { %v717_v23 = vor.u32 %v716_v16, %v715_v13  ;;  %v720_v24 = vor.u32 %v719_v19, %v718_v17  ;;  %v602_v44 = vshll.u32 %v7747_v3, %v4902_v57  ;;  %v603_v46 = vshrl.u32 %v7749_v5, %v4914_v2  ;;  %v1209_v16 = vld [vmem:[%s7724_s3] sm:$0xff]  ;;  %2192 = vperm.xlu0 %4594, %v2174_v63  }
  0xac   : > { %v725_v25 = vsel %vm721_vm3, %v705_v14, %v708_v20  ;;  %v726_v26 = vsel %vm724_vm5, %v714_v22, 2102212464  ;;  %v729_v27 = vsel %vm721_vm3, %v708_v20, %v711_v21  ;;  %v733_v28 = vsel %vm721_vm3, %v711_v21, %v714_v22  ;;  %1215 = vperm.xlu1 %4593, %v1209_v16  }
  0xad   : > { %v727_v29 = vsel %vm723_vm4, %v711_v21, %v726_v26  ;;  %v730_v30 = vsel %vm724_vm5, %v717_v23, 920167782  ;;  %v734_v35 = vsel %vm724_vm5, %v720_v24, 1326507024  ;;  %v601_v55 = vshrl.u32 %v7747_v3, %v4914_v2 }
  0xae   : > { %v728_v37 = vsel %vm722_vm6, %v725_v25, %v727_v29  ;;  %v731_v38 = vsel %vm723_vm4, %v714_v22, %v730_v30  ;;  %v735_v40 = vsel %vm723_vm4, %v717_v23, %v734_v35  ;;  %v605_v56 = vshll.u32 %v7749_v5, %v4902_v57  ;;  %v2173_v30 = vld [vmem:[%s7726_s5 + $0x10] sm:$0xff] }
  0xaf   : > { %v732_v42 = vsel %vm722_vm6, %v729_v27, %v731_v38  ;;  %v736_v43 = vsel %vm722_vm6, %v733_v28, %v735_v40  ;;  %v744_v53 = vmul.u32 %v4906_v60, %v728_v37  ;;  %v606_v58 = vshrl.u32 %v7739_v7, %v4914_v2 }
  0xb0   : > { %v4941_v48 = vmul.u32.u64.low %v4906_v60, %v736_v43  ;;  %v4942_v49 = vmul.u32.u64.high %v4906_v60, %v736_v43, %v4941_v48  ;;  %v4945_v50 = vmul.u32.u64.low %v4906_v60, %v732_v42  ;;  %v4946_v51 = vmul.u32.u64.high %v4906_v60, %v732_v42, %v4945_v50  ;;  %2187 = vperm.xlu1 %4593, %v2173_v30  }
  0xb1   : > { %v604_v0 = vor.u32 %v603_v46, %v602_v44  ;;  %v608_v4 = vshll.u32 %v7739_v7, %v4902_v57  ;;  %v609_v60 = vshrl.u32 %v7745_v11, %v4914_v2  ;;  %v612_v6 = vshrl.u32 %v7743_v15, %v4914_v2 }
  0xb2   : > { %v607_v8 = vor.u32 %v606_v58, %v605_v56  ;;  %v611_v9 = vshll.u32 %v7745_v11, %v4902_v57  ;;  %v614_v10 = vshll.u32 %v7743_v15, %v4902_v57  ;;  %v615_v12 = vshrl.u32 %v7741_v18, %v4914_v2  ;;  %v2172_v57 = vld [vmem:[%s7726_s5 + $0x8] sm:$0xff] }
  0xb3   : > { %vm746_vm7 = vc.u32 %v4942_v49, %v4945_v50  ;;  %v747_v13 = vadd.s32 1, %v4946_v51  ;;  %v610_v14 = vor.u32 %v609_v60, %v608_v4  ;;  %vm617_vm8 = vcmp.lt.s32.totalorder %v4909_v62, 1  ;;  %2182 = vperm.xlu0 %4594, %v2172_v57  }
  0xb4   : > { %v613_v17 = vor.u32 %v612_v6, %v611_v9  ;;  %v616_v19 = vor.u32 %v615_v12, %v614_v10  ;;  %vm618_vm9 = vcmp.lt.s32.totalorder %v4909_v62, 2  ;;  %vm620_vm10 = vcmp.lt.s32.totalorder %v4909_v62, 4  ;;  %v4375_v10 = vld [vmem:[%s7726_s5 + $0x30] sm:$0xff] }
  0xb5   : > { %v748_v2 = vsel %vm746_vm7, %v747_v13, %v4946_v51  ;;  %vm619_vm11 = vcmp.lt.s32.totalorder %v4909_v62, 3  ;;  %v622_v20 = vsel %vm620_vm10, %v610_v14, 2102212464  ;;  %v625_v21 = vsel %vm617_vm8, %v604_v0, %v607_v8  ;;  %v2171_v51 = vld [vmem:[%s7726_s5] sm:$0xff] }
  0xb6   : > { %v749_v22 = vadd.s32 %v748_v2, %v744_v53  ;;  %v621_v23 = vsel %vm617_vm8, %v601_v55, %v604_v0  ;;  %v626_v24 = vsel %vm620_vm10, %v613_v17, 920167782  ;;  %v629_v25 = vsel %vm617_vm8, %v607_v8, %v610_v14  ;;  %v4374_v55 = vld [vmem:[%s7726_s5 + $0x28] sm:$0xff]  ;;  %2177 = vperm.xlu1 %4593, %v2171_v51  }
  0xb7   : > { %v623_v26 = vsel %vm619_vm11, %v607_v8, %v622_v20  ;;  %v627_v27 = vsel %vm619_vm11, %v610_v14, %v626_v24  ;;  %v630_v28 = vsel %vm620_vm10, %v616_v19, 1326507024  ;;  %v633_v29 = vshll.u32 %v593_v61, 8  ;;  %3155 = vperm.xlu0 %4594, %v4376_v54  }
  0xb8   : > { %v4998_v35 = vsub.s32 32, %v4928_v36  ;;  %v750_v37 = vadd.s32 536870912, %v749_v22  ;;  %v628_v38 = vsel %vm618_vm9, %v625_v21, %v627_v27  ;;  %v631_v40 = vsel %vm619_vm11, %v613_v17, %v630_v28  ;;  %v4092_v17 = vld [vmem:[%s7728_s7] sm:$0x3] }
  0xb9   : > { %v632_v61 = vsel %vm618_vm9, %v629_v25, %v631_v40  ;;  %v5010_v41 = vmul.u32.u64.low %v633_v29, %v628_v38  ;;  %v5011_v42 = vmul.u32.u64.high %v633_v29, %v628_v38, %v5010_v41  ;;  %v624_v44 = vsel %vm618_vm9, %v621_v23, %v623_v26 }
  0xba   : > { %v5014_v43 = vshrl.u32 %v750_v37, 30  ;;  %v5018_v46 = vmul.u32.u64.low %v633_v29, %v632_v61  ;;  %v5019_v47 = vmul.u32.u64.high %v633_v29, %v632_v61, %v5018_v46  ;;  %v481_v48 = vand.u32 2147483647, %v4888_v34  ;;  %3150 = vperm.xlu1 %4593, %v4375_v10  }
  0xbb   : > { %v499_v62 = vshrl.u32 %v7749_v5, %v4998_v35  ;;  %v5035_v56 = vshrl.u32 %v4911_v1, 5  ;;  %v640_v58 = vmul.u32 %v633_v29, %v624_v44  ;;  %v643_v63 = vadd.s32 1, %v5011_v42  ;;  %3145 = vperm.xlu0 %4594, %v4374_v55  }
  0xbc   : > { %v752_v53 = vshll.u32 %v5014_v43, 30  ;;  %v502_v0 = vshrl.u32 %v7739_v7, %v4998_v35  ;;  %vm642_vm13 = vc.u32 %v5019_v47, %v5010_v41  ;;  %v498_v4 = vshll.u32 %v7747_v3, %v4928_v36 }
  0xbd   : > { %v505_v60 = vshrl.u32 %v7745_v11, %v4998_v35  ;;  %v644_v1 = vsel %vm642_vm13, %v643_v63, %v5011_v42  ;;  %v488_v6 = vand.u32 8388607, %v481_v48  ;;  %v501_v8 = vshll.u32 %v7749_v5, %v4928_v36 }
  0xbe   : > { %v5040_v59 = vsub.s32 %v749_v22, %v752_v53  ;;  %v504_v9 = vshll.u32 %v7739_v7, %v4928_v36  ;;  %v645_v13 = vadd.s32 %v644_v1, %v640_v58  ;;  %v500_v14 = vor.u32 %v499_v62, %v498_v4 }
  0xbf   : > { %v508_v16 = vshrl.u32 %v7743_v15, %v4998_v35  ;;  %v503_v19 = vor.u32 %v502_v0, %v501_v8  ;;  %v507_v57 = vshll.u32 %v7745_v11, %v4928_v36  ;;  %v510_v2 = vshll.u32 %v7743_v15, %v4928_v36  ;;  %v4373_v36 = vld [vmem:[%s7726_s5 + $0x20] sm:$0xff]  ;;  %4095 = vperm.xlu0 %4594, %v4092_v17  }
  0xc0   : > { %v755_v12 = vsub.s32 0, %v5040_v59  ;;  %v511_v20 = vshrl.u32 %v7741_v18, %v4998_v35  ;;  %v5071_v21 = vand.u32 31, %v5026_v52  ;;  %v506_v23 = vor.u32 %v505_v60, %v504_v9  ;;  %3140 = vperm.xlu1 %4593, %v4373_v36  }
  0xc1   : > { %v745_v24 = vadd.s32 %v4945_v50, %v4942_v49  ;;  %v646_v25 = vadd.s32 536870912, %v645_v13  ;;  %v509_v26 = vor.u32 %v508_v16, %v507_v57  ;;  %v489_v29 = vor.u32 8388608, %v488_v6 }
  0xc2   : > { %v4278_v22 = vmin.u32 %v755_v12, %v5040_v59  ;;  %v512_v27 = vor.u32 %v511_v20, %v510_v2  ;;  %vm513_vm15 = vcmp.lt.s32.totalorder %v5035_v56, 1  ;;  %vm516_vm0 = vcmp.lt.s32.totalorder %v5035_v56, 4 }
  0xc3   : > { %v5082_v30 = vshrl.u32 %v646_v25, 30  ;;  %vm515_vm1 = vcmp.lt.s32.totalorder %v5035_v56, 3  ;;  %v521_v49 = vsel %vm513_vm15, %v500_v14, %v503_v19  ;;  %v522_v50 = vsel %vm516_vm0, %v509_v26, 920167782 }
  0xc4   : > { %v757_v28 = vclz %v4278_v22  ;;  %v523_v38 = vsel %vm515_vm1, %v506_v23, %v522_v50  ;;  %v525_v40 = vsel %vm513_vm15, %v503_v19, %v506_v23  ;;  %v526_v54 = vsel %vm516_vm0, %v512_v27, 1326507024 }
  0xc5   : > { %v648_v61 = vshll.u32 %v5082_v30, 30  ;;  %v497_v42 = vshrl.u32 %v7747_v3, %v4998_v35  ;;  %vm514_vm2 = vcmp.lt.s32.totalorder %v5035_v56, 2  ;;  %v518_v44 = vsel %vm516_vm0, %v506_v23, 2102212464 }
  0xc6   : > { %v4279_v37 = vadd.s32 4294967294, %v757_v28  ;;  %v775_v46 = vsub.s32 4, %v5014_v43  ;;  %v524_v51 = vsel %vm514_vm2, %v521_v49, %v523_v38  ;;  %v527_v53 = vsel %vm515_vm1, %v509_v26, %v526_v54 }
  0xc7   : > { %v649_v55 = vsub.s32 %v645_v13, %v648_v61  ;;  %v528_v58 = vsel %vm514_vm2, %v525_v40, %v527_v53  ;;  %v529_v63 = vshll.u32 %v489_v29, 8  ;;  %v517_v4 = vsel %vm513_vm15, %v497_v42, %v500_v14 }
  0xc8   : > { %vm4280_vm3 = vcmp.lt.s32.totalorder %v4279_v37, 0  ;;  %v519_v60 = vsel %vm515_vm1, %v503_v19, %v518_v44  ;;  %v776_v17 = vsel %vm691_vm14, %v775_v46, %v5014_v43  ;;  %v392_v57 = vsub.s32 32, %v5071_v21 }
  0xc9   : > { %v760_v62 = vsel %vm4280_vm3, 0, %v4279_v37  ;;  %v651_v6 = vsub.s32 0, %v649_v55  ;;  %v5107_v8 = vmul.u32.u64.low %v529_v63, %v528_v58  ;;  %v5108_v9 = vmul.u32.u64.high %v529_v63, %v528_v58, %v5107_v8 }
  0xca   : > { %v761_v0 = vsub.s32 32, %v760_v62  ;;  %v765_v35 = vsub.s32 4294967266, %v760_v62  ;;  %v762_v1 = vshll.u32 %v5040_v59, %v760_v62  ;;  %v520_v59 = vsel %vm514_vm2, %v517_v4, %v519_v60 }
  0xcb   : > { %v5110_v13 = vmul.u32.u64.low %v529_v63, %v524_v51  ;;  %v5111_v16 = vmul.u32.u64.high %v529_v63, %v524_v51, %v5110_v13  ;;  %v4274_v14 = vmin.u32 %v651_v6, %v649_v55  ;;  %vm5122_vm4 = vcmp.le.f32.partialorder %v689_v39, 0.7853982 }
  0xcc   : > { %v763_v10 = vshrl.u32 %v745_v24, %v761_v0  ;;  %v766_v12 = vadd.s32 127, %v765_v35  ;;  %v377_v43 = vand.u32 2147483647, %v4886_v33  ;;  %v5131_v24 = vsel %vm5122_vm4, 0, %v776_v17 }
  0xcd   : > { %v653_v22 = vclz %v4274_v14  ;;  %vm538_vm5 = vc.u32 %v5108_v9, %v5110_v13  ;;  %v539_v56 = vadd.s32 1, %v5111_v16  ;;  %v5135_v25 = vshrl.u32 %v5026_v52, 5 }
  0xce   : > { %v764_v19 = vor.u32 %v763_v10, %v762_v1  ;;  %v767_v2 = vshll.u32 %v766_v12, 23  ;;  %v641_v39 = vadd.s32 %v5010_v41, %v5019_v47  ;;  %v536_v27 = vmul.u32 %v529_v63, %v520_v59 }
  0xcf   : > { %v4275_v26 = vadd.s32 4294967294, %v653_v22  ;;  %v540_v29 = vsel %vm538_vm5, %v539_v56, %v5111_v16  ;;  %v395_v49 = vshrl.u32 %v7749_v5, %v392_v57  ;;  %v5142_v50 = vand.u32 3, %v5131_v24 }
  0xd0   : > { %v768_v23 = vor.u32 4788187, %v767_v2  ;;  %v771_v28 = vcvt.s32.f32 %v764_v19  ;;  %v541_v37 = vadd.s32 %v540_v29, %v536_v27  ;;  %v384_v52 = vand.u32 8388607, %v377_v43 }
  0xd1   : > { %vm4276_vm6 = vcmp.lt.s32.totalorder %v4275_v26, 0  ;;  %v394_v41 = vshll.u32 %v7747_v3, %v5071_v21  ;;  %v397_v47 = vshll.u32 %v7749_v5, %v5071_v21  ;;  %v398_v44 = vshrl.u32 %v7739_v7, %v392_v57 }
  0xd2   : > { %v769_v36 = vand.u32 2147483647, %v768_v23  ;;  %v656_v40 = vsel %vm4276_vm6, 0, %v4275_v26  ;;  %v542_v42 = vadd.s32 536870912, %v541_v37  ;;  %v401_v62 = vshrl.u32 %v7745_v11, %v392_v57 }
  0xd3   : > { %v657_v54 = vsub.s32 32, %v656_v40  ;;  %v661_v61 = vsub.s32 4294967266, %v656_v40  ;;  %v658_v51 = vshll.u32 %v649_v55, %v656_v40  ;;  %v396_v53 = vor.u32 %v395_v49, %v394_v41 }
  0xd4   : > { %v772_v38 = vmul.f32 %v771_v28, %v769_v36  ;;  %v5152_v0 = vshrl.u32 %v542_v42, 30  ;;  %v404_v35 = vshrl.u32 %v7743_v15, %v392_v57  ;;  %v400_v60 = vshll.u32 %v7739_v7, %v5071_v21 }
  0xd5   : > { %v659_v58 = vshrl.u32 %v641_v39, %v657_v54  ;;  %v662_v63 = vadd.s32 127, %v661_v61  ;;  %v403_v1 = vshll.u32 %v7745_v11, %v5071_v21  ;;  %v407_v55 = vshrl.u32 %v7741_v18, %v392_v57 }
  0xd6   : > { %v773_v46 = vxor.u32 2147483648, %v772_v38  ;;  %v544_v12 = vshll.u32 %v5152_v0, 30  ;;  %v399_v16 = vor.u32 %v398_v44, %v397_v47  ;;  %v402_v17 = vor.u32 %v401_v62, %v400_v60 }
  0xd7   : > { %v660_v8 = vor.u32 %v659_v58, %v658_v51  ;;  %v663_v10 = vshll.u32 %v662_v63, 23  ;;  %v406_v14 = vshll.u32 %v7743_v15, %v5071_v21  ;;  %v405_v59 = vor.u32 %v404_v35, %v403_v1 }
  0xd8   : > { %v774_v4 = vsel %vm691_vm14, %v773_v46, %v772_v38  ;;  %v5168_v2 = vsub.s32 %v541_v37, %v544_v12  ;;  %v385_v23 = vor.u32 8388608, %v384_v52  ;;  %v393_v20 = vshrl.u32 %v7747_v3, %v392_v57 }
  0xd9   : > { %v777_v6 = vsel %vm5122_vm4, %v4884_v32, %v774_v4  ;;  %v664_v19 = vor.u32 4788187, %v663_v10  ;;  %v667_v22 = vcvt.s32.f32 %v660_v8  ;;  %v408_v56 = vor.u32 %v407_v55, %v406_v14 }
  0xda   : > { %4595 = vcosq.f32 %v777_v6  ;;  %v547_v26 = vsub.s32 0, %v5168_v2  ;;  %vm409_vm7 = vcmp.lt.s32.totalorder %v5135_v25, 1  ;;  %vm412_vm8 = vcmp.lt.s32.totalorder %v5135_v25, 4 }
  0xdb   : > { %4597 = vsinq.f32 %v777_v6  ;;  %v665_v39 = vand.u32 2147483647, %v664_v19  ;;  %vm411_vm9 = vcmp.lt.s32.totalorder %v5135_v25, 3  ;;  %v413_v21 = vsel %vm409_vm7, %v393_v20, %v396_v53 }
  0xdc   : > { %v414_v27 = vsel %vm412_vm8, %v402_v17, 2102212464  ;;  %v417_v36 = vsel %vm409_vm7, %v396_v53, %v399_v16  ;;  %v4270_v28 = vmin.u32 %v547_v26, %v5168_v2  ;;  %v418_v49 = vsel %vm412_vm8, %v405_v59, 920167782 }
  0xdd   : > { %v668_v57 = vmul.f32 %v667_v22, %v665_v39  ;;  %v415_v29 = vsel %vm411_vm9, %v399_v16, %v414_v27  ;;  %vm5188_vm10 = vcmp.le.f32.partialorder %v585_v45, 0.7853982  ;;  %vm587_vm11 = vcmp.lt.s32.totalorder %v4882_v31, 0 }
  0xde   : > { %v671_v52 = vsub.s32 4, %v5082_v30  ;;  %vm410_vm12 = vcmp.lt.s32.totalorder %v5135_v25, 2  ;;  %v549_v40 = vclz %v4270_v28  ;;  %v419_v41 = vsel %vm411_vm9, %v402_v17, %v418_v49 }
  0xdf   : > { %v669_v38 = vxor.u32 2147483648, %v668_v57  ;;  %v421_v47 = vsel %vm409_vm7, %v399_v16, %v402_v17  ;;  %vm1197_vm13 = vcmp.eq.s32.totalorder %v5142_v50, 0  ;;  %v416_v45 = vsel %vm410_vm12, %v413_v21, %v415_v29 }
  0xe0   : > { %v420_v54 = vsel %vm410_vm12, %v417_v36, %v419_v41  ;;  %v422_v61 = vsel %vm412_vm8, %v408_v56, 1326507024  ;;  %v425_v42 = vshll.u32 %v385_v23, 8  ;;  %vm1196_vm14 = vcmp.lt.s32.totalorder %v5142_v50, 2 }
  0xe1   : > { %v670_v44 = vsel %vm587_vm11, %v669_v38, %v668_v57  ;;  %v4271_v46 = vadd.s32 4294967294, %v549_v40  ;;  %v423_v51 = vsel %vm411_vm9, %v405_v59, %v422_v61  ;;  %v782_v53 = vadd.s32 3, %v5131_v24 }
  0xe2   : > { %vm781_vm15 = vweird.f32 %v4884_v32  ;;  %v673_v62 = vsel %vm5188_vm10, %v4882_v31, %v670_v44  ;;  %v424_v58 = vsel %vm410_vm12, %v421_v47, %v423_v51  ;;  %vm1200_vm1 = vcmp.eq.s32.totalorder %v5142_v50, 2 }
  0xe3   : > { %v5218_v63 = vmul.u32.u64.low %v425_v42, %v420_v54  ;;  %v5219_v35 = vmul.u32.u64.high %v425_v42, %v420_v54, %v5218_v63  ;;  %4599 = vcosq.f32 %v673_v62  ;;  %vm4272_vm0 = vcmp.lt.s32.totalorder %v4271_v46, 0 }
  0xe4   : > { %v5222_v4 = vmul.u32.u64.low %v425_v42, %v424_v58  ;;  %v5223_v60 = vmul.u32.u64.high %v425_v42, %v424_v58, %v5222_v4  ;;  %4601 = vsinq.f32 %v673_v62  ;;  %v552_v24 = vsel %vm4272_vm0, 0, %v4271_v46 }
  0xe5   : > { %v783_v1 = vand.u32 3, %v782_v53  ;;  %v672_v25 = vsel %vm587_vm11, %v671_v52, %v5082_v30  ;;  %v537_v6 = vadd.s32 %v5110_v13, %v5108_v9  ;;  %v553_v8 = vsub.s32 32, %v552_v24 }
  0xe6   : > { %v557_v10 = vsub.s32 4294967266, %v552_v24  ;;  %v554_v17 = vshll.u32 %v5168_v2, %v552_v24  ;;  %v432_v14 = vmul.u32 %v425_v42, %v416_v45  ;;  %v435_v19 = vadd.s32 1, %v5219_v35 }
  0xe7   : > { %v4596_v55 = vpop.eup %4595  ;;  %v555_v22 = vshrl.u32 %v537_v6, %v553_v8  ;;  %vm784_vm2 = vcmp.lt.s32.totalorder %v783_v1, 2  ;;  %vm434_vm3 = vc.u32 %v5223_v60, %v5218_v63  ;;  %vm785_vm4 = vcmp.eq.s32.totalorder %v783_v1, 0 }
  0xe8   : > { %v4598_v12 = vpop.eup %4597  ;;  %v789_v16 = vxor.u32 2147483648, %v4596_v55  ;;  %v558_v23 = vadd.s32 127, %v557_v10  ;;  %vm788_vm5 = vcmp.eq.s32.totalorder %v783_v1, 2  ;;  %v436_v2 = vsel %vm434_vm3, %v435_v19, %v5219_v35 }
  0xe9   : > { %v786_v59 = vxor.u32 2147483648, %v4598_v12  ;;  %v556_v9 = vor.u32 %v555_v22, %v554_v17  ;;  %v437_v39 = vadd.s32 %v436_v2, %v432_v14  ;;  %v5246_v36 = vsel %vm5188_vm10, 0, %v672_v25 }
  0xea   : > { %v1202_v20 = vsel %vm1200_vm1, %v789_v16, %v4598_v12  ;;  %v559_v13 = vshll.u32 %v558_v23, 23  ;;  %v790_v21 = vsel %vm788_vm5, %v789_v16, %v4598_v12  ;;  %v1092_v38 = vand.u32 3, %v5246_v36 }
  0xeb   : > { %v1199_v30 = vsel %vm1197_vm13, %v4596_v55, %v786_v59  ;;  %v787_v26 = vsel %vm785_vm4, %v4596_v55, %v786_v59  ;;  %v438_v29 = vadd.s32 536870912, %v437_v39  ;;  %v563_v52 = vcvt.s32.f32 %v556_v9 }
  0xec   : > { %v1203_v56 = vsel %vm1196_vm14, %v1199_v30, %v1202_v20  ;;  %v560_v57 = vor.u32 4788187, %v559_v13  ;;  %v791_v28 = vsel %vm784_vm2, %v787_v26, %v790_v21  ;;  %v7730_v41 = vmov 0.0  }
  0xed   : > { %v1204_v27 = vsel %vm781_vm15, nan, %v1203_v56  ;;  %v5251_v50 = vsel %vm781_vm15, nan, %v791_v28  ;;  %v5254_v40 = vshrl.u32 %v438_v29, 30  ;;  %1310 = vmatprep.mubr.f32.mxu0 %v7730_v41  ;;  %1322 = vmatprep.mubr.f32.mxu1 %v7730_v41  ;;  %vm1097_vm6 = vcmp.eq.s32.totalorder %v1092_v38, 2 }
  0xee   : > { %1270 = vmatprep.subr.mxu0 %v1204_v27  ;;  %4421 = vmatprep.subr.mxu1 %v1204_v27  ;;  %v561_v49 = vand.u32 2147483647, %v560_v57  ;;  %vm483_vm7 = vcmp.lt.s32.totalorder %v4888_v34, 0  ;;  %vm1094_vm8 = vcmp.eq.s32.totalorder %v1092_v38, 0  ;;  %vm5271_vm9 = vcmp.le.f32.partialorder %v481_v48, 0.7853982 }
  0xef   : > { %v440_v45 = vshll.u32 %v5254_v40, 30  ;;  %vm1093_vm10 = vcmp.lt.s32.totalorder %v1092_v38, 2  ;;  %vm677_vm11 = vweird.f32 %v4882_v31  ;;  %v567_v24 = vsub.s32 4, %v5152_v0 }
  0xf0   : > { %v564_v37 = vmul.f32 %v563_v52, %v561_v49  ;;  %v5258_v47 = vpop.eup %4599  ;;  %v433_v12 = vadd.s32 %v5218_v63, %v5223_v60  ;;  %vm573_vm0 = vweird.f32 %v4888_v34  ;;  %vm379_vm1 = vcmp.lt.s32.totalorder %v4886_v33, 0 }
  0xf1   : > { %v5261_v54 = vpop.eup %4601  ;;  %v685_v32 = vxor.u32 2147483648, %v5258_v47  ;;  %v441_v44 = vsub.s32 %v437_v39, %v440_v45  ;;  %v568_v25 = vsel %vm483_vm7, %v567_v24, %v5152_v0  ;;  %v463_v28 = vsub.s32 4, %v5254_v40 }
  0xf2   : > { %v565_v61 = vxor.u32 2147483648, %v564_v37  ;;  %v682_v42 = vxor.u32 2147483648, %v5261_v54  ;;  %v570_v8 = vsel %vm5271_vm9, 0, %v568_v25  ;;  %vm378_vm2 = vcmp.le.f32.partialorder %v377_v43, 0.7853982 }
  0xf3   : > { %v1099_v46 = vsel %vm1097_vm6, %v685_v32, %v5261_v54  ;;  %v443_v35 = vsub.s32 0, %v441_v44  ;;  %v989_v14 = vand.u32 3, %v570_v8  ;;  %v464_v52 = vsel %vm379_vm1, %v463_v28, %v5254_v40 }
  0xf4   : > { %v566_v53 = vsel %vm483_vm7, %v565_v61, %v564_v37  ;;  %v1096_v62 = vsel %vm1094_vm8, %v5258_v47, %v682_v42  ;;  %v466_v38 = vsel %vm378_vm2, 0, %v464_v52  ;;  %v678_v37 = vadd.s32 3, %v5246_v36 }
  0xf5   : > { %v569_v58 = vsel %vm5271_vm9, %v4888_v34, %v566_v53  ;;  %v1100_v4 = vsel %vm1093_vm10, %v1096_v62, %v1099_v46  ;;  %v4266_v1 = vmin.u32 %v443_v35, %v441_v44  ;;  %vm994_vm13 = vcmp.eq.s32.totalorder %v989_v14, 2  ;;  %v1206_v34 = vld [vmem:[%s7723_s2 + $0x8] sm:$0xff] }
  0xf6   : > { %4603 = vcosq.f32 %v569_v58  ;;  %v1101_v48 = vsel %vm677_vm11, nan, %v1100_v4  ;;  %vm991_vm14 = vcmp.eq.s32.totalorder %v989_v14, 0  ;;  %vm990_vm15 = vcmp.lt.s32.totalorder %v989_v14, 2 }
  0xf7   : > { %4605 = vsinq.f32 %v569_v58  ;;  %1271 = vmatpush1.msra.mxu0 %v1101_v48  ;;  %4425 = vmatpush1.msra.mxu1 %v1101_v48  ;;  %v445_v55 = vclz %v4266_v1  ;;  %v574_v45 = vadd.s32 3, %v570_v8  ;;  %v470_v61 = vadd.s32 3, %v466_v38 }
  0xf8   : > { %v886_v51 = vand.u32 3, %v466_v38 }
  0xf9   : > { %v4267_v6 = vadd.s32 4294967294, %v445_v55  ;;  %v575_v46 = vand.u32 3, %v574_v45  ;;  %v471_v53 = vand.u32 3, %v470_v61 }
  0xfa   : > { %vm888_vm8 = vcmp.eq.s32.totalorder %v886_v51, 0  ;;  %vm891_vm9 = vcmp.eq.s32.totalorder %v886_v51, 2 }
  0xfb   : > { %vm4268_vm12 = vcmp.lt.s32.totalorder %v4267_v6, 0  ;;  %vm577_vm6 = vcmp.eq.s32.totalorder %v575_v46, 0  ;;  %vm580_vm7 = vcmp.eq.s32.totalorder %v575_v46, 2  ;;  %vm473_vm10 = vcmp.eq.s32.totalorder %v471_v53, 0 }
  0xfc   : > { %v448_v10 = vsel %vm4268_vm12, 0, %v4267_v6  ;;  %vm476_vm12 = vcmp.eq.s32.totalorder %v471_v53, 2 }
  0xfd   : > { %v449_v16 = vsub.s32 32, %v448_v10  ;;  %v453_v17 = vsub.s32 4294967266, %v448_v10  ;;  %v450_v19 = vshll.u32 %v441_v44, %v448_v10  ;;  %v679_v44 = vand.u32 3, %v678_v37 }
  0xff   : > { %v451_v59 = vshrl.u32 %v433_v12, %v449_v16  ;;  %v454_v22 = vadd.s32 127, %v453_v17  ;;  %vm680_vm3 = vcmp.lt.s32.totalorder %v679_v44, 2  ;;  %vm681_vm4 = vcmp.eq.s32.totalorder %v679_v44, 0  ;;  %v1205_v12 = vld [vmem:[%s7723_s2] sm:$0xff]  ;;  %v1207_v16 = vld [vmem:[%s7723_s2 + $0x10] sm:$0xff] }
 0x100   : > { %vm684_vm5 = vcmp.eq.s32.totalorder %v679_v44, 2  ;;  %v683_v40 = vsel %vm681_vm4, %v5258_v47, %v682_v42 }
 0x101   : > { %v452_v20 = vor.u32 %v451_v59, %v450_v19  ;;  %v455_v30 = vshll.u32 %v454_v22, 23  ;;  %v686_v36 = vsel %vm684_vm5, %v685_v32, %v5261_v54 }
 0x102   : > { %v687_v6 = vsel %vm680_vm3, %v683_v40, %v686_v36 }
 0x103   : > { %v4604_v23 = vpop.eup %4603  ;;  %v456_v2 = vor.u32 4788187, %v455_v30  ;;  %v459_v63 = vcvt.s32.f32 %v452_v20  ;;  %v688_v8 = vsel %vm677_vm11, nan, %v687_v6 }
 0x104   : > { %v4606_v9 = vpop.eup %4605  ;;  %v581_v0 = vxor.u32 2147483648, %v4604_v23 }
 0x105   : > { %v578_v13 = vxor.u32 2147483648, %v4606_v9  ;;  %v457_v26 = vand.u32 2147483647, %v456_v2 }
 0x106   : > { %v996_v56 = vsel %vm994_vm13, %v581_v0, %v4606_v9  ;;  %v582_v24 = vsel %vm580_vm7, %v581_v0, %v4606_v9  ;;  %vm887_vm13 = vcmp.lt.s32.totalorder %v886_v51, 2 }
 0x107   : > { %v993_v39 = vsel %vm991_vm14, %v4604_v23, %v578_v13  ;;  %v460_v27 = vmul.f32 %v459_v63, %v457_v26  ;;  %v579_v48 = vsel %vm577_vm6, %v4604_v23, %v578_v13  ;;  %vm469_vm14 = vweird.f32 %v4886_v33 }
 0x108   : > { %v997_v60 = vsel %vm990_vm15, %v993_v39, %v996_v56  ;;  %vm576_vm15 = vcmp.lt.s32.totalorder %v575_v46, 2 }
 0x109   : > { %v998_v21 = vsel %vm573_vm0, nan, %v997_v60  ;;  %v461_v57 = vxor.u32 2147483648, %v460_v27  ;;  %v583_v54 = vsel %vm576_vm15, %v579_v48, %v582_v24 }
 0x10a   : > { %1272 = vmatprep.subr.mxu0 %v998_v21  ;;  %4422 = vmatprep.subr.mxu1 %v998_v21  ;;  %v584_v10 = vsel %vm573_vm0, nan, %v583_v54 }
 0x10b   : > { %v462_v29 = vsel %vm379_vm1, %v461_v57, %v460_v27  ;;  %vm472_vm1 = vcmp.lt.s32.totalorder %v471_v53, 2 }
 0x10c   : > { %v465_v49 = vsel %vm378_vm2, %v4886_v33, %v462_v29  ;;  %vm1233_vm2 = vcmask 261120  }
 0x10d   : > { %4607 = vcosq.f32 %v465_v49 }
 0x10e   : > { %4609 = vsinq.f32 %v465_v49 }
 0x11a   : > { %v4608_v62 = vpop.eup %4607  ;;  %v5342_v33 = vpop.permute.xlu1 %1230 }
 0x11b   : > { %v4610_v43 = vpop.eup %4609  ;;  %v477_v58 = vxor.u32 2147483648, %v4608_v62 }
 0x11c   : > { %v474_v35 = vxor.u32 2147483648, %v4610_v43  ;;  %v5346_v14 = vpop.permute.xlu0 %1225 }
 0x11d   : > { %v893_v4 = vsel %vm891_vm9, %v477_v58, %v4610_v43  ;;  %v478_v25 = vsel %vm476_vm12, %v477_v58, %v4610_v43 }
 0x11e   : > { %v890_v1 = vsel %vm888_vm8, %v4608_v62, %v474_v35  ;;  %v475_v55 = vsel %vm473_vm10, %v4608_v62, %v474_v35  ;;  %v5344_v17 = vpop.permute.xlu1 %1220 }
 0x11f   : > { %v894_v42 = vsel %vm887_vm13, %v890_v1, %v893_v4  ;;  %v479_v32 = vsel %vm472_vm1, %v475_v55, %v478_v25 }
 0x120   : > { %v895_v47 = vsel %vm469_vm14, nan, %v894_v42  ;;  %v480_v31 = vsel %vm469_vm14, nan, %v479_v32 }
 0x121   : > { %1273 = vmatpush1.msra.mxu0 %v895_v47  ;;  %4426 = vmatpush1.msra.mxu1 %v895_v47 }
 0x122   : > { %1274 = vmatprep.subr.mxu0 %v5251_v50  ;;  %4423 = vmatprep.subr.mxu1 %v5251_v50  ;;  %v1208_v50 = vld [vmem:[%s7723_s2 + $0x18] sm:$0xff] }
 0x123   : > { %1275 = vmatpush1.msra.mxu0 %v688_v8  ;;  %4427 = vmatpush1.msra.mxu1 %v688_v8 }
 0x124   : > { %1276 = vmatprep.subr.mxu0 %v584_v10  ;;  %4424 = vmatprep.subr.mxu1 %v584_v10 }
 0x125   : > { %1277 = vmatpush1.msra.mxu0 %v480_v31  ;;  %4428 = vmatpush1.msra.mxu1 %v480_v31 }
 0x126   : > { %4297 = vmatmul.mubr.msk.f32.vlgmr.msra.gmra.mxu0 %vm1233_vm2, %v1205_v12  ;;  %4299 = vmatmul.mubr.msk.f32.vlgmr.msra.gmra.mxu1 %vm1233_vm2, %v1207_v16 }
 0x127   : > { %1316 = vmatprep.mubr.f32.mxu0 %v7730_v41  ;;  %1328 = vmatprep.mubr.f32.mxu1 %v7730_v41  ;;  %v1216_v19 = vpop.permute.xlu1 %1215 }
 0x12a   : > { %4298 = vmatmul.mubr.msk.f32.gmra.mxu0 %vm1233_vm2, %v1206_v34  ;;  %4300 = vmatmul.mubr.msk.f32.gmra.mxu1 %vm1233_vm2, %v1208_v50 }
 0x12b   : > { %2271 = vmatprep.mubr.f32.mxu1 %v7730_v41  ;;  %3234 = vmatprep.mubr.f32.mxu0 %v7730_v41 }
 0x1e6   : > { %v1312_v59 = vpop.f32.mrf.mxu0  ;;  %v1324_v22 = vpop.f32.mrf.mxu1 }
 0x1e7   : > { %v5348_v23 = vadd.f32 %v1312_v59, %v1216_v19  ;;  %v5351_v20 = vadd.f32 %v1324_v22, %v5346_v14 }
 0x1e8   : > { %v1314_v56 = vpop.f32.mrf.mxu0 }
 0x1e9   : > { %v1338_v30 = vand.u32 2139095040, %v5348_v23  ;;  %v1754_v9 = vand.u32 2139095040, %v5351_v20  ;;  %v7737_v26 = vand.u32 2147483647, %v5348_v23  ;;  %v5356_v21 = vadd.f32 %v1314_v56, %v1216_v19 }
 0x1eb   : > { %v1339_v0 = vshrl.u32 %v1338_v30, 23  ;;  %v1755_v13 = vshrl.u32 %v1754_v9, 23  ;;  %v1342_v57 = vand.u32 8388607, %v7737_v26  ;;  %v1442_v29 = vand.u32 2139095040, %v5356_v21 }
 0x1ed   : > { %v4301_v2 = vadd.s32 4294967169, %v1339_v0  ;;  %v4317_v39 = vadd.s32 4294967169, %v1755_v13  ;;  %v1343_v51 = vor.u32 8388608, %v1342_v57  ;;  %v1443_v55 = vshrl.u32 %v1442_v29, 23 }
 0x1ee   : > { %v7736_v0 = vand.u32 2147483647, %v5351_v20 }
 0x1ef   : > { %v1345_v63 = vadd.s32 1, %v4301_v2  ;;  %v1761_v60 = vadd.s32 1, %v4317_v39  ;;  %v1383_v6 = vshll.u32 %v1343_v51, 8  ;;  %v4305_v50 = vadd.s32 4294967169, %v1443_v55  ;;  %v1326_v2 = vpop.f32.mrf.mxu1 }
 0x1f1   : > { %vm1346_vm11 = vcmp.gt.s32.totalorder %v1345_v63, 0  ;;  %vm1762_vm0 = vcmp.gt.s32.totalorder %v1761_v60, 0 }
 0x1f2   : > { %v1347_v27 = vsel %vm1346_vm11, %v1345_v63, 0  ;;  %v1763_v46 = vsel %vm1762_vm0, %v1761_v60, 0 }
 0x1f3   : > { %v1349_v28 = vand.u32 31, %v1347_v27  ;;  %v1348_v45 = vshrl.u32 %v1347_v27, 5  ;;  %v1765_v48 = vand.u32 31, %v1763_v46  ;;  %v5389_v13 = vshrl.u32 %v1763_v46, 5 }
 0x1f5   : > { %v1350_v49 = vsub.s32 32, %v1349_v28  ;;  %v1352_v52 = vshll.u32 %v7747_v3, %v1349_v28  ;;  %v1355_v38 = vshll.u32 %v7749_v5, %v1349_v28  ;;  %v1358_v37 = vshll.u32 %v7739_v7, %v1349_v28 }
 0x1f6   : > { %v1361_v61 = vshll.u32 %v7745_v11, %v1349_v28  ;;  %v1364_v44 = vshll.u32 %v7743_v15, %v1349_v28  ;;  %vm1367_vm3 = vcmp.lt.s32.totalorder %v1348_v45, 1  ;;  %vm1370_vm4 = vcmp.lt.s32.totalorder %v1348_v45, 4 }
 0x1f7   : > { %v1353_v53 = vshrl.u32 %v7749_v5, %v1350_v49  ;;  %v1356_v62 = vshrl.u32 %v7739_v7, %v1350_v49  ;;  %v1359_v43 = vshrl.u32 %v7745_v11, %v1350_v49  ;;  %v1362_v58 = vshrl.u32 %v7743_v15, %v1350_v49 }
 0x1f8   : > { %v1365_v40 = vshrl.u32 %v7741_v18, %v1350_v49  ;;  %v1351_v47 = vshrl.u32 %v7747_v3, %v1350_v49  ;;  %vm1369_vm5 = vcmp.lt.s32.totalorder %v1348_v45, 3  ;;  %vm1368_vm6 = vcmp.lt.s32.totalorder %v1348_v45, 2 }
 0x1f9   : > { %v1354_v36 = vor.u32 %v1353_v53, %v1352_v52  ;;  %v1357_v35 = vor.u32 %v1356_v62, %v1355_v38  ;;  %v1360_v4 = vor.u32 %v1359_v43, %v1358_v37  ;;  %v1363_v24 = vor.u32 %v1362_v58, %v1361_v61 }
 0x1fa   : > { %v1366_v1 = vor.u32 %v1365_v40, %v1364_v44  ;;  %v5376_v12 = vsub.s32 32, %v1765_v48  ;;  %v1777_v39 = vshll.u32 %v7745_v11, %v1765_v48  ;;  %v1780_v29 = vshll.u32 %v7743_v15, %v1765_v48 }
 0x1fb   : > { %v1375_v25 = vsel %vm1367_vm3, %v1354_v36, %v1357_v35  ;;  %v1379_v42 = vsel %vm1367_vm3, %v1357_v35, %v1360_v4  ;;  %v1376_v54 = vsel %vm1370_vm4, %v1363_v24, 920167782  ;;  %v1372_v16 = vsel %vm1370_vm4, %v1360_v4, 2102212464 }
 0x1fc   : > { %v1380_v32 = vsel %vm1370_vm4, %v1366_v1, 1326507024  ;;  %v1377_v8 = vsel %vm1369_vm5, %v1360_v4, %v1376_v54  ;;  %v1371_v9 = vsel %vm1367_vm3, %v1351_v47, %v1354_v36  ;;  %v1373_v56 = vsel %vm1369_vm5, %v1357_v35, %v1372_v16 }
 0x1fd   : > { %v1381_v10 = vsel %vm1369_vm5, %v1363_v24, %v1380_v32  ;;  %v1378_v31 = vsel %vm1368_vm6, %v1375_v25, %v1377_v8  ;;  %v1778_v63 = vshrl.u32 %v7743_v15, %v5376_v12  ;;  %v1781_v60 = vshrl.u32 %v7741_v18, %v5376_v12 }
 0x1fe   : > { %v1382_v34 = vsel %vm1368_vm6, %v1379_v42, %v1381_v10  ;;  %v5383_v22 = vmul.u32.u64.low %v1383_v6, %v1378_v31  ;;  %v5384_v30 = vmul.u32.u64.high %v1383_v6, %v1378_v31, %v5383_v22  ;;  %v1769_v27 = vshrl.u32 %v7749_v5, %v5376_v12 }
 0x1ff   : > { %v5380_v19 = vmul.u32.u64.low %v1383_v6, %v1382_v34  ;;  %v5381_v59 = vmul.u32.u64.high %v1383_v6, %v1382_v34, %v5380_v19  ;;  %v1772_v57 = vshrl.u32 %v7739_v7, %v5376_v12  ;;  %v1775_v28 = vshrl.u32 %v7745_v11, %v5376_v12 }
 0x200   : > { %v1768_v49 = vshll.u32 %v7747_v3, %v1765_v48  ;;  %v1779_v52 = vor.u32 %v1778_v63, %v1777_v39  ;;  %v1449_v38 = vadd.s32 1, %v4305_v50  ;;  %v5406_v37 = vadd.f32 %v1326_v2, %v5346_v14 }
 0x201   : > { %v1393_v61 = vadd.s32 1, %v5384_v30  ;;  %v1771_v44 = vshll.u32 %v7749_v5, %v1765_v48  ;;  %v1774_v46 = vshll.u32 %v7739_v7, %v1765_v48  ;;  %v1782_v51 = vor.u32 %v1781_v60, %v1780_v29 }
 0x202   : > { %v1374_v53 = vsel %vm1368_vm6, %v1371_v9, %v1373_v56  ;;  %vm1392_vm7 = vc.u32 %v5381_v59, %v5383_v22  ;;  %v1758_v62 = vand.u32 8388607, %v7736_v0  ;;  %v1770_v43 = vor.u32 %v1769_v27, %v1768_v49 }
 0x203   : > { %v1773_v58 = vor.u32 %v1772_v57, %v1771_v44  ;;  %v1776_v40 = vor.u32 %v1775_v28, %v1774_v46  ;;  %vm1786_vm8 = vcmp.lt.s32.totalorder %v5389_v13, 4  ;;  %vm1450_vm9 = vcmp.gt.s32.totalorder %v1449_v38, 0 }
 0x204   : > { %v1792_v14 = vsel %vm1786_vm8, %v1779_v52, 920167782  ;;  %v1394_v36 = vsel %vm1392_vm7, %v1393_v61, %v5384_v30  ;;  %v1796_v45 = vsel %vm1786_vm8, %v1782_v51, 1326507024  ;;  %v1858_v35 = vand.u32 2139095040, %v5406_v37 }
 0x205   : > { %v1390_v4 = vmul.u32 %v1383_v6, %v1374_v53  ;;  %vm1783_vm10 = vcmp.lt.s32.totalorder %v5389_v13, 1  ;;  %vm1785_vm12 = vcmp.lt.s32.totalorder %v5389_v13, 3  ;;  %v1451_v48 = vsel %vm1450_vm9, %v1449_v38, 0 }
 0x206   : > { %v1759_v24 = vor.u32 8388608, %v1758_v62  ;;  %v1791_v1 = vsel %vm1783_vm10, %v1770_v43, %v1773_v58  ;;  %v1793_v55 = vsel %vm1785_vm12, %v1776_v40, %v1792_v14  ;;  %v1795_v42 = vsel %vm1783_vm10, %v1773_v58, %v1776_v40 }
 0x207   : > { %v1395_v25 = vadd.s32 %v1394_v36, %v1390_v4  ;;  %v1797_v47 = vsel %vm1785_vm12, %v1779_v52, %v1796_v45  ;;  %v1453_v6 = vand.u32 31, %v1451_v48  ;;  %vm1784_vm13 = vcmp.lt.s32.totalorder %v5389_v13, 2 }
 0x208   : > { %v1859_v54 = vshrl.u32 %v1858_v35, 23  ;;  %v1794_v32 = vsel %vm1784_vm13, %v1791_v1, %v1793_v55  ;;  %v1798_v8 = vsel %vm1784_vm13, %v1795_v42, %v1797_v47  ;;  %v1799_v10 = vshll.u32 %v1759_v24, 8  ;;  %v1318_v35 = vpop.f32.mrf.mxu0 }
 0x209   : > { %v1396_v16 = vadd.s32 536870912, %v1395_v25  ;;  %v1454_v31 = vsub.s32 32, %v1453_v6  ;;  %v1788_v30 = vsel %vm1786_vm8, %v1776_v40, 2102212464  ;;  %v1767_v56 = vshrl.u32 %v7747_v3, %v5376_v12 }
 0x20a   : > { %v5438_v34 = vmul.u32.u64.low %v1799_v10, %v1794_v32  ;;  %v5439_v50 = vmul.u32.u64.high %v1799_v10, %v1794_v32, %v5438_v34  ;;  %v4321_v19 = vadd.s32 4294967169, %v1859_v54  ;;  %v7732_v63 = vand.u32 2147483647, %v5356_v21 }
 0x20b   : > { %v5444_v9 = vmul.u32.u64.low %v1799_v10, %v1798_v8  ;;  %v5445_v2 = vmul.u32.u64.high %v1799_v10, %v1798_v8, %v5444_v9  ;;  %v5449_v39 = vshrl.u32 %v1396_v16, 30  ;;  %v1465_v60 = vshll.u32 %v7745_v11, %v1453_v6 }
 0x20c   : > { %v1466_v27 = vshrl.u32 %v7743_v15, %v1454_v31  ;;  %v1787_v57 = vsel %vm1783_vm10, %v1767_v56, %v1770_v43  ;;  %v1789_v28 = vsel %vm1785_vm12, %v1773_v58, %v1788_v30  ;;  %v5458_v29 = vshrl.u32 %v1451_v48, 5 }
 0x20d   : > { %7798 = vst [vmem:[#allocation5_spill] sm:$0xff] %v5449_v39  ;;  %v1865_v49 = vadd.s32 1, %v4321_v19  ;;  %v1456_v52 = vshll.u32 %v7747_v3, %v1453_v6  ;;  %v1457_v12 = vshrl.u32 %v7749_v5, %v1454_v31  ;;  %v1459_v38 = vshll.u32 %v7749_v5, %v1453_v6 }
 0x20e   : > { %v1460_v61 = vshrl.u32 %v7739_v7, %v1454_v31  ;;  %v1462_v44 = vshll.u32 %v7739_v7, %v1453_v6  ;;  %v1463_v46 = vshrl.u32 %v7745_v11, %v1454_v31  ;;  %v1468_v51 = vshll.u32 %v7743_v15, %v1453_v6 }
 0x20f   : > { %v1469_v53 = vshrl.u32 %v7741_v18, %v1454_v31  ;;  %v1398_v62 = vshll.u32 %v5449_v39, 30  ;;  %v1467_v43 = vor.u32 %v1466_v27, %v1465_v60  ;;  %v1809_v58 = vadd.s32 1, %v5439_v50 }
 0x210   : > { %v1446_v40 = vand.u32 8388607, %v7732_v63  ;;  %v1790_v14 = vsel %vm1784_vm13, %v1787_v57, %v1789_v28  ;;  %vm1808_vm14 = vc.u32 %v5445_v2, %v5438_v34  ;;  %v1458_v36 = vor.u32 %v1457_v12, %v1456_v52 }
 0x211   : > { %v1461_v45 = vor.u32 %v1460_v61, %v1459_v38  ;;  %v1464_v4 = vor.u32 %v1463_v46, %v1462_v44  ;;  %v1470_v48 = vor.u32 %v1469_v53, %v1468_v51  ;;  %vm1474_vm15 = vcmp.lt.s32.totalorder %v5458_v29, 4 }
 0x212   : > { %vm1866_vm1 = vcmp.gt.s32.totalorder %v1865_v49, 0  ;;  %v5477_v24 = vsub.s32 %v1395_v25, %v1398_v62  ;;  %v1480_v1 = vsel %vm1474_vm15, %v1467_v43, 920167782  ;;  %v1810_v13 = vsel %vm1808_vm14, %v1809_v58, %v5439_v50 }
 0x213   : > { %v1867_v55 = vsel %vm1866_vm1, %v1865_v49, 0  ;;  %v7734_v42 = vand.u32 2147483647, %v5406_v37  ;;  %v5484_v47 = vadd.f32 %v1318_v35, %v5344_v17  ;;  %v1806_v6 = vmul.u32 %v1799_v10, %v1790_v14 }
 0x214   : > { %vm1471_vm11 = vcmp.lt.s32.totalorder %v5458_v29, 1  ;;  %vm1473_vm0 = vcmp.lt.s32.totalorder %v5458_v29, 3  ;;  %v1869_v54 = vand.u32 31, %v1867_v55  ;;  %v1447_v32 = vor.u32 8388608, %v1446_v40 }
 0x215   : > { %v1479_v25 = vsel %vm1471_vm11, %v1458_v36, %v1461_v45  ;;  %v1481_v8 = vsel %vm1473_vm0, %v1464_v4, %v1480_v1  ;;  %v1484_v16 = vsel %vm1474_vm15, %v1470_v48, 1326507024  ;;  %v1401_v50 = vsub.s32 0, %v5477_v24 }
 0x216   : > { %v1811_v19 = vadd.s32 %v1810_v13, %v1806_v6  ;;  %v5495_v30 = vsub.s32 32, %v1869_v54  ;;  %vm1472_vm3 = vcmp.lt.s32.totalorder %v5458_v29, 2  ;;  %v1483_v9 = vsel %vm1471_vm11, %v1461_v45, %v1464_v4 }
 0x217   : > { %v1482_v10 = vsel %vm1472_vm3, %v1479_v25, %v1481_v8  ;;  %v1485_v56 = vsel %vm1473_vm0, %v1467_v43, %v1484_v16  ;;  %v1455_v60 = vshrl.u32 %v7747_v3, %v1454_v31  ;;  %v5505_v27 = vshll.u32 %v1447_v32, 8 }
 0x218   : > { %v1862_v57 = vand.u32 8388607, %v7734_v42  ;;  %v1546_v28 = vand.u32 2139095040, %v5484_v47  ;;  %v4302_v49 = vmin.u32 %v1401_v50, %v5477_v24  ;;  %v1812_v52 = vadd.s32 536870912, %v1811_v19 }
 0x219   : > { %v1873_v12 = vshrl.u32 %v7749_v5, %v5495_v30  ;;  %v1876_v38 = vshrl.u32 %v7739_v7, %v5495_v30  ;;  %v1486_v61 = vsel %vm1472_vm3, %v1483_v9, %v1485_v56  ;;  %v1879_v46 = vshrl.u32 %v7745_v11, %v5495_v30 }
 0x21a   : > { %v5518_v31 = vmul.u32.u64.low %v5505_v27, %v1482_v10  ;;  %v5519_v44 = vmul.u32.u64.high %v5505_v27, %v1482_v10, %v5518_v31  ;;  %v5524_v51 = vshrl.u32 %v1867_v55, 5  ;;  %v1872_v53 = vshll.u32 %v7747_v3, %v1869_v54 }
 0x21b   : > { %v1875_v62 = vshll.u32 %v7749_v5, %v1869_v54  ;;  %v1878_v43 = vshll.u32 %v7739_v7, %v1869_v54  ;;  %v1881_v58 = vshll.u32 %v7745_v11, %v1869_v54  ;;  %v1882_v40 = vshrl.u32 %v7743_v15, %v5495_v30 }
 0x21c   : > { %v1884_v14 = vshll.u32 %v7743_v15, %v1869_v54  ;;  %v1885_v35 = vshrl.u32 %v7741_v18, %v5495_v30  ;;  %v5536_v48 = vmul.u32.u64.low %v5505_v27, %v1486_v61  ;;  %v5537_v1 = vmul.u32.u64.high %v5505_v27, %v1486_v61, %v5536_v48 }
 0x21d   : > { %v1874_v55 = vor.u32 %v1873_v12, %v1872_v53  ;;  %v1877_v13 = vor.u32 %v1876_v38, %v1875_v62  ;;  %v1476_v6 = vsel %vm1474_vm15, %v1464_v4, 2102212464  ;;  %v1880_v32 = vor.u32 %v1879_v46, %v1878_v43 }
 0x21e   : > { %v1883_v25 = vor.u32 %v1882_v40, %v1881_v58  ;;  %v1886_v8 = vor.u32 %v1885_v35, %v1884_v14  ;;  %v5541_v16 = vshrl.u32 %v1812_v52, 30  ;;  %v1863_v50 = vor.u32 8388608, %v1862_v57 }
 0x21f   : > { %v1403_v10 = vclz %v4302_v49  ;;  %vm1887_vm4 = vcmp.lt.s32.totalorder %v5524_v51, 1  ;;  %v1547_v54 = vshrl.u32 %v1546_v28, 23  ;;  %v1475_v9 = vsel %vm1471_vm11, %v1455_v60, %v1458_v36 }
 0x220   : > { %v1477_v56 = vsel %vm1473_vm0, %v1461_v45, %v1476_v6  ;;  %vm1890_vm5 = vcmp.lt.s32.totalorder %v5524_v51, 4  ;;  %v1895_v4 = vsel %vm1887_vm4, %v1874_v55, %v1877_v13  ;;  %vm1889_vm6 = vcmp.lt.s32.totalorder %v5524_v51, 3 }
 0x221   : > { %v1896_v57 = vsel %vm1890_vm5, %v1883_v25, 920167782  ;;  %v1899_v49 = vsel %vm1887_vm4, %v1877_v13, %v1880_v32  ;;  %v1900_v28 = vsel %vm1890_vm5, %v1886_v8, 1326507024  ;;  %v1814_v36 = vshll.u32 %v5541_v16, 30 }
 0x222   : > { %vm1888_vm7 = vcmp.lt.s32.totalorder %v5524_v51, 2  ;;  %v1897_v45 = vsel %vm1889_vm6, %v1880_v32, %v1896_v57  ;;  %v5562_v60 = vshll.u32 %v1863_v50, 8  ;;  %v1497_v52 = vadd.s32 1, %v5519_v44 }
 0x223   : > { %v1898_v12 = vsel %vm1888_vm7, %v1895_v4, %v1897_v45  ;;  %v1901_v38 = vsel %vm1889_vm6, %v1883_v25, %v1900_v28  ;;  %v4309_v61 = vadd.s32 4294967169, %v1547_v54  ;;  %v4303_v46 = vadd.s32 4294967294, %v1403_v10  ;;  %v1330_v54 = vpop.f32.mrf.mxu1 }
 0x224   : > { %v1478_v53 = vsel %vm1472_vm3, %v1475_v9, %v1477_v56  ;;  %vm1496_vm8 = vc.u32 %v5537_v1, %v5518_v31  ;;  %v1902_v62 = vsel %vm1888_vm7, %v1899_v49, %v1901_v38  ;;  %v5584_v35 = vsub.s32 %v1811_v19, %v1814_v36 }
 0x225   : > { %v5576_v43 = vmul.u32.u64.low %v5562_v60, %v1902_v62  ;;  %v5577_v58 = vmul.u32.u64.high %v5562_v60, %v1902_v62, %v5576_v43  ;;  %v5580_v40 = vmul.u32.u64.low %v5562_v60, %v1898_v12  ;;  %v5581_v14 = vmul.u32.u64.high %v5562_v60, %v1898_v12, %v5580_v40 }
 0x226   : > { %v1892_v29 = vsel %vm1890_vm5, %v1880_v32, 2102212464  ;;  %v1553_v48 = vadd.s32 1, %v4309_v61  ;;  %v1498_v6 = vsel %vm1496_vm8, %v1497_v52, %v5519_v44  ;;  %v1871_v25 = vshrl.u32 %v7747_v3, %v5495_v30 }
 0x227   : > { %v7733_v8 = vand.u32 2147483647, %v5484_v47  ;;  %vm4304_vm9 = vcmp.lt.s32.totalorder %v4303_v46, 0  ;;  %v1494_v50 = vmul.u32 %v5505_v27, %v1478_v53  ;;  %v1893_v19 = vsel %vm1889_vm6, %v1877_v13, %v1892_v29 }
 0x228   : > { %v1891_v10 = vsel %vm1887_vm4, %v1871_v25, %v1874_v55  ;;  %v1817_v32 = vsub.s32 0, %v5584_v35  ;;  %vm1554_vm10 = vcmp.gt.s32.totalorder %v1553_v48, 0  ;;  %v5600_v44 = vsel %vm4304_vm9, 0, %v4303_v46 }
 0x229   : > { %v5598_v9 = vadd.s32 %v1498_v6, %v1494_v50  ;;  %v1913_v30 = vadd.s32 1, %v5581_v14  ;;  %v1550_v56 = vand.u32 8388607, %v7733_v8  ;;  %v1555_v27 = vsel %vm1554_vm10, %v1553_v48, 0 }
 0x22a   : > { %v1894_v55 = vsel %vm1888_vm7, %v1891_v10, %v1893_v19  ;;  %vm1912_vm12 = vc.u32 %v5577_v58, %v5580_v40  ;;  %v5610_v13 = vadd.f32 %v1330_v54, %v5342_v33  ;;  %v1557_v4 = vand.u32 31, %v1555_v27 }
 0x22b   : > { %v1411_v57 = vsub.s32 4294967266, %v5600_v44  ;;  %v4318_v49 = vmin.u32 %v1817_v32, %v5584_v35  ;;  %v1500_v28 = vadd.s32 536870912, %v5598_v9  ;;  %v1910_v36 = vmul.u32 %v5562_v60, %v1894_v55  ;;  %v1320_v60 = vpop.f32.mrf.mxu0 }
 0x22c   : > { %v1914_v45 = vsel %vm1912_vm12, %v1913_v30, %v5581_v14  ;;  %v1551_v52 = vor.u32 8388608, %v1550_v56  ;;  %v1558_v51 = vsub.s32 32, %v1557_v4  ;;  %v1556_v12 = vshrl.u32 %v1555_v27, 5 }
 0x22d   : > { %v1560_v38 = vshll.u32 %v7747_v3, %v1557_v4  ;;  %v1563_v61 = vshll.u32 %v7749_v5, %v1557_v4  ;;  %v1962_v46 = vand.u32 2139095040, %v5610_v13  ;;  %v1566_v43 = vshll.u32 %v7739_v7, %v1557_v4 }
 0x22e   : > { %v1561_v53 = vshrl.u32 %v7749_v5, %v1558_v51  ;;  %v1564_v62 = vshrl.u32 %v7739_v7, %v1558_v51  ;;  %v1567_v29 = vshrl.u32 %v7745_v11, %v1558_v51  ;;  %v1569_v14 = vshll.u32 %v7745_v11, %v1557_v4 }
 0x22f   : > { %v1570_v48 = vshrl.u32 %v7743_v15, %v1558_v51  ;;  %v1572_v6 = vshll.u32 %v7743_v15, %v1557_v4  ;;  %v1573_v25 = vshrl.u32 %v7741_v18, %v1558_v51  ;;  %v1591_v54 = vshll.u32 %v1551_v52, 8 }
 0x230   : > { %v1562_v50 = vor.u32 %v1561_v53, %v1560_v38  ;;  %v1565_v10 = vor.u32 %v1564_v62, %v1563_v61  ;;  %v1568_v19 = vor.u32 %v1567_v29, %v1566_v43  ;;  %vm1575_vm13 = vcmp.lt.s32.totalorder %v1556_v12, 1 }
 0x231   : > { %v1571_v32 = vor.u32 %v1570_v48, %v1569_v14  ;;  %v1574_v30 = vor.u32 %v1573_v25, %v1572_v6  ;;  %v5629_v56 = vadd.f32 %v1320_v60, %v5344_v17  ;;  %v5631_v27 = vadd.s32 %v1914_v45, %v1910_v36 }
 0x232   : > { %vm1578_vm14 = vcmp.lt.s32.totalorder %v1556_v12, 4  ;;  %v1583_v55 = vsel %vm1575_vm13, %v1562_v50, %v1565_v10  ;;  %v1963_v41 = vshrl.u32 %v1962_v46, 23  ;;  %v1559_v63 = vshrl.u32 %v7747_v3, %v1558_v51 }
 0x233   : > { %vm1577_vm15 = vcmp.lt.s32.totalorder %v1556_v12, 3  ;;  %v1580_v4 = vsel %vm1578_vm14, %v1568_v19, 2102212464  ;;  %v1584_v8 = vsel %vm1578_vm14, %v1571_v32, 920167782  ;;  %vm1576_vm1 = vcmp.lt.s32.totalorder %v1556_v12, 2 }
 0x234   : > { %v1585_v38 = vsel %vm1577_vm15, %v1568_v19, %v1584_v8  ;;  %v1587_v61 = vsel %vm1575_vm13, %v1565_v10, %v1568_v19  ;;  %v1588_v52 = vsel %vm1578_vm14, %v1574_v30, 1326507024  ;;  %v1579_v53 = vsel %vm1575_vm13, %v1559_v63, %v1562_v50 }
 0x235   : > { %v1581_v62 = vsel %vm1577_vm15, %v1565_v10, %v1580_v4  ;;  %v1586_v43 = vsel %vm1576_vm1, %v1583_v55, %v1585_v38  ;;  %v1589_v29 = vsel %vm1577_vm15, %v1571_v32, %v1588_v52  ;;  %v1819_v17 = vclz %v4318_v49 }
 0x236   : > { %v1590_v60 = vsel %vm1576_vm1, %v1587_v61, %v1589_v29  ;;  %v5634_v36 = vmul.u32.u64.low %v1591_v54, %v1586_v43  ;;  %v5635_v45 = vmul.u32.u64.high %v1591_v54, %v1586_v43, %v5634_v36  ;;  %v5638_v46 = vshrl.u32 %v1500_v28, 30 }
 0x237   : > { %v5640_v51 = vmul.u32.u64.low %v1591_v54, %v1590_v60  ;;  %v5641_v14 = vmul.u32.u64.high %v1591_v54, %v1590_v60, %v5640_v51  ;;  %v4325_v48 = vadd.s32 4294967169, %v1963_v41  ;;  %v1916_v8 = vadd.s32 536870912, %v5631_v27 }
 0x238   : > { %7799 = vst [vmem:[#allocation6_spill] sm:$0xff] %v5638_v46  ;;  %v1582_v12 = vsel %vm1576_vm1, %v1579_v53, %v1581_v62  ;;  %v1650_v63 = vand.u32 2139095040, %v5629_v56  ;;  %v1407_v25 = vsub.s32 32, %v5600_v44  ;;  %v5646_v49 = vadd.s32 127, %v1411_v57 }
 0x239   : > { %v1969_v6 = vadd.s32 1, %v4325_v48  ;;  %v4319_v50 = vadd.s32 4294967294, %v1819_v17  ;;  %v1601_v10 = vadd.s32 1, %v5635_v45  ;;  %v1502_v28 = vshll.u32 %v5638_v46, 30 }
 0x23a   : > { %v1598_v19 = vmul.u32 %v1591_v54, %v1582_v12  ;;  %vm1600_vm11 = vc.u32 %v5641_v14, %v5634_v36  ;;  %v5652_v41 = vshrl.u32 %v1916_v8, 30  ;;  %v7735_v30 = vand.u32 2147483647, %v5610_v13 }
 0x23b   : > { %vm1970_vm0 = vcmp.gt.s32.totalorder %v1969_v6, 0  ;;  %v1602_v32 = vsel %vm1600_vm11, %v1601_v10, %v5635_v45  ;;  %v1391_v57 = vadd.s32 %v5383_v22, %v5381_v59  ;;  %v1651_v38 = vshrl.u32 %v1650_v63, 23 }
 0x23c   : > { %v1971_v55 = vsel %vm1970_vm0, %v1969_v6, 0  ;;  %v1603_v4 = vadd.s32 %v1602_v32, %v1598_v19  ;;  %v1408_v54 = vshll.u32 %v5477_v24, %v5600_v44  ;;  %v1413_v53 = vshll.u32 %v5646_v49, 23 }
 0x23d   : > { %v1973_v61 = vand.u32 31, %v1971_v55  ;;  %v1409_v52 = vshrl.u32 %v1391_v57, %v1407_v25  ;;  %vm4320_vm3 = vcmp.lt.s32.totalorder %v4319_v50, 0  ;;  %v5662_v62 = vsub.s32 %v5598_v9, %v1502_v28 }
 0x23e   : > { %v1918_v43 = vshll.u32 %v5652_v41, 30  ;;  %v1966_v29 = vand.u32 8388607, %v7735_v30  ;;  %v1604_v59 = vadd.s32 536870912, %v1603_v4  ;;  %v4313_v45 = vadd.s32 4294967169, %v1651_v38 }
 0x23f   : > { %v1974_v17 = vsub.s32 32, %v1973_v61  ;;  %v1976_v22 = vshll.u32 %v7747_v3, %v1973_v61  ;;  %v1979_v60 = vshll.u32 %v7749_v5, %v1973_v61  ;;  %v1982_v51 = vshll.u32 %v7739_v7, %v1973_v61 }
 0x240   : > { %v5673_v48 = vsel %vm4320_vm3, 0, %v4319_v50  ;;  %v1972_v8 = vshrl.u32 %v1971_v55, 5  ;;  %v1985_v12 = vshll.u32 %v7745_v11, %v1973_v61  ;;  %v1505_v63 = vsub.s32 0, %v5662_v62 }
 0x241   : > { %v1977_v24 = vshrl.u32 %v7749_v5, %v1974_v17  ;;  %v1980_v44 = vshrl.u32 %v7739_v7, %v1974_v17  ;;  %v1983_v9 = vshrl.u32 %v7745_v11, %v1974_v17  ;;  %v1986_v6 = vshrl.u32 %v7743_v15, %v1974_v17 }
 0x242   : > { %v5678_v28 = vshrl.u32 %v1604_v59, 30  ;;  %v1988_v32 = vshll.u32 %v7743_v15, %v1973_v61  ;;  %v1989_v57 = vshrl.u32 %v7741_v18, %v1974_v17  ;;  %v5683_v50 = vsub.s32 %v5631_v27, %v1918_v43 }
 0x243   : > { %v1978_v25 = vor.u32 %v1977_v24, %v1976_v22  ;;  %v1981_v49 = vor.u32 %v1980_v44, %v1979_v60  ;;  %v1984_v10 = vor.u32 %v1983_v9, %v1982_v51  ;;  %v1987_v19 = vor.u32 %v1986_v6, %v1985_v12 }
 0x244   : > { %v1967_v55 = vor.u32 8388608, %v1966_v29  ;;  %v7738_v38 = vand.u32 2147483647, %v5629_v56  ;;  %v1657_v42 = vadd.s32 1, %v4313_v45  ;;  %v1975_v30 = vshrl.u32 %v7747_v3, %v1974_v17 }
 0x245   : > { %v1990_v0 = vor.u32 %v1989_v57, %v1988_v32  ;;  %vm1991_vm4 = vcmp.lt.s32.totalorder %v1972_v8, 1  ;;  %vm1994_vm5 = vcmp.lt.s32.totalorder %v1972_v8, 4  ;;  %vm1993_vm6 = vcmp.lt.s32.totalorder %v1972_v8, 3 }
 0x246   : > { %v1996_v59 = vsel %vm1994_vm5, %v1984_v10, 2102212464  ;;  %v1999_v22 = vsel %vm1991_vm4, %v1978_v25, %v1981_v49  ;;  %v2000_v60 = vsel %vm1994_vm5, %v1987_v19, 920167782  ;;  %v1606_v61 = vshll.u32 %v5678_v28, 30 }
 0x247   : > { %vm1992_vm7 = vcmp.lt.s32.totalorder %v1972_v8, 2  ;;  %v2001_v24 = vsel %vm1993_vm6, %v1984_v10, %v2000_v60  ;;  %v2003_v44 = vsel %vm1991_vm4, %v1981_v49, %v1984_v10  ;;  %v2004_v43 = vsel %vm1994_vm5, %v1990_v0, 1326507024 }
 0x248   : > { %v2002_v27 = vsel %vm1992_vm7, %v1999_v22, %v2001_v24  ;;  %v2007_v29 = vshll.u32 %v1967_v55, 8  ;;  %vm1658_vm8 = vcmp.gt.s32.totalorder %v1657_v42, 0  ;;  %v1921_v45 = vsub.s32 0, %v5683_v50  ;;  %v1332_v22 = vpop.f32.mrf.mxu1 }
 0x249   : > { %v1995_v17 = vsel %vm1991_vm4, %v1975_v30, %v1978_v25  ;;  %v1997_v51 = vsel %vm1993_vm6, %v1981_v49, %v1996_v59  ;;  %v2005_v9 = vsel %vm1993_vm6, %v1987_v19, %v2004_v43  ;;  %v1659_v57 = vsel %vm1658_vm8, %v1657_v42, 0 }
 0x24a   : > { %v2006_v12 = vsel %vm1992_vm7, %v2003_v44, %v2005_v9  ;;  %v5691_v6 = vmul.u32.u64.low %v2007_v29, %v2002_v27  ;;  %v5692_v32 = vmul.u32.u64.high %v2007_v29, %v2002_v27, %v5691_v6  ;;  %v5695_v26 = vsub.s32 %v1603_v4, %v1606_v61 }
 0x24b   : > { %v5697_v10 = vmul.u32.u64.low %v2007_v29, %v2006_v12  ;;  %v5698_v60 = vmul.u32.u64.high %v2007_v29, %v2006_v12, %v5697_v10  ;;  %v1654_v0 = vand.u32 8388607, %v7738_v38  ;;  %v1661_v55 = vand.u32 31, %v1659_v57 }
 0x24c   : > { %v5702_v30 = vor.u32 %v1409_v52, %v1408_v54  ;;  %v5704_v25 = vor.u32 4788187, %v1413_v53  ;;  %v1823_v49 = vsub.s32 32, %v5673_v48  ;;  %v1998_v19 = vsel %vm1992_vm7, %v1995_v17, %v1997_v51 }
 0x24d   : > { %v1827_v42 = vsub.s32 4294967266, %v5673_v48  ;;  %v4322_v4 = vmin.u32 %v1921_v45, %v5683_v50  ;;  %v2017_v59 = vadd.s32 1, %v5692_v32  ;;  %v1662_v61 = vsub.s32 32, %v1661_v55 }
 0x24e   : > { %v5712_v24 = vmin.u32 %v1505_v63, %v5662_v62  ;;  %v1609_v44 = vsub.s32 0, %v5695_v26  ;;  %v1655_v54 = vor.u32 8388608, %v1654_v0  ;;  %v5716_v52 = vadd.f32 %v1332_v22, %v5342_v33 }
 0x24f   : > { %v2014_v53 = vmul.u32 %v2007_v29, %v1998_v19  ;;  %vm2016_vm9 = vc.u32 %v5698_v60, %v5691_v6  ;;  %v1660_v8 = vshrl.u32 %v1659_v57, 5  ;;  %v1665_v27 = vshrl.u32 %v7749_v5, %v1662_v61 }
 0x250   : > { %v2018_v43 = vsel %vm2016_vm9, %v2017_v59, %v5692_v32  ;;  %v1664_v45 = vshll.u32 %v7747_v3, %v1661_v55  ;;  %v1667_v63 = vshll.u32 %v7749_v5, %v1661_v55  ;;  %v1668_v17 = vshrl.u32 %v7739_v7, %v1662_v61 }
 0x251   : > { %v1923_v51 = vclz %v4322_v4  ;;  %v2019_v9 = vadd.s32 %v2018_v43, %v2014_v53  ;;  %v1670_v33 = vshll.u32 %v7739_v7, %v1661_v55  ;;  %v1671_v29 = vshrl.u32 %v7745_v11, %v1662_v61 }
 0x252   : > { %v4310_v12 = vmin.u32 %v1609_v44, %v5695_v26  ;;  %v1666_v10 = vor.u32 %v1665_v27, %v1664_v45  ;;  %v1669_v57 = vor.u32 %v1668_v17, %v1667_v63  ;;  %v1695_v0 = vshll.u32 %v1655_v54, 8 }
 0x253   : > { %v2020_v22 = vadd.s32 536870912, %v2019_v9  ;;  %v1672_v19 = vor.u32 %v1671_v29, %v1670_v33  ;;  %v1673_v32 = vshll.u32 %v7745_v11, %v1661_v55  ;;  %v1674_v59 = vshrl.u32 %v7743_v15, %v1662_v61 }
 0x254   : > { %v1676_v38 = vshll.u32 %v7743_v15, %v1661_v55  ;;  %v1677_v4 = vshrl.u32 %v7741_v18, %v1662_v61  ;;  %vm1682_vm10 = vcmp.lt.s32.totalorder %v1660_v8, 4  ;;  %v2066_v53 = vand.u32 2139095040, %v5716_v52 }
 0x255   : > { %v5733_v43 = vshrl.u32 %v2020_v22, 30  ;;  %v1675_v7 = vor.u32 %v1674_v59, %v1673_v32  ;;  %vm1679_vm12 = vcmp.lt.s32.totalorder %v1660_v8, 1  ;;  %v1684_v44 = vsel %vm1682_vm10, %v1672_v19, 2102212464 }
 0x256   : > { %v1663_v54 = vshrl.u32 %v7747_v3, %v1662_v61  ;;  %v1678_v27 = vor.u32 %v1677_v4, %v1676_v38  ;;  %vm1680_vm13 = vcmp.lt.s32.totalorder %v1660_v8, 2  ;;  %v1687_v45 = vsel %vm1679_vm12, %v1666_v10, %v1669_v57 }
 0x257   : > { %v2022_v63 = vshll.u32 %v5733_v43, 30  ;;  %vm1681_vm14 = vcmp.lt.s32.totalorder %v1660_v8, 3  ;;  %v1688_v55 = vsel %vm1682_vm10, %v1675_v7, 920167782  ;;  %v1691_v17 = vsel %vm1679_vm12, %v1669_v57, %v1672_v19 }
 0x258   : > { %v1683_v33 = vsel %vm1679_vm12, %v1663_v54, %v1666_v10  ;;  %v1685_v29 = vsel %vm1681_vm14, %v1669_v57, %v1684_v44  ;;  %v1689_v18 = vsel %vm1681_vm14, %v1672_v19, %v1688_v55  ;;  %v1692_v22 = vsel %vm1682_vm10, %v1678_v27, 1326507024 }
 0x259   : > { %v5740_v32 = vsub.s32 %v2019_v9, %v2022_v63  ;;  %v1690_v59 = vsel %vm1680_vm13, %v1687_v45, %v1689_v18  ;;  %v1693_v15 = vsel %vm1681_vm14, %v1675_v7, %v1692_v22  ;;  %v2067_v61 = vshrl.u32 %v2066_v53, 23 }
 0x25a   : > { %v4323_v38 = vadd.s32 4294967294, %v1923_v51  ;;  %v1694_v4 = vsel %vm1680_vm13, %v1691_v17, %v1693_v15  ;;  %v5744_v11 = vmul.u32.u64.low %v1695_v0, %v1690_v59  ;;  %v5745_v3 = vmul.u32.u64.high %v1695_v0, %v1690_v59, %v5744_v11 }
 0x25b   : > { %v2025_v5 = vsub.s32 0, %v5740_v32  ;;  %v5749_v10 = vmul.u32.u64.low %v1695_v0, %v1694_v4  ;;  %v5750_v57 = vmul.u32.u64.high %v1695_v0, %v1694_v4, %v5749_v10  ;;  %v4329_v19 = vadd.s32 4294967169, %v2067_v61 }
 0x25c   : > { %v1807_v9 = vadd.s32 %v5438_v34, %v5445_v2  ;;  %v1828_v44 = vadd.s32 127, %v1827_v42  ;;  %v1507_v7 = vclz %v5712_v24  ;;  %v1686_v18 = vsel %vm1680_vm13, %v1683_v33, %v1685_v29 }
 0x25d   : > { %v1611_v51 = vclz %v4310_v12  ;;  %v4326_v15 = vmin.u32 %v2025_v5, %v5740_v32  ;;  %v2073_v53 = vadd.s32 1, %v4329_v19  ;;  %v1415_v54 = vand.u32 2147483647, %v5704_v25 }
 0x25e   : > { %v1417_v27 = vcvt.s32.f32 %v5702_v30  ;;  %v1825_v45 = vshrl.u32 %v1807_v9, %v1823_v49  ;;  %v1705_v63 = vadd.s32 1, %v5745_v3  ;;  %vm4324_vm15 = vcmp.lt.s32.totalorder %v4323_v38, 0 }
 0x25f   : > { %v2027_v34 = vclz %v4326_v15  ;;  %v1702_v2 = vmul.u32 %v1695_v0, %v1686_v18  ;;  %vm1704_vm1 = vc.u32 %v5750_v57, %v5744_v11  ;;  %v1829_v42 = vshll.u32 %v1828_v44, 23 }
 0x260   : > { %v4307_v24 = vadd.s32 4294967294, %v1507_v7  ;;  %v1706_v5 = vsel %vm1704_vm1, %v1705_v63, %v5745_v3  ;;  %vm2074_vm11 = vcmp.gt.s32.totalorder %v2073_v53, 0  ;;  %v4311_v8 = vadd.s32 4294967294, %v1611_v51 }
 0x261   : > { %v4327_v25 = vadd.s32 4294967294, %v2027_v34  ;;  %v1707_v12 = vadd.s32 %v1706_v5, %v1702_v2  ;;  %v2075_v30 = vsel %vm2074_vm11, %v2073_v53, 0  ;;  %v1824_v49 = vshll.u32 %v5584_v35, %v5673_v48 }
 0x262   : > { %v5767_v55 = vsel %vm4324_vm15, 0, %v4323_v38  ;;  %v7751_v17 = vand.u32 2147483647, %v5716_v52  ;;  %v2077_v0 = vand.u32 31, %v2075_v30  ;;  %v5770_v33 = vmul.f32 %v1417_v27, %v1415_v54 }
 0x263   : > { %v1708_v29 = vadd.s32 536870912, %v1707_v12  ;;  %v5772_v22 = vor.u32 %v1825_v45, %v1824_v49  ;;  %v5774_v59 = vor.u32 4788187, %v1829_v42  ;;  %vm4308_vm0 = vcmp.lt.s32.totalorder %v4307_v24, 0 }
 0x264   : > { %v2078_v3 = vsub.s32 32, %v2077_v0  ;;  %v1931_v61 = vsub.s32 4294967266, %v5767_v55  ;;  %vm4312_vm3 = vcmp.lt.s32.totalorder %v4311_v8, 0  ;;  %vm4328_vm4 = vcmp.lt.s32.totalorder %v4327_v25, 0 }
 0x265   : > { %v5777_v4 = vshrl.u32 %v1708_v29, 30  ;;  %v2070_v35 = vand.u32 8388607, %v7751_v17  ;;  %v2076_v48 = vshrl.u32 %v2075_v30, 5  ;;  %v7800_v38 = vmov 2475754826  }
 0x266   : > { %v2081_v10 = vshrl.u32 %v7800_v38, %v2078_v3  ;;  %v7801_v19 = vmov 2131351028   ;;  %v7802_v7 = vmov 683565275   ;;  %v2083_v51 = vshll.u32 %v7800_v38, %v2077_v0 }
 0x267   : > { %v2084_v9 = vshrl.u32 %v7801_v19, %v2078_v3  ;;  %v1710_v44 = vshll.u32 %v5777_v4, 30  ;;  %v2080_v18 = vshll.u32 %v7802_v7, %v2077_v0  ;;  %v7803_v15 = vmov 2102212464  }
 0x268   : > { %v2087_v53 = vshrl.u32 %v7803_v15, %v2078_v3  ;;  %v5787_v54 = vsel %vm4328_vm4, 0, %v4327_v25  ;;  %v2086_v27 = vshll.u32 %v7801_v19, %v2077_v0  ;;  %v2089_v45 = vshll.u32 %v7803_v15, %v2077_v0 }
 0x269   : > { %v7804_v63 = vmov 920167782   ;;  %v5793_v2 = vsel %vm4308_vm0, 0, %v4307_v24  ;;  %v5795_v42 = vsub.s32 %v1707_v12, %v1710_v44  ;;  %v2082_v5 = vor.u32 %v2081_v10, %v2080_v18 }
 0x26a   : > { %v2090_v34 = vshrl.u32 %v7804_v63, %v2078_v3  ;;  %v2085_v30 = vor.u32 %v2084_v9, %v2083_v51  ;;  %v2088_v49 = vor.u32 %v2087_v53, %v2086_v27  ;;  %v2092_v17 = vshll.u32 %v7804_v63, %v2077_v0 }
 0x26b   : > { %v7805_v38 = vmov 1326507024   ;;  %v5799_v39 = vadd.s32 127, %v1931_v61  ;;  %v5802_v19 = vsel %vm4312_vm3, 0, %v4311_v8  ;;  %v2035_v15 = vsub.s32 4294967266, %v5787_v54 }
 0x26c   : > { %v2091_v29 = vor.u32 %v2090_v34, %v2089_v45  ;;  %v2093_v25 = vshrl.u32 %v7805_v38, %v2078_v3  ;;  %v1713_v24 = vsub.s32 0, %v5795_v42  ;;  %v2071_v46 = vor.u32 8388608, %v2070_v35 }
 0x26d   : > { %v2079_v12 = vshrl.u32 %v7802_v7, %v2078_v3  ;;  %vm2095_vm5 = vcmp.lt.s32.totalorder %v2076_v48, 1  ;;  %vm2097_vm6 = vcmp.lt.s32.totalorder %v2076_v48, 3  ;;  %vm2098_vm7 = vcmp.lt.s32.totalorder %v2076_v48, 4 }
 0x26e   : > { %v2094_v10 = vor.u32 %v2093_v25, %v2092_v17  ;;  %v4314_v9 = vmin.u32 %v1713_v24, %v5795_v42  ;;  %v2103_v0 = vsel %vm2095_vm5, %v2082_v5, %v2085_v30  ;;  %v2100_v61 = vsel %vm2098_vm7, %v2088_v49, 2102212464 }
 0x26f   : > { %v2104_v44 = vsel %vm2098_vm7, %v2091_v29, 920167782  ;;  %v2107_v8 = vsel %vm2095_vm5, %v2085_v30, %v2088_v49  ;;  %v2036_v51 = vadd.s32 127, %v2035_v15  ;;  %vm2096_vm8 = vcmp.lt.s32.totalorder %v2076_v48, 2 }
 0x270   : > { %v2108_v18 = vsel %vm2098_vm7, %v2094_v10, 1326507024  ;;  %v1715_v53 = vclz %v4314_v9  ;;  %v2105_v35 = vsel %vm2097_vm6, %v2088_v49, %v2104_v44  ;;  %v2031_v3 = vsub.s32 32, %v5787_v54 }
 0x271   : > { %v2106_v17 = vsel %vm2096_vm8, %v2103_v0, %v2105_v35  ;;  %v2109_v27 = vsel %vm2097_vm6, %v2091_v29, %v2108_v18  ;;  %v2111_v45 = vshll.u32 %v2071_v46, 8  ;;  %v2099_v25 = vsel %vm2095_vm5, %v2079_v12, %v2082_v5 }
 0x272   : > { %v4315_v34 = vadd.s32 4294967294, %v1715_v53  ;;  %v2101_v24 = vsel %vm2097_vm6, %v2085_v30, %v2100_v61  ;;  %v2110_v38 = vsel %vm2096_vm8, %v2107_v8, %v2109_v27  ;;  %vm1337_vm9 = vcmp.lt.s32.totalorder %v5348_v23, 0 }
 0x273   : > { %v5818_v15 = vmul.u32.u64.low %v2111_v45, %v2110_v38  ;;  %v5819_v10 = vmul.u32.u64.high %v2111_v45, %v2110_v38, %v5818_v15  ;;  %v5821_v49 = vmul.u32.u64.low %v2111_v45, %v2106_v17  ;;  %v5822_v9 = vmul.u32.u64.high %v2111_v45, %v2106_v17, %v5821_v49 }
 0x274   : > { %v1831_v0 = vand.u32 2147483647, %v5774_v59  ;;  %v2015_v46 = vadd.s32 %v5691_v6, %v5698_v60  ;;  %v2037_v29 = vshll.u32 %v2036_v51, 23  ;;  %vm4316_vm10 = vcmp.lt.s32.totalorder %v4315_v34, 0 }
 0x275   : > { %v1927_v5 = vsub.s32 32, %v5767_v55  ;;  %v1619_v30 = vsub.s32 4294967266, %v5802_v19  ;;  %v5830_v12 = vsel %vm4316_vm10, 0, %v4315_v34  ;;  %v2102_v38 = vsel %vm2096_vm8, %v2099_v25, %v2101_v24 }
 0x276   : > { %v1419_v61 = vxor.u32 2147483648, %v5770_v33  ;;  %v1833_v44 = vcvt.s32.f32 %v5772_v22  ;;  %v1515_v8 = vsub.s32 4294967266, %v5793_v2  ;;  %v2033_v59 = vshrl.u32 %v2015_v46, %v2031_v3 }
 0x277   : > { %v1911_v6 = vadd.s32 %v5580_v40, %v5577_v58  ;;  %v1933_v60 = vshll.u32 %v5799_v39, 23  ;;  %vm2120_vm12 = vc.u32 %v5819_v10, %v5821_v49  ;;  %v2121_v18 = vadd.s32 1, %v5822_v9 }
 0x278   : > { %v2032_v48 = vshll.u32 %v5740_v32, %v5787_v54  ;;  %v2038_v51 = vor.u32 4788187, %v2037_v29  ;;  %v1723_v53 = vsub.s32 4294967266, %v5830_v12  ;;  %v2118_v22 = vmul.u32 %v2111_v45, %v2102_v38 }
 0x279   : > { %v1834_v35 = vmul.f32 %v1833_v44, %v1831_v0  ;;  %v1929_v17 = vshrl.u32 %v1911_v6, %v1927_v5  ;;  %v1620_v3 = vadd.s32 127, %v1619_v30  ;;  %v2122_v27 = vsel %vm2120_vm12, %v2121_v18, %v5822_v9 }
 0x27a   : > { %v7806_v58 = vand.u32 2147483647, %v5348_v23  ;;  %vm1753_vm14 = vcmp.lt.s32.totalorder %v5351_v20, 0  ;;  %v2034_v40 = vor.u32 %v2033_v59, %v2032_v48  ;;  %v2123_v34 = vadd.s32 %v2122_v27, %v2118_v22 }
 0x27b   : > { %v1516_v32 = vadd.s32 127, %v1515_v8  ;;  %v1928_v54 = vshll.u32 %v5683_v50, %v5767_v55  ;;  %v1934_v45 = vor.u32 4788187, %v1933_v60  ;;  %v1615_v25 = vsub.s32 32, %v5802_v19 }
 0x27c   : > { %vm5848_vm13 = vcmp.le.f32.partialorder %v7806_v58, 0.7853982  ;;  %v1420_v24 = vsel %vm1337_vm9, %v1419_v61, %v5770_v33  ;;  %v2039_v15 = vand.u32 2147483647, %v2038_v51  ;;  %v1724_v9 = vadd.s32 127, %v1723_v53 }
 0x27d   : > { %v2124_v0 = vadd.s32 536870912, %v2123_v34  ;;  %v1835_v46 = vxor.u32 2147483648, %v1834_v35  ;;  %v1930_v29 = vor.u32 %v1929_v17, %v1928_v54  ;;  %v1599_v5 = vadd.s32 %v5634_v36, %v5641_v14 }
 0x27e   : > { %v1621_v30 = vshll.u32 %v1620_v3, 23  ;;  %v1511_v38 = vsub.s32 32, %v5793_v2  ;;  %v2041_v44 = vcvt.s32.f32 %v2034_v40  ;;  %v1719_v50 = vsub.s32 32, %v5830_v12 }
 0x27f   : > { %v5863_v55 = vshrl.u32 %v2124_v0, 30  ;;  %v1495_v8 = vadd.s32 %v5518_v31, %v5537_v1  ;;  %v1517_v33 = vshll.u32 %v1516_v32, 23  ;;  %v1935_v61 = vand.u32 2147483647, %v1934_v45 }
 0x280   : > { %v1617_v59 = vshrl.u32 %v1599_v5, %v1615_v25  ;;  %v2042_v6 = vmul.f32 %v2041_v44, %v2039_v15  ;;  %v1703_v60 = vadd.s32 %v5744_v11, %v5750_v57  ;;  %v1725_v18 = vshll.u32 %v1724_v9, 23 }
 0x281   : > { %v2126_v36 = vshll.u32 %v5863_v55, 30  ;;  %v5873_v14 = vsel %vm5848_vm13, %v5348_v23, %v1420_v24  ;;  %v1937_v48 = vcvt.s32.f32 %v1930_v29  ;;  %v1616_v51 = vshll.u32 %v5695_v26, %v5802_v19 }
 0x282   : > { %v1622_v31 = vor.u32 4788187, %v1621_v30  ;;  %v1836_v1 = vsel %vm1753_vm14, %v1835_v46, %v1834_v35  ;;  %v1513_v53 = vshrl.u32 %v1495_v8, %v1511_v38  ;;  %v1721_v22 = vshrl.u32 %v1703_v60, %v1719_v50 }
 0x283   : > { %v2127_v17 = vsub.s32 %v2123_v34, %v2126_v36  ;;  %v1512_v11 = vshll.u32 %v5662_v62, %v5793_v2  ;;  %v1518_v57 = vor.u32 4788187, %v1517_v33  ;;  %v1938_v3 = vmul.f32 %v1937_v48, %v1935_v61 }
 0x284   : > { %v1618_v27 = vor.u32 %v1617_v59, %v1616_v51  ;;  %v2043_v58 = vxor.u32 2147483648, %v2042_v6  ;;  %v1720_v40 = vshll.u32 %v5795_v42, %v5830_v12  ;;  %v1726_v32 = vor.u32 4788187, %v1725_v18 }
 0x285   : > { %v2129_v54 = vsub.s32 0, %v2127_v17  ;;  %v7809_v26 = vand.u32 2147483647, %v5351_v20  ;;  %v1623_v35 = vand.u32 2147483647, %v1622_v31  ;;  %v1514_v2 = vor.u32 %v1513_v53, %v1512_v11 }
 0x286   : > { %v1722_v34 = vor.u32 %v1721_v22, %v1720_v40  ;;  %4611 = vcosq.f32 %v5873_v14  ;;  %v1519_v25 = vand.u32 2147483647, %v1518_v57  ;;  %v1625_v42 = vcvt.s32.f32 %v1618_v27 }
 0x287   : > { %vm5885_vm15 = vcmp.le.f32.partialorder %v7809_v26, 0.7853982  ;;  %v4330_v45 = vmin.u32 %v2129_v54, %v2127_v17  ;;  %vm1961_vm1 = vcmp.lt.s32.totalorder %v5610_v13, 0  ;;  %v1939_v12 = vxor.u32 2147483648, %v1938_v3 }
 0x288   : > { %v1839_v62 = vsel %vm5885_vm15, %v5351_v20, %v1836_v1  ;;  %v2044_v24 = vsel %vm1961_vm1, %v2043_v58, %v2042_v6  ;;  %v1727_v15 = vand.u32 2147483647, %v1726_v32  ;;  %v1626_v0 = vmul.f32 %v1625_v42, %v1623_v35 }
 0x289   : > { %v2131_v9 = vclz %v4330_v45  ;;  %4613 = vcosq.f32 %v1839_v62  ;;  %v1521_v46 = vcvt.s32.f32 %v1514_v2  ;;  %v7812_v29 = vand.u32 2147483647, %v5610_v13 }
 0x28a   : > { %v1729_v30 = vcvt.s32.f32 %v1722_v34  ;;  %4615 = vsinq.f32 %v1839_v62  ;;  %vm1857_vm0 = vcmp.lt.s32.totalorder %v5406_v37, 0  ;;  %v1627_v61 = vxor.u32 2147483648, %v1626_v0 }
 0x28b   : > { %vm5898_vm11 = vcmp.le.f32.partialorder %v7812_v29, 0.7853982  ;;  %v4331_v38 = vadd.s32 4294967294, %v2131_v9  ;;  %v1522_v50 = vmul.f32 %v1521_v46, %v1519_v25  ;;  %v1940_v8 = vsel %vm1857_vm0, %v1939_v12, %v1938_v3 }
 0x28c   : > { %v2047_v44 = vsel %vm5898_vm11, %v5610_v13, %v2044_v24  ;;  %v1730_v33 = vmul.f32 %v1729_v30, %v1727_v15  ;;  %v2045_v6 = vsub.s32 4, %v5733_v43  ;;  %v7815_v60 = vand.u32 2147483647, %v5406_v37 }
 0x28d   : > { %vm4332_vm3 = vcmp.lt.s32.totalorder %v4331_v38, 0  ;;  %4617 = vcosq.f32 %v2047_v44  ;;  %v2119_v36 = vadd.s32 %v5821_v49, %v5819_v10  ;;  %vm1545_vm5 = vcmp.lt.s32.totalorder %v5484_v47, 0 }
 0x28e   : > { %v2134_v59 = vsel %vm4332_vm3, 0, %v4331_v38  ;;  %vm5911_vm4 = vcmp.le.f32.partialorder %v7815_v60, 0.7853982  ;;  %4619 = vsinq.f32 %v2047_v44  ;;  %v1731_v1 = vxor.u32 2147483648, %v1730_v33 }
 0x28f   : > { %v2135_v48 = vsub.s32 32, %v2134_v59  ;;  %v2139_v51 = vsub.s32 4294967266, %v2134_v59  ;;  %v1943_v31 = vsel %vm5911_vm4, %v5406_v37, %v1940_v8  ;;  %v2136_v53 = vshll.u32 %v2127_v17, %v2134_v59 }
 0x290   : > { %v1523_v57 = vxor.u32 2147483648, %v1522_v50  ;;  %v1628_v3 = vsel %vm1545_vm5, %v1627_v61, %v1626_v0  ;;  %v2046_v10 = vsel %vm1961_vm1, %v2045_v6, %v5733_v43  ;;  %v1941_v49 = vsub.s32 4, %v5652_v41 }
 0x291   : > { %v2137_v22 = vshrl.u32 %v2119_v36, %v2135_v48  ;;  %v2140_v11 = vadd.s32 127, %v2139_v51  ;;  %4621 = vcosq.f32 %v1943_v31  ;;  %v1837_v40 = vsub.s32 4, %v5541_v16 }
 0x292   : > { %vm1441_vm6 = vcmp.lt.s32.totalorder %v5356_v21, 0  ;;  %v7818_v17 = vand.u32 2147483647, %v5484_v47  ;;  %vm1649_vm8 = vcmp.lt.s32.totalorder %v5629_v56, 0  ;;  %4623 = vsinq.f32 %v1943_v31 }
 0x293   : > { %v2138_v27 = vor.u32 %v2137_v22, %v2136_v53  ;;  %v2141_v58 = vshll.u32 %v2140_v11, 23  ;;  %v5936_v54 = vpop.eup %4611  ;;  %v1732_v26 = vsel %vm1649_vm8, %v1731_v1, %v1730_v33  ;;  %v2048_v62 = vsel %vm5898_vm11, 0, %v2046_v10  ;;  %v7830_v53 = vld [vmem:[#allocation6_spill] sm:$0xff]  ;;  %v7831_v11 = vld [vmem:[#allocation5_spill] sm:$0xff] }
 0x294   : > { %vm5931_vm7 = vcmp.le.f32.partialorder %v7818_v17, 0.7853982  ;;  %4625 = vsinq.f32 %v5873_v14  ;;  %v1524_v2 = vsel %vm1441_vm6, %v1523_v57, %v1522_v50  ;;  %v1942_v34 = vsel %vm1857_vm0, %v1941_v49, %v5652_v41 }
 0x295   : > { %v1631_v43 = vsel %vm5931_vm7, %v5484_v47, %v1628_v3  ;;  %v2142_v35 = vor.u32 4788187, %v2141_v58  ;;  %v2145_v42 = vcvt.s32.f32 %v2138_v27  ;;  %v1838_v12 = vsel %vm1753_vm14, %v1837_v40, %v5541_v16 }
 0x296   : > { %v5951_v45 = vpop.eup %4613  ;;  %v7821_v24 = vand.u32 2147483647, %v5629_v56  ;;  %4627 = vsinq.f32 %v1631_v43  ;;  %v2149_v14 = vsub.s32 4, %v5863_v55  ;;  %v2052_v9 = vadd.s32 3, %v2048_v62 }
 0x297   : > { %v2143_v25 = vand.u32 2147483647, %v2142_v35  ;;  %v5966_v0 = vpop.eup %4615  ;;  %v1944_v16 = vsel %vm5911_vm4, 0, %v1942_v34  ;;  %v1733_v29 = vsub.s32 4, %v5777_v4  ;;  %v7824_v5 = vand.u32 2147483647, %v5356_v21 }
 0x298   : > { %vm5958_vm10 = vcmp.le.f32.partialorder %v7821_v24, 0.7853982  ;;  %4629 = vcosq.f32 %v1631_v43  ;;  %v1840_v38 = vsel %vm5885_vm15, 0, %v1838_v12  ;;  %v1629_v44 = vsub.s32 4, %v5678_v28 }
 0x299   : > { %v1735_v41 = vsel %vm5958_vm10, %v5629_v56, %v1732_v26  ;;  %v2146_v46 = vmul.f32 %v2145_v42, %v2143_v25  ;;  %vm5973_vm12 = vcmp.le.f32.partialorder %v7824_v5, 0.7853982  ;;  %vm2065_vm14 = vcmp.lt.s32.totalorder %v5716_v52, 0 }
 0x29a   : > { %v1527_v50 = vsel %vm5973_vm12, %v5356_v21, %v1524_v2  ;;  %v7827_v33 = vand.u32 2147483647, %v5716_v52  ;;  %4631 = vcosq.f32 %v1735_v41  ;;  %v4618_v59 = vpop.eup %4617  ;;  %v2150_v19 = vsel %vm2065_vm14, %v2149_v14, %v5863_v55 }
 0x29b   : > { %v2147_v8 = vxor.u32 2147483648, %v2146_v46  ;;  %v2053_v6 = vand.u32 3, %v2052_v9  ;;  %v1948_v60 = vadd.s32 3, %v1944_v16  ;;  %4633 = vsinq.f32 %v1735_v41  ;;  %v4620_v18 = vpop.eup %4619 }
 0x29c   : > { %vm5986_vm1 = vcmp.le.f32.partialorder %v7827_v33, 0.7853982  ;;  %v1844_v48 = vadd.s32 3, %v1840_v38  ;;  %v1734_v51 = vsel %vm1649_vm8, %v1733_v29, %v5777_v4  ;;  %4635 = vcosq.f32 %v1527_v50 }
 0x29d   : > { %v2148_v36 = vsel %vm2065_vm14, %v2147_v8, %v2146_v46  ;;  %v1630_v1 = vsel %vm1545_vm5, %v1629_v44, %v5678_v28  ;;  %4637 = vsinq.f32 %v1527_v50  ;;  %v2152_v55 = vsel %vm5986_vm1, 0, %v2150_v19 }
 0x29e   : > { %v2151_v31 = vsel %vm5986_vm1, %v5716_v52, %v2148_v36  ;;  %v1525_v22 = vsub.s32 4, %v7830_v53  ;;  %v1421_v57 = vsub.s32 4, %v7831_v11  ;;  %v4622_v3 = vpop.eup %4621  ;;  %vm2054_vm15 = vcmp.lt.s32.totalorder %v2053_v6, 2 }
 0x29f   : > { %4639 = vcosq.f32 %v2151_v31  ;;  %v1949_v4 = vand.u32 3, %v1948_v60  ;;  %v1736_v10 = vsel %vm5958_vm10, 0, %v1734_v51  ;;  %v4624_v49 = vpop.eup %4623  ;;  %vm2055_vm11 = vcmp.eq.s32.totalorder %v2053_v6, 0 }
 0x2a0   : > { %4641 = vsinq.f32 %v2151_v31  ;;  %v2056_v27 = vxor.u32 2147483648, %v4620_v18  ;;  %v2059_v28 = vxor.u32 2147483648, %v4618_v59  ;;  %v1845_v58 = vand.u32 3, %v1844_v48 }
 0x2a1   : > { %v2156_v40 = vadd.s32 3, %v2152_v55  ;;  %vm2051_vm0 = vweird.f32 %v5610_v13  ;;  %vm2058_vm3 = vcmp.eq.s32.totalorder %v2053_v6, 2  ;;  %v1848_v17 = vxor.u32 2147483648, %v5966_v0  ;;  %v6010_v26 = vpop.eup %4625 }
 0x2a2   : > { %v1632_v43 = vsel %vm5931_vm7, 0, %v1630_v1  ;;  %v1851_v35 = vxor.u32 2147483648, %v5951_v45  ;;  %v1740_v62 = vadd.s32 3, %v1736_v10  ;;  %v1526_v2 = vsel %vm1441_vm6, %v1525_v22, %v7830_v53 }
 0x2a3   : > { %v1422_v34 = vsel %vm1337_vm9, %v1421_v57, %v7831_v11  ;;  %vm1950_vm4 = vcmp.lt.s32.totalorder %v1949_v4, 2  ;;  %vm1951_vm5 = vcmp.eq.s32.totalorder %v1949_v4, 0  ;;  %v1952_v25 = vxor.u32 2147483648, %v4624_v49  ;;  %v4628_v12 = vpop.eup %4627 }
 0x2a4   : > { %v1955_v42 = vxor.u32 2147483648, %v4622_v3  ;;  %v2057_v32 = vsel %vm2055_vm11, %v4618_v59, %v2056_v27  ;;  %v2060_v24 = vsel %vm2058_vm3, %v2059_v28, %v4620_v18  ;;  %vm1847_vm7 = vcmp.eq.s32.totalorder %v1845_v58, 0 }
 0x2a5   : > { %v1636_v15 = vadd.s32 3, %v1632_v43  ;;  %v2157_v14 = vand.u32 3, %v2156_v40  ;;  %vm1850_vm8 = vcmp.eq.s32.totalorder %v1845_v58, 2  ;;  %v1528_v9 = vsel %vm5973_vm12, 0, %v1526_v2  ;;  %v4630_v46 = vpop.eup %4629 }
 0x2a6   : > { %v1424_v41 = vsel %vm5848_vm13, 0, %v1422_v34  ;;  %vm1954_vm9 = vcmp.eq.s32.totalorder %v1949_v4, 2  ;;  %v1849_v16 = vsel %vm1847_vm7, %v5951_v45, %v1848_v17  ;;  %v1852_v29 = vsel %vm1850_vm8, %v1851_v35, %v5966_v0 }
 0x2a7   : > { %v1741_v5 = vand.u32 3, %v1740_v62  ;;  %v4632_v38 = vpop.eup %4631  ;;  %v2061_v44 = vsel %vm2054_vm15, %v2057_v32, %v2060_v24  ;;  %v1953_v50 = vsel %vm1951_vm5, %v4622_v3, %v1952_v25  ;;  %v1956_v8 = vsel %vm1954_vm9, %v1955_v42, %v4624_v49 }
 0x2a8   : > { %v1640_v33 = vxor.u32 2147483648, %v4628_v12  ;;  %v4634_v61 = vpop.eup %4633  ;;  %vm2155_vm6 = vweird.f32 %v5716_v52  ;;  %vm1846_vm10 = vcmp.lt.s32.totalorder %v1845_v58, 2  ;;  %v1637_v39 = vand.u32 3, %v1636_v15  ;;  %v6072_v15 = vpop.permute.xlu1 %2187 }
 0x2a9   : > { %v1532_v30 = vadd.s32 3, %v1528_v9  ;;  %v1428_v59 = vadd.s32 3, %v1424_v41  ;;  %v4636_v19 = vpop.eup %4635  ;;  %vm2158_vm13 = vcmp.lt.s32.totalorder %v2157_v14, 2  ;;  %vm2159_vm12 = vcmp.eq.s32.totalorder %v2157_v14, 0 }
 0x2aa   : > { %v1853_v45 = vsel %vm1846_vm10, %v1849_v16, %v1852_v29  ;;  %v1643_v0 = vxor.u32 2147483648, %v4630_v46  ;;  %v4638_v60 = vpop.eup %4637  ;;  %vm2162_vm14 = vcmp.eq.s32.totalorder %v2157_v14, 2  ;;  %v2062_v6 = vsel %vm2051_vm0, nan, %v2061_v44 }
 0x2ab   : > { %vm1947_vm1 = vweird.f32 %v5406_v37  ;;  %v1957_v18 = vsel %vm1950_vm4, %v1953_v50, %v1956_v8  ;;  %vm1742_vm15 = vcmp.lt.s32.totalorder %v1741_v5, 2  ;;  %vm1743_vm11 = vcmp.eq.s32.totalorder %v1741_v5, 0  ;;  %v6080_v50 = vpop.permute.xlu0 %2192 }
 0x2ac   : > { %v4640_v36 = vpop.eup %4639  ;;  %v1744_v48 = vxor.u32 2147483648, %v4634_v61  ;;  %vm1746_vm3 = vcmp.eq.s32.totalorder %v1741_v5, 2  ;;  %v1747_v51 = vxor.u32 2147483648, %v4632_v38  ;;  %vm1639_vm5 = vcmp.eq.s32.totalorder %v1637_v39, 0  ;;  %v2178_v14 = vpop.permute.xlu1 %2177 }
 0x2ad   : > { %v4642_v31 = vpop.eup %4641  ;;  %v2163_v1 = vxor.u32 2147483648, %v4640_v36  ;;  %v1533_v55 = vand.u32 3, %v1532_v30  ;;  %v1429_v53 = vand.u32 3, %v1428_v59  ;;  %v1641_v11 = vsel %vm1639_vm5, %v4630_v46, %v1640_v33 }
 0x2ae   : > { %v2160_v22 = vxor.u32 2147483648, %v4642_v31  ;;  %v1536_v57 = vxor.u32 2147483648, %v4638_v60  ;;  %v1539_v13 = vxor.u32 2147483648, %v4636_v19  ;;  %vm1642_vm0 = vcmp.eq.s32.totalorder %v1637_v39, 2 }
 0x2af   : > { %v2164_v3 = vsel %vm2162_vm14, %v2163_v1, %v4642_v31  ;;  %v1432_v4 = vxor.u32 2147483648, %v6010_v26  ;;  %v1435_v10 = vxor.u32 2147483648, %v5936_v54  ;;  %v1745_v27 = vsel %vm1743_vm11, %v4632_v38, %v1744_v48 }
 0x2b0   : > { %v2161_v49 = vsel %vm2159_vm12, %v4640_v36, %v2160_v22  ;;  %v1748_v28 = vsel %vm1746_vm3, %v1747_v51, %v4634_v61  ;;  %v1644_v58 = vsel %vm1642_vm0, %v1643_v0, %v4628_v12  ;;  %vm1535_vm4 = vcmp.eq.s32.totalorder %v1533_v55, 0  ;;  %v2183_v0 = vpop.permute.xlu0 %2182 }
 0x2b1   : > { %v2165_v40 = vsel %vm2158_vm13, %v2161_v49, %v2164_v3  ;;  %vm1538_vm7 = vcmp.eq.s32.totalorder %v1533_v55, 2  ;;  %vm1431_vm8 = vcmp.eq.s32.totalorder %v1429_v53, 0  ;;  %v1537_v43 = vsel %vm1535_vm4, %v4636_v19, %v1536_v57 }
 0x2b2   : > { %v2166_v17 = vsel %vm2155_vm6, nan, %v2165_v40  ;;  %v1540_v35 = vsel %vm1538_vm7, %v1539_v13, %v4638_v60  ;;  %vm1434_vm9 = vcmp.eq.s32.totalorder %v1429_v53, 2  ;;  %v1749_v62 = vsel %vm1742_vm15, %v1745_v27, %v1748_v28 }
 0x2b3   : > { %2231 = vmatprep.subr.mxu1 %v2166_v17  ;;  %vm1638_vm10 = vcmp.lt.s32.totalorder %v1637_v39, 2  ;;  %v1433_v2 = vsel %vm1431_vm8, %v5936_v54, %v1432_v4  ;;  %v1436_v34 = vsel %vm1434_vm9, %v1435_v10, %v6010_v26  ;;  %v1958_v25 = vsel %vm1947_vm1, nan, %v1957_v18 }
 0x2b4   : > { %2232 = vmatpush1.msra.mxu1 %v2062_v6  ;;  %vm1843_vm13 = vweird.f32 %v5351_v20  ;;  %v1645_v42 = vsel %vm1638_vm10, %v1641_v11, %v1644_v58  ;;  %vm1534_vm12 = vcmp.lt.s32.totalorder %v1533_v55, 2  ;;  %vm1739_vm6 = vweird.f32 %v5629_v56  ;;  %v2167_v20 = vld [vmem:[%s7725_s4] sm:$0xff] }
 0x2b5   : > { %2233 = vmatprep.subr.mxu1 %v1958_v25  ;;  %v1854_v52 = vsel %vm1843_vm13, nan, %v1853_v45  ;;  %v1541_v12 = vsel %vm1534_vm12, %v1537_v43, %v1540_v35  ;;  %vm1430_vm14 = vcmp.lt.s32.totalorder %v1429_v53, 2  ;;  %v1750_v32 = vsel %vm1739_vm6, nan, %v1749_v62 }
 0x2b6   : > { %2234 = vmatpush1.msra.mxu1 %v1854_v52  ;;  %vm1635_vm15 = vweird.f32 %v5484_v47  ;;  %v1437_v54 = vsel %vm1430_vm14, %v1433_v2, %v1436_v34  ;;  %vm1531_vm11 = vweird.f32 %v5356_v21  ;;  %vm1427_vm1 = vweird.f32 %v5348_v23  ;;  %v2168_v47 = vld [vmem:[%s7725_s4 + $0x8] sm:$0xff]  ;;  %v2169_v23 = vld [vmem:[%s7725_s4 + $0x10] sm:$0xff]  ;;  %v2170_v21 = vld [vmem:[%s7725_s4 + $0x18] sm:$0xff] }
 0x2b7   : > { %2235 = vmatprep.subr.mxu1 %v1750_v32  ;;  %v1646_v26 = vsel %vm1635_vm15, nan, %v1645_v42  ;;  %v1542_v37 = vsel %vm1531_vm11, nan, %v1541_v12  ;;  %v1438_v56 = vsel %vm1427_vm1, nan, %v1437_v54  ;;  %v7832_v24 = vmov 0.0  }
 0x2b8   : > { %2236 = vmatpush1.msra.mxu1 %v1646_v26  ;;  %v7833_v51 = vmov 2475754826   ;;  %v7834_v55 = vmov 2131351028   ;;  %v7835_v11 = vmov 2102212464  }
 0x2b9   : > { %2237 = vmatprep.subr.mxu1 %v1542_v37  ;;  %v7836_v10 = vmov 1326507024  }
 0x2ba   : > { %2238 = vmatpush1.msra.mxu1 %v1438_v56 }
 0x2bb   : > { %4333 = vmatmul.mubr.msk.f32.vlgmr.msra.gmra.mxu1 %vm1233_vm2, %v2167_v20 }
 0x2bc   : > { %2277 = vmatprep.mubr.f32.mxu1 %v7832_v24 }
 0x2bf   : > { %4334 = vmatmul.mubr.msk.f32.gmra.mxu1 %vm1233_vm2, %v2168_v47 }
 0x2c0   : > { %2283 = vmatprep.mubr.f32.mxu1 %v7832_v24 }
 0x2c3   : > { %4335 = vmatmul.mubr.msk.f32.gmra.mxu1 %vm1233_vm2, %v2169_v23 }
 0x2c4   : > { %2289 = vmatprep.mubr.f32.mxu1 %v7832_v24 }
 0x2c7   : > { %4336 = vmatmul.mubr.msk.f32.gmra.mxu1 %vm1233_vm2, %v2170_v21 }
 0x2c8   : > { %4165 = vmatprep.mubr.f32.mxu1 %v7832_v24 }
 0x37b   : > { %v2273_v9 = vpop.f32.mrf.mxu1 }
 0x37c   : > { %v6074_v41 = vadd.f32 %v2273_v9, %v2178_v14 }
 0x37d   : > { %v2275_v46 = vpop.f32.mrf.mxu1 }
 0x37e   : > { %v2299_v16 = vand.u32 2139095040, %v6074_v41  ;;  %v6077_v29 = vadd.f32 %v2275_v46, %v2178_v14  ;;  %v7764_v39 = vand.u32 2147483647, %v6074_v41 }
 0x37f   : > { %v2279_v19 = vpop.f32.mrf.mxu1 }
 0x380   : > { %v2300_v5 = vshrl.u32 %v2299_v16, 23  ;;  %v2403_v38 = vand.u32 2139095040, %v6077_v29  ;;  %v2303_v60 = vand.u32 8388607, %v7764_v39  ;;  %v6085_v18 = vadd.f32 %v2279_v19, %v2183_v0 }
 0x381   : > { %v2281_v9 = vpop.f32.mrf.mxu1  ;;  %v7759_v46 = vand.u32 2147483647, %v6077_v29 }
 0x382   : > { %v4337_v44 = vadd.s32 4294967169, %v2300_v5  ;;  %v2404_v8 = vshrl.u32 %v2403_v38, 23  ;;  %v2304_v17 = vor.u32 8388608, %v2303_v60  ;;  %v2507_v2 = vand.u32 2139095040, %v6085_v18 }
 0x384   : > { %v2306_v33 = vadd.s32 1, %v4337_v44  ;;  %v4341_v61 = vadd.s32 4294967169, %v2404_v8  ;;  %v2344_v37 = vshll.u32 %v2304_v17, 8  ;;  %v2508_v20 = vshrl.u32 %v2507_v2, 23 }
 0x386   : > { %vm2307_vm3 = vcmp.gt.s32.totalorder %v2306_v33, 0  ;;  %v2410_v59 = vadd.s32 1, %v4341_v61  ;;  %v4345_v16 = vadd.s32 4294967169, %v2508_v20  ;;  %v6139_v61 = vadd.f32 %v2281_v9, %v2183_v0 }
 0x387   : > { %v2308_v30 = vsel %vm2307_vm3, %v2306_v33, 0  ;;  %v7762_v9 = vand.u32 2147483647, %v6085_v18 }
 0x388   : > { %v2310_v45 = vand.u32 31, %v2308_v30  ;;  %v6087_v36 = vshrl.u32 %v2308_v30, 5  ;;  %vm2411_vm5 = vcmp.gt.s32.totalorder %v2410_v59, 0 }
 0x389   : > { %v2412_v40 = vsel %vm2411_vm5, %v2410_v59, 0 }
 0x38a   : > { %v2311_v6 = vsub.s32 32, %v2310_v45  ;;  %v2313_v48 = vshll.u32 %v7802_v7, %v2310_v45  ;;  %v2316_v31 = vshll.u32 %v7833_v51, %v2310_v45  ;;  %v2319_v22 = vshll.u32 %v7834_v55, %v2310_v45 }
 0x38b   : > { %v2322_v13 = vshll.u32 %v7835_v11, %v2310_v45  ;;  %v2325_v4 = vshll.u32 %v7804_v63, %v2310_v45  ;;  %vm2328_vm0 = vcmp.lt.s32.totalorder %v6087_v36, 1  ;;  %vm2330_vm4 = vcmp.lt.s32.totalorder %v6087_v36, 3 }
 0x38c   : > { %v2314_v1 = vshrl.u32 %v7833_v51, %v2311_v6  ;;  %v2317_v53 = vshrl.u32 %v7834_v55, %v2311_v6  ;;  %v2320_v57 = vshrl.u32 %v7835_v11, %v2311_v6  ;;  %v2323_v3 = vshrl.u32 %v7804_v63, %v2311_v6 }
 0x38d   : > { %v2326_v49 = vshrl.u32 %v7836_v10, %v2311_v6  ;;  %vm2331_vm7 = vcmp.lt.s32.totalorder %v6087_v36, 4  ;;  %v2414_v52 = vand.u32 31, %v2412_v40  ;;  %vm2329_vm8 = vcmp.lt.s32.totalorder %v6087_v36, 2 }
 0x38e   : > { %v2315_v27 = vor.u32 %v2314_v1, %v2313_v48  ;;  %v2318_v28 = vor.u32 %v2317_v53, %v2316_v31  ;;  %v2321_v58 = vor.u32 %v2320_v57, %v2319_v22  ;;  %v2324_v43 = vor.u32 %v2323_v3, %v2322_v13 }
 0x38f   : > { %v2327_v35 = vor.u32 %v2326_v49, %v2325_v4  ;;  %v6120_v56 = vsub.s32 32, %v2414_v52  ;;  %v2312_v5 = vshrl.u32 %v7802_v7, %v2311_v6  ;;  %v6137_v33 = vshrl.u32 %v2412_v40, 5 }
 0x390   : > { %v2336_v62 = vsel %vm2328_vm0, %v2315_v27, %v2318_v28  ;;  %v2337_v34 = vsel %vm2331_vm7, %v2324_v43, 920167782  ;;  %v2340_v25 = vsel %vm2328_vm0, %v2318_v28, %v2321_v58  ;;  %v2333_v38 = vsel %vm2331_vm7, %v2321_v58, 2102212464 }
 0x391   : > { %v2341_v42 = vsel %vm2331_vm7, %v2327_v35, 1326507024  ;;  %v2338_v12 = vsel %vm2330_vm4, %v2321_v58, %v2337_v34  ;;  %v2427_v44 = vshrl.u32 %v7804_v63, %v6120_v56  ;;  %v2430_v8 = vshrl.u32 %v7836_v10, %v6120_v56 }
 0x392   : > { %v2342_v32 = vsel %vm2330_vm4, %v2324_v43, %v2341_v42  ;;  %v2339_v54 = vsel %vm2329_vm8, %v2336_v62, %v2338_v12  ;;  %v2332_v30 = vsel %vm2328_vm0, %v2312_v5, %v2315_v27  ;;  %v2418_v59 = vshrl.u32 %v7833_v51, %v6120_v56 }
 0x393   : > { %v2343_v26 = vsel %vm2329_vm8, %v2340_v25, %v2342_v32  ;;  %v6122_v47 = vmul.u32.u64.low %v2344_v37, %v2339_v54  ;;  %v6123_v23 = vmul.u32.u64.high %v2344_v37, %v2339_v54, %v6122_v47  ;;  %v2426_v19 = vshll.u32 %v7835_v11, %v2414_v52 }
 0x394   : > { %v6126_v21 = vmul.u32.u64.low %v2344_v37, %v2343_v26  ;;  %v6127_v14 = vmul.u32.u64.high %v2344_v37, %v2343_v26, %v6126_v21  ;;  %v2429_v45 = vshll.u32 %v7804_v63, %v2414_v52  ;;  %v2334_v60 = vsel %vm2330_vm4, %v2318_v28, %v2333_v38 }
 0x395   : > { %v2421_v6 = vshrl.u32 %v7834_v55, %v6120_v56  ;;  %v2424_v0 = vshrl.u32 %v7835_v11, %v6120_v56  ;;  %v2514_v48 = vadd.s32 1, %v4345_v16  ;;  %v2407_v31 = vand.u32 8388607, %v7759_v46 }
 0x396   : > { %v2417_v1 = vshll.u32 %v7802_v7, %v2414_v52  ;;  %v2428_v53 = vor.u32 %v2427_v44, %v2426_v19  ;;  %v2431_v22 = vor.u32 %v2430_v8, %v2429_v45  ;;  %v2354_v57 = vadd.s32 1, %v6123_v23 }
 0x397   : > { %v2420_v13 = vshll.u32 %v7833_v51, %v2414_v52  ;;  %v2423_v3 = vshll.u32 %v7834_v55, %v2414_v52  ;;  %v2611_v4 = vand.u32 2139095040, %v6139_v61  ;;  %v2335_v49 = vsel %vm2329_vm8, %v2332_v30, %v2334_v60 }
 0x398   : > { %vm2353_vm9 = vc.u32 %v6127_v14, %v6122_v47  ;;  %v2419_v27 = vor.u32 %v2418_v59, %v2417_v1  ;;  %vm2515_vm10 = vcmp.gt.s32.totalorder %v2514_v48, 0  ;;  %vm2435_vm13 = vcmp.lt.s32.totalorder %v6137_v33, 4 }
 0x399   : > { %v2422_v28 = vor.u32 %v2421_v6, %v2420_v13  ;;  %v2425_v58 = vor.u32 %v2424_v0, %v2423_v3  ;;  %v2516_v40 = vsel %vm2515_vm10, %v2514_v48, 0  ;;  %v2441_v17 = vsel %vm2435_vm13, %v2428_v53, 920167782 }
 0x39a   : > { %v2445_v43 = vsel %vm2435_vm13, %v2431_v22, 1326507024  ;;  %v2518_v35 = vand.u32 31, %v2516_v40  ;;  %v2355_v36 = vsel %vm2353_vm9, %v2354_v57, %v6123_v23  ;;  %v2408_v62 = vor.u32 8388608, %v2407_v31 }
 0x39b   : > { %v2351_v2 = vmul.u32 %v2344_v37, %v2335_v49  ;;  %vm2432_vm12 = vcmp.lt.s32.totalorder %v6137_v33, 1  ;;  %vm2434_vm6 = vcmp.lt.s32.totalorder %v6137_v33, 3  ;;  %v2612_v34 = vshrl.u32 %v2611_v4, 23 }
 0x39c   : > { %v2440_v25 = vsel %vm2432_vm12, %v2419_v27, %v2422_v28  ;;  %v2442_v42 = vsel %vm2434_vm6, %v2425_v58, %v2441_v17  ;;  %v2444_v52 = vsel %vm2432_vm12, %v2422_v28, %v2425_v58  ;;  %v2446_v12 = vsel %vm2434_vm6, %v2428_v53, %v2445_v43 }
 0x39d   : > { %v2356_v32 = vadd.s32 %v2355_v36, %v2351_v2  ;;  %v6180_v54 = vsub.s32 32, %v2518_v35  ;;  %vm2433_vm14 = vcmp.lt.s32.totalorder %v6137_v33, 2  ;;  %v2448_v20 = vshll.u32 %v2408_v62, 8 }
 0x39e   : > { %v2443_v26 = vsel %vm2433_vm14, %v2440_v25, %v2442_v42  ;;  %v2447_v37 = vsel %vm2433_vm14, %v2444_v52, %v2446_v12  ;;  %v4349_v23 = vadd.s32 4294967169, %v2612_v34  ;;  %v2416_v30 = vshrl.u32 %v7802_v7, %v6120_v56 }
 0x39f   : > { %v2357_v21 = vadd.s32 536870912, %v2356_v32  ;;  %v2531_v16 = vshrl.u32 %v7804_v63, %v6180_v54  ;;  %v6190_v5 = vmul.u32.u64.low %v2448_v20, %v2447_v37  ;;  %v6191_v38 = vmul.u32.u64.high %v2448_v20, %v2447_v37, %v6190_v5 }
 0x3a0   : > { %v6193_v44 = vmul.u32.u64.low %v2448_v20, %v2443_v26  ;;  %v6194_v8 = vmul.u32.u64.high %v2448_v20, %v2443_v26, %v6193_v44  ;;  %v2522_v59 = vshrl.u32 %v7833_v51, %v6180_v54  ;;  %v2525_v19 = vshrl.u32 %v7834_v55, %v6180_v54 }
 0x3a1   : > { %v2530_v45 = vshll.u32 %v7835_v11, %v2518_v35  ;;  %v6204_v60 = vshrl.u32 %v2516_v40, 5  ;;  %v2528_v6 = vshrl.u32 %v7835_v11, %v6180_v54  ;;  %v2534_v0 = vshrl.u32 %v7836_v10, %v6180_v54 }
 0x3a2   : > { %v2618_v48 = vadd.s32 1, %v4349_v23  ;;  %v6210_v31 = vshrl.u32 %v2357_v21, 30  ;;  %v2521_v56 = vshll.u32 %v7802_v7, %v2518_v35  ;;  %v2524_v1 = vshll.u32 %v7833_v51, %v2518_v35 }
 0x3a3   : > { %v2532_v53 = vor.u32 %v2531_v16, %v2530_v45  ;;  %v2437_v22 = vsel %vm2435_vm13, %v2425_v58, 2102212464  ;;  %v2527_v57 = vshll.u32 %v7834_v55, %v2518_v35  ;;  %v2533_v13 = vshll.u32 %v7804_v63, %v2518_v35 }
 0x3a4   : > { %7837 = vst [vmem:[#allocation6_spill] sm:$0xff] %v6210_v31  ;;  %v2436_v3 = vsel %vm2432_vm12, %v2416_v30, %v2419_v27  ;;  %v2511_v4 = vand.u32 8388607, %v7762_v9  ;;  %v6222_v49 = vor.u32 %v2522_v59, %v2521_v56  ;;  %v6224_v40 = vor.u32 %v2525_v19, %v2524_v1 }
 0x3a5   : > { %v2529_v17 = vor.u32 %v2528_v6, %v2527_v57  ;;  %v2535_v43 = vor.u32 %v2534_v0, %v2533_v13  ;;  %vm2539_vm15 = vcmp.lt.s32.totalorder %v6204_v60, 4  ;;  %vm2619_vm11 = vcmp.gt.s32.totalorder %v2618_v48, 0 }
 0x3a6   : > { %v2359_v58 = vshll.u32 %v6210_v31, 30  ;;  %v2438_v35 = vsel %vm2434_vm6, %v2422_v28, %v2437_v22  ;;  %v2545_v27 = vsel %vm2539_vm15, %v2532_v53, 920167782  ;;  %v2620_v36 = vsel %vm2619_vm11, %v2618_v48, 0 }
 0x3a7   : > { %v2458_v62 = vadd.s32 1, %v6194_v8  ;;  %v2622_v2 = vand.u32 31, %v2620_v36  ;;  %vm2457_vm1 = vc.u32 %v6191_v38, %v6193_v44  ;;  %v2512_v34 = vor.u32 8388608, %v2511_v4 }
 0x3a8   : > { %vm2536_vm3 = vcmp.lt.s32.totalorder %v6204_v60, 1  ;;  %vm2538_vm5 = vcmp.lt.s32.totalorder %v6204_v60, 3  ;;  %v2439_v25 = vsel %vm2433_vm14, %v2436_v3, %v2438_v35  ;;  %v2549_v52 = vsel %vm2539_vm15, %v2535_v43, 1326507024 }
 0x3a9   : > { %v2544_v28 = vsel %vm2536_vm3, %v6222_v49, %v6224_v40  ;;  %v2546_v42 = vsel %vm2538_vm5, %v2529_v17, %v2545_v27  ;;  %v6247_v12 = vsub.s32 %v2356_v32, %v2359_v58  ;;  %v7760_v26 = vand.u32 2147483647, %v6139_v61 }
 0x3aa   : > { %v2459_v37 = vsel %vm2457_vm1, %v2458_v62, %v6194_v8  ;;  %vm2537_vm0 = vcmp.lt.s32.totalorder %v6204_v60, 2  ;;  %v6252_v33 = vsub.s32 32, %v2622_v2  ;;  %v2455_v23 = vmul.u32 %v2448_v20, %v2439_v25  ;;  %v2285_v20 = vpop.f32.mrf.mxu1 }
 0x3ab   : > { %v2547_v21 = vsel %vm2537_vm0, %v2544_v28, %v2546_v42  ;;  %v2548_v16 = vsel %vm2536_vm3, %v6224_v40, %v2529_v17  ;;  %v2550_v32 = vsel %vm2538_vm5, %v2532_v53, %v2549_v52  ;;  %v6261_v5 = vshll.u32 %v2512_v34, 8 }
 0x3ac   : > { %v2362_v30 = vsub.s32 0, %v6247_v12  ;;  %v6264_v8 = vadd.s32 %v2459_v37, %v2455_v23  ;;  %v2615_v59 = vand.u32 8388607, %v7760_v26  ;;  %v2551_v19 = vsel %vm2537_vm0, %v2548_v16, %v2550_v32 }
 0x3ad   : > { %v6271_v45 = vmul.u32.u64.low %v6261_v5, %v2547_v21  ;;  %v6272_v6 = vmul.u32.u64.high %v6261_v5, %v2547_v21, %v6271_v45  ;;  %v2626_v0 = vshrl.u32 %v7833_v51, %v6252_v33  ;;  %v2629_v48 = vshrl.u32 %v7834_v55, %v6252_v33 }
 0x3ae   : > { %v2632_v56 = vshrl.u32 %v7835_v11, %v6252_v33  ;;  %v2634_v1 = vshll.u32 %v7835_v11, %v2622_v2  ;;  %v2635_v53 = vshrl.u32 %v7804_v63, %v6252_v33  ;;  %v6284_v22 = vshrl.u32 %v2620_v36, 5 }
 0x3af   : > { %v2625_v57 = vshll.u32 %v7802_v7, %v2622_v2  ;;  %v2638_v13 = vshrl.u32 %v7836_v10, %v6252_v33  ;;  %v6290_v3 = vadd.f32 %v2285_v20, %v6072_v15  ;;  %v2628_v4 = vshll.u32 %v7833_v51, %v2622_v2 }
 0x3b0   : > { %v2631_v43 = vshll.u32 %v7834_v55, %v2622_v2  ;;  %v2636_v58 = vor.u32 %v2635_v53, %v2634_v1  ;;  %v2637_v35 = vshll.u32 %v7804_v63, %v2622_v2  ;;  %v4338_v27 = vmin.u32 %v2362_v30, %v6247_v12  ;;  %v2287_v53 = vpop.f32.mrf.mxu1 }
 0x3b1   : > { %v2461_v36 = vadd.s32 536870912, %v6264_v8  ;;  %v6298_v62 = vmul.u32.u64.low %v6261_v5, %v2551_v19  ;;  %v6299_v34 = vmul.u32.u64.high %v6261_v5, %v2551_v19, %v6298_v62  ;;  %v2627_v25 = vor.u32 %v2626_v0, %v2625_v57 }
 0x3b2   : > { %v2630_v28 = vor.u32 %v2629_v48, %v2628_v4  ;;  %v2633_v42 = vor.u32 %v2632_v56, %v2631_v43  ;;  %v2639_v52 = vor.u32 %v2638_v13, %v2637_v35  ;;  %vm2643_vm4 = vcmp.lt.s32.totalorder %v6284_v22, 4 }
 0x3b3   : > { %v2541_v37 = vsel %vm2539_vm15, %v2529_v17, 2102212464  ;;  %v2616_v23 = vor.u32 8388608, %v2615_v59  ;;  %v2649_v2 = vsel %vm2643_vm4, %v2636_v58, 920167782  ;;  %v2715_v21 = vand.u32 2139095040, %v6290_v3 }
 0x3b4   : > { %v2364_v16 = vclz %v4338_v27  ;;  %v2520_v32 = vshrl.u32 %v7802_v7, %v6180_v54  ;;  %vm2640_vm7 = vcmp.lt.s32.totalorder %v6284_v22, 1  ;;  %vm2642_vm8 = vcmp.lt.s32.totalorder %v6284_v22, 3 }
 0x3b5   : > { %v6311_v30 = vshrl.u32 %v2461_v36, 30  ;;  %v2648_v20 = vsel %vm2640_vm7, %v2627_v25, %v2630_v28  ;;  %v2650_v17 = vsel %vm2642_vm8, %v2633_v42, %v2649_v2  ;;  %v2653_v59 = vsel %vm2643_vm4, %v2639_v52, 1326507024 }
 0x3b6   : > { %v2540_v19 = vsel %vm2536_vm3, %v2520_v32, %v6222_v49  ;;  %v2542_v54 = vsel %vm2538_vm5, %v6224_v40, %v2541_v37  ;;  %v2652_v0 = vsel %vm2640_vm7, %v2630_v28, %v2633_v42  ;;  %v2654_v48 = vsel %vm2642_vm8, %v2636_v58, %v2653_v59 }
 0x3b7   : > { %7838 = vst [vmem:[#allocation5_spill] sm:$0xff] %v6311_v30  ;;  %v2562_v56 = vadd.s32 1, %v6272_v6  ;;  %vm2641_vm9 = vcmp.lt.s32.totalorder %v6284_v22, 2  ;;  %v2716_v1 = vshrl.u32 %v2715_v21, 23  ;;  %v4339_v57 = vadd.s32 4294967294, %v2364_v16 }
 0x3b8   : > { %vm2561_vm10 = vc.u32 %v6299_v34, %v6271_v45  ;;  %v2651_v49 = vsel %vm2641_vm9, %v2648_v20, %v2650_v17  ;;  %v2543_v40 = vsel %vm2537_vm0, %v2540_v19, %v2542_v54  ;;  %v2655_v13 = vsel %vm2641_vm9, %v2652_v0, %v2654_v48 }
 0x3b9   : > { %v6339_v4 = vshll.u32 %v2616_v23, 8  ;;  %v4353_v43 = vadd.s32 4294967169, %v2716_v1  ;;  %v2463_v58 = vshll.u32 %v6311_v30, 30  ;;  %v6343_v35 = vadd.f32 %v2287_v53, %v6072_v15 }
 0x3ba   : > { %v2563_v27 = vsel %vm2561_vm10, %v2562_v56, %v6272_v6  ;;  %vm4340_vm13 = vcmp.lt.s32.totalorder %v4339_v57, 0  ;;  %v2559_v52 = vmul.u32 %v6261_v5, %v2543_v40  ;;  %v2645_v2 = vsel %vm2643_vm4, %v2633_v42, 2102212464 }
 0x3bb   : > { %v6347_v36 = vmul.u32.u64.low %v6339_v4, %v2651_v49  ;;  %v6348_v62 = vmul.u32.u64.high %v6339_v4, %v2651_v49, %v6347_v36  ;;  %v2722_v60 = vadd.s32 1, %v4353_v43  ;;  %v6359_v15 = vsub.s32 %v6264_v8, %v2463_v58 }
 0x3bc   : > { %v6353_v37 = vmul.u32.u64.low %v6339_v4, %v2655_v13  ;;  %v6354_v23 = vmul.u32.u64.high %v6339_v4, %v2655_v13, %v6353_v37  ;;  %v6361_v6 = vadd.s32 %v2563_v27, %v2559_v52  ;;  %v2624_v21 = vshrl.u32 %v7802_v7, %v6252_v33 }
 0x3bd   : > { %vm2723_vm12 = vcmp.gt.s32.totalorder %v2722_v60, 0  ;;  %v2819_v16 = vand.u32 2139095040, %v6343_v35  ;;  %v6366_v32 = vsel %vm4340_vm13, 0, %v4339_v57  ;;  %v7763_v5 = vand.u32 2147483647, %v6290_v3 }
 0x3be   : > { %v2724_v20 = vsel %vm2723_vm12, %v2722_v60, 0  ;;  %v2644_v17 = vsel %vm2640_vm7, %v2624_v21, %v2627_v25  ;;  %v2646_v42 = vsel %vm2642_vm8, %v2630_v28, %v2645_v2  ;;  %v2372_v59 = vsub.s32 4294967266, %v6366_v32 }
 0x3bf   : > { %v2726_v8 = vand.u32 31, %v2724_v20  ;;  %v2466_v19 = vsub.s32 0, %v6359_v15  ;;  %v2565_v33 = vadd.s32 536870912, %v6361_v6  ;;  %v2820_v54 = vshrl.u32 %v2819_v16, 23 }
 0x3c0   : > { %v2647_v0 = vsel %vm2641_vm9, %v2644_v17, %v2646_v42  ;;  %v2666_v48 = vadd.s32 1, %v6348_v62  ;;  %v2719_v56 = vand.u32 8388607, %v7763_v5  ;;  %vm2665_vm6 = vc.u32 %v6354_v23, %v6347_v36 }
 0x3c1   : > { %v2727_v25 = vsub.s32 32, %v2726_v8  ;;  %v2725_v28 = vshrl.u32 %v2724_v20, 5  ;;  %v2729_v1 = vshll.u32 %v7802_v7, %v2726_v8  ;;  %v2732_v53 = vshll.u32 %v7833_v51, %v2726_v8 }
 0x3c2   : > { %v2735_v22 = vshll.u32 %v7834_v55, %v2726_v8  ;;  %v2738_v13 = vshll.u32 %v7835_v11, %v2726_v8  ;;  %v2741_v58 = vshll.u32 %v7804_v63, %v2726_v8  ;;  %v4357_v27 = vadd.s32 4294967169, %v2820_v54 }
 0x3c3   : > { %v2730_v57 = vshrl.u32 %v7833_v51, %v2727_v25  ;;  %v2733_v49 = vshrl.u32 %v7834_v55, %v2727_v25  ;;  %v2736_v40 = vshrl.u32 %v7835_v11, %v2727_v25  ;;  %v2739_v43 = vshrl.u32 %v7804_v63, %v2727_v25 }
 0x3c4   : > { %v2742_v2 = vshrl.u32 %v7836_v10, %v2727_v25  ;;  %v6393_v21 = vshrl.u32 %v2565_v33, 30  ;;  %v2663_v16 = vmul.u32 %v6339_v4, %v2647_v0  ;;  %v2720_v20 = vor.u32 8388608, %v2719_v56 }
 0x3c5   : > { %v2731_v60 = vor.u32 %v2730_v57, %v2729_v1  ;;  %v2734_v52 = vor.u32 %v2733_v49, %v2732_v53  ;;  %v2737_v37 = vor.u32 %v2736_v40, %v2735_v22  ;;  %v2740_v17 = vor.u32 %v2739_v43, %v2738_v13 }
 0x3c6   : > { %v2667_v42 = vsel %vm2665_vm6, %v2666_v48, %v6348_v62  ;;  %v2743_v46 = vor.u32 %v2742_v2, %v2741_v58  ;;  %vm2744_vm14 = vcmp.lt.s32.totalorder %v2725_v28, 1  ;;  %v7761_v8 = vand.u32 2147483647, %v6343_v35 }
 0x3c7   : > { %vm2746_vm15 = vcmp.lt.s32.totalorder %v2725_v28, 3  ;;  %vm2747_vm11 = vcmp.lt.s32.totalorder %v2725_v28, 4  ;;  %v2752_v54 = vsel %vm2744_vm14, %v2731_v60, %v2734_v52  ;;  %v2826_v1 = vadd.s32 1, %v4357_v27 }
 0x3c8   : > { %v2749_v33 = vsel %vm2747_vm11, %v2737_v37, 2102212464  ;;  %v2753_v53 = vsel %vm2747_vm11, %v2740_v17, 920167782  ;;  %v2756_v4 = vsel %vm2744_vm14, %v2734_v52, %v2737_v37  ;;  %v2757_v0 = vsel %vm2747_vm11, %v2743_v46, 1326507024 }
 0x3c9   : > { %v6403_v56 = vadd.s32 %v2667_v42, %v2663_v16  ;;  %v2728_v57 = vshrl.u32 %v7802_v7, %v2727_v25  ;;  %vm2745_vm1 = vcmp.lt.s32.totalorder %v2725_v28, 2  ;;  %v2754_v62 = vsel %vm2746_vm15, %v2737_v37, %v2753_v53 }
 0x3ca   : > { %v4342_v48 = vmin.u32 %v2466_v19, %v6359_v15  ;;  %v2755_v49 = vsel %vm2745_vm1, %v2752_v54, %v2754_v62  ;;  %v2758_v22 = vsel %vm2746_vm15, %v2740_v17, %v2757_v0  ;;  %v2760_v40 = vshll.u32 %v2720_v20, 8 }
 0x3cb   : > { %v2748_v13 = vsel %vm2744_vm14, %v2728_v57, %v2731_v60  ;;  %v2750_v43 = vsel %vm2746_vm15, %v2734_v52, %v2749_v33  ;;  %v2759_v46 = vsel %vm2745_vm1, %v2756_v4, %v2758_v22  ;;  %vm2827_vm3 = vcmp.gt.s32.totalorder %v2826_v1, 0 }
 0x3cc   : > { %v2567_v58 = vshll.u32 %v6393_v21, 30  ;;  %v6414_v25 = vmul.u32.u64.low %v2760_v40, %v2759_v46  ;;  %v6415_v27 = vmul.u32.u64.high %v2760_v40, %v2759_v46, %v6414_v25  ;;  %v2828_v37 = vsel %vm2827_vm3, %v2826_v1, 0 }
 0x3cd   : > { %v2669_v19 = vadd.s32 536870912, %v6403_v56  ;;  %v6418_v2 = vmul.u32.u64.low %v2760_v40, %v2755_v49  ;;  %v6419_v16 = vmul.u32.u64.high %v2760_v40, %v2755_v49, %v6418_v2  ;;  %v2823_v60 = vand.u32 8388607, %v7761_v8 }
 0x3ce   : > { %v2751_v52 = vsel %vm2745_vm1, %v2748_v13, %v2750_v43  ;;  %v2830_v20 = vand.u32 31, %v2828_v37  ;;  %v6427_v17 = vadd.s32 %v6122_v47, %v6127_v14  ;;  %v6430_v54 = vadd.s32 127, %v2372_v59  ;;  %v2291_v13 = vpop.f32.mrf.mxu1 }
 0x3cf   : > { %v2468_v1 = vclz %v4342_v48  ;;  %v6433_v33 = vsub.s32 %v6361_v6, %v2567_v58  ;;  %vm2769_vm5 = vc.u32 %v6415_v27, %v6418_v2  ;;  %v6437_v4 = vshrl.u32 %v2669_v19, 30 }
 0x3d0   : > { %v2831_v53 = vsub.s32 32, %v2830_v20  ;;  %v2767_v28 = vmul.u32 %v2760_v40, %v2751_v52  ;;  %v2770_v0 = vadd.s32 1, %v6419_v16  ;;  %v2824_v57 = vor.u32 8388608, %v2823_v60 }
 0x3d1   : > { %v2829_v47 = vshrl.u32 %v2828_v37, 5  ;;  %v2833_v14 = vshll.u32 %v7802_v7, %v2830_v20  ;;  %v2836_v48 = vshll.u32 %v7833_v51, %v2830_v20  ;;  %v2839_v49 = vshll.u32 %v7834_v55, %v2830_v20 }
 0x3d2   : > { %v2834_v59 = vshrl.u32 %v7833_v51, %v2831_v53  ;;  %v2837_v62 = vshrl.u32 %v7834_v55, %v2831_v53  ;;  %v2771_v6 = vsel %vm2769_vm5, %v2770_v0, %v6419_v16  ;;  %v2840_v22 = vshrl.u32 %v7835_v11, %v2831_v53 }
 0x3d3   : > { %v4343_v40 = vadd.s32 4294967294, %v2468_v1  ;;  %v2570_v43 = vsub.s32 0, %v6433_v33  ;;  %v2772_v46 = vadd.s32 %v2771_v6, %v2767_v28  ;;  %v2842_v19 = vshll.u32 %v7835_v11, %v2830_v20  ;;  %v2293_v6 = vpop.f32.mrf.mxu1 }
 0x3d4   : > { %v2835_v58 = vor.u32 %v2834_v59, %v2833_v14  ;;  %v2838_v25 = vor.u32 %v2837_v62, %v2836_v48  ;;  %v2841_v37 = vor.u32 %v2840_v22, %v2839_v49  ;;  %v2843_v60 = vshrl.u32 %v7804_v63, %v2831_v53 }
 0x3d5   : > { %v2773_v52 = vadd.s32 536870912, %v2772_v46  ;;  %v2845_v16 = vshll.u32 %v7804_v63, %v2830_v20  ;;  %v2846_v0 = vshrl.u32 %v7836_v10, %v2831_v53  ;;  %v6453_v26 = vadd.f32 %v2291_v13, %v6080_v50 }
 0x3d6   : > { %v2671_v1 = vshll.u32 %v6437_v4, 30  ;;  %v2844_v8 = vor.u32 %v2843_v60, %v2842_v19  ;;  %vm2848_vm0 = vcmp.lt.s32.totalorder %v2829_v47, 1  ;;  %v2864_v28 = vshll.u32 %v2824_v57, 8 }
 0x3d7   : > { %v6456_v14 = vshrl.u32 %v2773_v52, 30  ;;  %v2832_v59 = vshrl.u32 %v7802_v7, %v2831_v53  ;;  %v2847_v62 = vor.u32 %v2846_v0, %v2845_v16  ;;  %vm2851_vm4 = vcmp.lt.s32.totalorder %v2829_v47, 4 }
 0x3d8   : > { %vm2850_vm7 = vcmp.lt.s32.totalorder %v2829_v47, 3  ;;  %v2853_v48 = vsel %vm2851_vm4, %v2841_v37, 2102212464  ;;  %v2856_v20 = vsel %vm2848_vm0, %v2835_v58, %v2838_v25  ;;  %v2857_v49 = vsel %vm2851_vm4, %v2844_v8, 920167782 }
 0x3d9   : > { %v2775_v22 = vshll.u32 %v6456_v14, 30  ;;  %vm2849_vm8 = vcmp.lt.s32.totalorder %v2829_v47, 2  ;;  %v2858_v13 = vsel %vm2850_vm7, %v2841_v37, %v2857_v49  ;;  %v2860_v9 = vsel %vm2848_vm0, %v2838_v25, %v2841_v37 }
 0x3da   : > { %v2852_v5 = vsel %vm2848_vm0, %v2832_v59, %v2835_v58  ;;  %v2859_v19 = vsel %vm2849_vm8, %v2856_v20, %v2858_v13  ;;  %v2861_v57 = vsel %vm2851_vm4, %v2847_v62, 1326507024  ;;  %v6462_v60 = vadd.f32 %v2293_v6, %v6080_v50 }
 0x3db   : > { %v2854_v53 = vsel %vm2850_vm7, %v2838_v25, %v2853_v48  ;;  %v2862_v52 = vsel %vm2850_vm7, %v2844_v8, %v2861_v57  ;;  %v6464_v16 = vmul.u32.u64.low %v2864_v28, %v2859_v19  ;;  %v6465_v0 = vmul.u32.u64.high %v2864_v28, %v2859_v19, %v6464_v16 }
 0x3dc   : > { %v6469_v39 = vsub.s32 %v6403_v56, %v2671_v1  ;;  %v6471_v42 = vsub.s32 %v2772_v46, %v2775_v22  ;;  %v2863_v37 = vsel %vm2849_vm8, %v2860_v9, %v2862_v52  ;;  %v2923_v58 = vand.u32 2139095040, %v6453_v26 }
 0x3dd   : > { %v6475_v59 = vmul.u32.u64.low %v2864_v28, %v2863_v37  ;;  %v6476_v62 = vmul.u32.u64.high %v2864_v28, %v2863_v37, %v6475_v59  ;;  %v7839_v50 = vsub.s32 32, %v6366_v32  ;;  %v2855_v25 = vsel %vm2849_vm8, %v2852_v5, %v2854_v53 }
 0x3de   : > { %v2924_v6 = vshrl.u32 %v2923_v58, 23  ;;  %v3027_v48 = vand.u32 2139095040, %v6462_v60  ;;  %v2369_v56 = vshll.u32 %v6247_v12, %v6366_v32  ;;  %v2374_v46 = vshll.u32 %v6430_v54, 23 }
 0x3df   : > { %v2370_v8 = vshrl.u32 %v6427_v17, %v7839_v50  ;;  %v4346_v9 = vmin.u32 %v2570_v43, %v6433_v33  ;;  %v2874_v1 = vadd.s32 1, %v6465_v0  ;;  %vm4344_vm9 = vcmp.lt.s32.totalorder %v4343_v40, 0 }
 0x3e0   : > { %v2674_v20 = vsub.s32 0, %v6469_v39  ;;  %v2778_v49 = vsub.s32 0, %v6471_v42  ;;  %v4361_v17 = vadd.s32 4294967169, %v2924_v6  ;;  %v2871_v47 = vmul.u32 %v2864_v28, %v2855_v25 }
 0x3e1   : > { %vm2873_vm10 = vc.u32 %v6476_v62, %v6464_v16  ;;  %v3028_v5 = vshrl.u32 %v3027_v48, 23  ;;  %v6492_v22 = vor.u32 %v2370_v8, %v2369_v56  ;;  %v6495_v54 = vor.u32 4788187, %v2374_v46 }
 0x3e2   : > { %v2875_v12 = vsel %vm2873_vm10, %v2874_v1, %v6465_v0  ;;  %v2930_v32 = vadd.s32 1, %v4361_v17  ;;  %v6497_v43 = vsel %vm4344_vm9, 0, %v4343_v40  ;;  %v2572_v13 = vclz %v4346_v9 }
 0x3e3   : > { %v2876_v19 = vadd.s32 %v2875_v12, %v2871_v47  ;;  %v4350_v57 = vmin.u32 %v2674_v20, %v6469_v39  ;;  %v4354_v53 = vmin.u32 %v2778_v49, %v6471_v42  ;;  %v7765_v28 = vand.u32 2147483647, %v6453_v26 }
 0x3e4   : > { %vm2931_vm13 = vcmp.gt.s32.totalorder %v2930_v32, 0  ;;  %v4365_v58 = vadd.s32 4294967169, %v3028_v5  ;;  %v6505_v0 = vadd.s32 %v6193_v44, %v6191_v38  ;;  %v6509_v25 = vadd.s32 4294967294, %v2572_v13 }
 0x3e5   : > { %v2877_v52 = vadd.s32 536870912, %v2876_v19  ;;  %v2932_v37 = vsel %vm2931_vm13, %v2930_v32, 0  ;;  %v2676_v48 = vclz %v4350_v57  ;;  %v2780_v56 = vclz %v4354_v53 }
 0x3e6   : > { %v2934_v40 = vand.u32 31, %v2932_v37  ;;  %v2927_v46 = vand.u32 8388607, %v7765_v28  ;;  %v3034_v20 = vadd.s32 1, %v4365_v58  ;;  %v2933_v32 = vshrl.u32 %v2932_v37, 5 }
 0x3e7   : > { %v6511_v6 = vshrl.u32 %v2877_v52, 30  ;;  %v4351_v53 = vadd.s32 4294967294, %v2676_v48  ;;  %v7771_v24 = vand.u32 2147483647, %v6462_v60  ;;  %v4355_v31 = vadd.s32 4294967294, %v2780_v56 }
 0x3e8   : > { %v2935_v9 = vsub.s32 32, %v2934_v40  ;;  %v2937_v38 = vshll.u32 %v7802_v7, %v2934_v40  ;;  %v2940_v44 = vshll.u32 %v7833_v51, %v2934_v40  ;;  %v2943_v47 = vshll.u32 %v7834_v55, %v2934_v40 }
 0x3e9   : > { %v2879_v1 = vshll.u32 %v6511_v6, 30  ;;  %v2946_v13 = vshll.u32 %v7835_v11, %v2934_v40  ;;  %v2928_v59 = vor.u32 8388608, %v2927_v46  ;;  %v2949_v30 = vshll.u32 %v7804_v63, %v2934_v40 }
 0x3ea   : > { %v2938_v49 = vshrl.u32 %v7833_v51, %v2935_v9  ;;  %v2941_v17 = vshrl.u32 %v7834_v55, %v2935_v9  ;;  %v2944_v5 = vshrl.u32 %v7835_v11, %v2935_v9  ;;  %v2947_v57 = vshrl.u32 %v7804_v63, %v2935_v9 }
 0x3eb   : > { %v6522_v12 = vsub.s32 %v2876_v19, %v2879_v1  ;;  %v2950_v19 = vshrl.u32 %v7836_v10, %v2935_v9  ;;  %vm3035_vm12 = vcmp.gt.s32.totalorder %v3034_v20, 0  ;;  %vm2952_vm6 = vcmp.lt.s32.totalorder %v2933_v32, 1 }
 0x3ec   : > { %v2939_v52 = vor.u32 %v2938_v49, %v2937_v38  ;;  %v2942_v28 = vor.u32 %v2941_v17, %v2940_v44  ;;  %v2945_v8 = vor.u32 %v2944_v5, %v2943_v47  ;;  %v2948_v50 = vor.u32 %v2947_v57, %v2946_v13 }
 0x3ed   : > { %v2882_v58 = vsub.s32 0, %v6522_v12  ;;  %vm2954_vm14 = vcmp.lt.s32.totalorder %v2933_v32, 3  ;;  %vm2955_vm15 = vcmp.lt.s32.totalorder %v2933_v32, 4  ;;  %v2951_v48 = vor.u32 %v2950_v19, %v2949_v30 }
 0x3ee   : > { %v2957_v1 = vsel %vm2955_vm15, %v2945_v8, 2102212464  ;;  %v2960_v38 = vsel %vm2952_vm6, %v2939_v52, %v2942_v28  ;;  %v2961_v44 = vsel %vm2955_vm15, %v2948_v50, 920167782  ;;  %v2936_v49 = vshrl.u32 %v7802_v7, %v2935_v9 }
 0x3ef   : > { %v4358_v37 = vmin.u32 %v2882_v58, %v6522_v12  ;;  %vm2953_vm11 = vcmp.lt.s32.totalorder %v2933_v32, 2  ;;  %v2962_v56 = vsel %vm2954_vm14, %v2945_v8, %v2961_v44  ;;  %v2964_v17 = vsel %vm2952_vm6, %v2942_v28, %v2945_v8 }
 0x3f0   : > { %v2963_v40 = vsel %vm2953_vm11, %v2960_v38, %v2962_v56  ;;  %v2965_v47 = vsel %vm2955_vm15, %v2951_v48, 1326507024  ;;  %v2968_v5 = vshll.u32 %v2928_v59, 8  ;;  %vm4356_vm1 = vcmp.lt.s32.totalorder %v4355_v31, 0 }
 0x3f1   : > { %v2884_v46 = vclz %v4358_v37  ;;  %v2956_v13 = vsel %vm2952_vm6, %v2936_v49, %v2939_v52  ;;  %v2958_v30 = vsel %vm2954_vm14, %v2942_v28, %v2957_v1  ;;  %v2966_v57 = vsel %vm2954_vm14, %v2948_v50, %v2965_v47 }
 0x3f2   : > { %v2967_v58 = vsel %vm2953_vm11, %v2964_v17, %v2966_v57  ;;  %v6540_v19 = vmul.u32.u64.low %v2968_v5, %v2963_v40  ;;  %v6541_v9 = vmul.u32.u64.high %v2968_v5, %v2963_v40, %v6540_v19  ;;  %v3036_v37 = vsel %vm3035_vm12, %v3034_v20, 0 }
 0x3f3   : > { %vm4348_vm3 = vcmp.lt.s32.totalorder %v6509_v25, 0  ;;  %v4359_v8 = vadd.s32 4294967294, %v2884_v46  ;;  %v6546_v48 = vmul.u32.u64.low %v2968_v5, %v2967_v58  ;;  %v6547_v59 = vmul.u32.u64.high %v2968_v5, %v2967_v58, %v6546_v48 }
 0x3f4   : > { %vm4352_vm5 = vcmp.lt.s32.totalorder %v4351_v53, 0  ;;  %v2959_v52 = vsel %vm2953_vm11, %v2956_v13, %v2958_v30  ;;  %v3031_v28 = vand.u32 8388607, %v7771_v24  ;;  %v3038_v50 = vand.u32 31, %v3036_v37 }
 0x3f5   : > { %v7840_v1 = vand.u32 2147483647, %v6495_v54  ;;  %v7841_v38 = vcvt.s32.f32 %v6492_v22  ;;  %v6561_v46 = vadd.s32 %v6271_v45, %v6299_v34  ;;  %v6564_v49 = vsel %vm4356_vm1, 0, %v4355_v31 }
 0x3f6   : > { %v7842_v32 = vsub.s32 4294967266, %v6497_v43  ;;  %v6571_v40 = vsel %vm4348_vm3, 0, %v6509_v25  ;;  %v2978_v22 = vadd.s32 1, %v6541_v9  ;;  %v3039_v54 = vsub.s32 32, %v3038_v50 }
 0x3f7   : > { %v6556_v44 = vmul.f32 %v7841_v38, %v7840_v1  ;;  %v6574_v17 = vsel %vm4352_vm5, 0, %v4351_v53  ;;  %vm4360_vm0 = vcmp.lt.s32.totalorder %v4359_v8, 0  ;;  %v2975_v47 = vmul.u32 %v2968_v5, %v2959_v52 }
 0x3f8   : > { %v6568_v56 = vadd.s32 127, %v7842_v32  ;;  %vm2977_vm4 = vc.u32 %v6547_v59, %v6540_v19  ;;  %v2788_v31 = vsub.s32 4294967266, %v6564_v49  ;;  %v3032_v34 = vor.u32 8388608, %v3031_v28 }
 0x3f9   : > { %v2979_v45 = vsel %vm2977_vm4, %v2978_v22, %v6541_v9  ;;  %v3042_v13 = vshrl.u32 %v7833_v51, %v3039_v54  ;;  %v3041_v25 = vshll.u32 %v7802_v7, %v3038_v50  ;;  %v3044_v57 = vshll.u32 %v7833_v51, %v3038_v50 }
 0x3fa   : > { %v2980_v30 = vadd.s32 %v2979_v45, %v2975_v47  ;;  %v3045_v53 = vshrl.u32 %v7834_v55, %v3039_v54  ;;  %v6584_v58 = vsel %vm4360_vm0, 0, %v4359_v8  ;;  %v3037_v5 = vshrl.u32 %v3036_v37, 5 }
 0x3fb   : > { %v3047_v48 = vshll.u32 %v7834_v55, %v3038_v50  ;;  %v3048_v52 = vshrl.u32 %v7835_v11, %v3039_v54  ;;  %v3043_v38 = vor.u32 %v3042_v13, %v3041_v25  ;;  %v3050_v28 = vshll.u32 %v7835_v11, %v3038_v50 }
 0x3fc   : > { %v2981_v1 = vadd.s32 536870912, %v2980_v30  ;;  %v3046_v9 = vor.u32 %v3045_v53, %v3044_v57  ;;  %v3051_v22 = vshrl.u32 %v7804_v63, %v3039_v54  ;;  %v3053_v47 = vshll.u32 %v7804_v63, %v3038_v50 }
 0x3fd   : > { %v3049_v32 = vor.u32 %v3048_v52, %v3047_v48  ;;  %v3054_v45 = vshrl.u32 %v7836_v10, %v3039_v54  ;;  %v2684_v8 = vsub.s32 4294967266, %v6574_v17  ;;  %v2768_v37 = vadd.s32 %v6418_v2, %v6415_v27 }
 0x3fe   : > { %v6595_v24 = vshrl.u32 %v2981_v1, 30  ;;  %v3072_v20 = vshll.u32 %v3032_v34, 8  ;;  %v2789_v55 = vadd.s32 127, %v2788_v31  ;;  %v2892_v13 = vsub.s32 4294967266, %v6584_v58 }
 0x3ff   : > { %v3052_v25 = vor.u32 %v3051_v22, %v3050_v28  ;;  %v3055_v57 = vor.u32 %v3054_v45, %v3053_v47  ;;  %v3040_v48 = vshrl.u32 %v7802_v7, %v3039_v54  ;;  %vm3056_vm7 = vcmp.lt.s32.totalorder %v3037_v5, 1 }
 0x400   : > { %v2983_v53 = vshll.u32 %v6595_v24, 30  ;;  %vm3059_vm8 = vcmp.lt.s32.totalorder %v3037_v5, 4  ;;  %vm3058_vm9 = vcmp.lt.s32.totalorder %v3037_v5, 3  ;;  %v3064_v52 = vsel %vm3056_vm7, %v3043_v38, %v3046_v9 }
 0x401   : > { %v3061_v50 = vsel %vm3059_vm8, %v3049_v32, 2102212464  ;;  %v3065_v10 = vsel %vm3059_vm8, %v3052_v25, 920167782  ;;  %vm3057_vm10 = vcmp.lt.s32.totalorder %v3037_v5, 2  ;;  %v3068_v2 = vsel %vm3056_vm7, %v3046_v9, %v3049_v32 }
 0x402   : > { %v6600_v63 = vsub.s32 %v2980_v30, %v2983_v53  ;;  %v3066_v27 = vsel %vm3058_vm9, %v3049_v32, %v3065_v10  ;;  %v2784_v31 = vsub.s32 32, %v6564_v49  ;;  %v2790_v34 = vshll.u32 %v2789_v55, 23 }
 0x403   : > { %v3067_v1 = vsel %vm3057_vm10, %v3064_v52, %v3066_v27  ;;  %v3069_v28 = vsel %vm3059_vm8, %v3055_v57, 1326507024  ;;  %v3060_v54 = vsel %vm3056_vm7, %v3040_v48, %v3043_v38  ;;  %v3062_v47 = vsel %vm3058_vm9, %v3046_v9, %v3061_v50 }
 0x404   : > { %v2986_v22 = vsub.s32 0, %v6600_v63  ;;  %v3070_v45 = vsel %vm3058_vm9, %v3052_v25, %v3069_v28  ;;  %v2893_v11 = vadd.s32 127, %v2892_v13  ;;  %v2580_v10 = vsub.s32 4294967266, %v6571_v40 }
 0x405   : > { %v3071_v51 = vsel %vm3057_vm10, %v3068_v2, %v3070_v45  ;;  %v6606_v7 = vmul.u32.u64.low %v3072_v20, %v3067_v1  ;;  %v6607_v30 = vmul.u32.u64.high %v3072_v20, %v3067_v1, %v6606_v7  ;;  %v2478_v57 = vshll.u32 %v6568_v56, 23 }
 0x406   : > { %v4362_v32 = vmin.u32 %v2986_v22, %v6600_v63  ;;  %v6612_v55 = vmul.u32.u64.low %v3072_v20, %v3071_v51  ;;  %v6613_v53 = vmul.u32.u64.high %v3072_v20, %v3071_v51, %v6612_v55  ;;  %v2786_v52 = vshrl.u32 %v2768_v37, %v2784_v31 }
 0x407   : > { %v2888_v38 = vsub.s32 32, %v6584_v58  ;;  %v3063_v9 = vsel %vm3057_vm10, %v3060_v54, %v3062_v47  ;;  %v2664_v13 = vadd.s32 %v6347_v36, %v6354_v23  ;;  %v2685_v25 = vadd.s32 127, %v2684_v8 }
 0x408   : > { %v2872_v48 = vadd.s32 %v6464_v16, %v6476_v62  ;;  %v2988_v50 = vclz %v4362_v32  ;;  %v2785_v27 = vshll.u32 %v6471_v42, %v6564_v49  ;;  %v2791_v51 = vor.u32 4788187, %v2790_v34 }
 0x409   : > { %v2894_v2 = vshll.u32 %v2893_v11, 23  ;;  %v3082_v1 = vadd.s32 1, %v6607_v30  ;;  %v2581_v37 = vadd.s32 127, %v2580_v10  ;;  %v3079_v28 = vmul.u32 %v3072_v20, %v3063_v9 }
 0x40a   : > { %v4363_v31 = vadd.s32 4294967294, %v2988_v50  ;;  %vm3081_vm13 = vc.u32 %v6613_v53, %v6606_v7  ;;  %v2680_v36 = vsub.s32 32, %v6574_v17  ;;  %v2787_v23 = vor.u32 %v2786_v52, %v2785_v27 }
 0x40b   : > { %v2890_v5 = vshrl.u32 %v2872_v48, %v2888_v38  ;;  %v3083_v16 = vsel %vm3081_vm13, %v3082_v1, %v6607_v30  ;;  %v2576_v62 = vsub.s32 32, %v6571_v40  ;;  %v2686_v8 = vshll.u32 %v2685_v25, 23 }
 0x40c   : > { %vm4364_vm12 = vcmp.lt.s32.totalorder %v4363_v31, 0  ;;  %v3084_v42 = vadd.s32 %v3083_v16, %v3079_v28  ;;  %v2792_v11 = vand.u32 2147483647, %v2791_v51  ;;  %v2889_v49 = vshll.u32 %v6522_v12, %v6584_v58 }
 0x40d   : > { %v2895_v34 = vor.u32 4788187, %v2894_v2  ;;  %v2991_v20 = vsel %vm4364_vm12, 0, %v4363_v31  ;;  %vm2298_vm6 = vcmp.lt.s32.totalorder %v6074_v41, 0  ;;  %v2582_v22 = vshll.u32 %v2581_v37, 23 }
 0x40e   : > { %v2992_v54 = vsub.s32 32, %v2991_v20  ;;  %v2996_v47 = vsub.s32 4294967266, %v2991_v20  ;;  %v3085_v45 = vadd.s32 536870912, %v3084_v42  ;;  %v2682_v10 = vshrl.u32 %v2664_v13, %v2680_v36 }
 0x40f   : > { %v2794_v32 = vcvt.s32.f32 %v2787_v23  ;;  %v2891_v30 = vor.u32 %v2890_v5, %v2889_v49  ;;  %v2976_v55 = vadd.s32 %v6540_v19, %v6547_v59  ;;  %v2578_v52 = vshrl.u32 %v6561_v46, %v2576_v62 }
 0x410   : > { %v2681_v38 = vshll.u32 %v6469_v39, %v6574_v17  ;;  %v2997_v12 = vadd.s32 127, %v2996_v47  ;;  %v6638_v58 = vshrl.u32 %v3085_v45, 30  ;;  %v2687_v9 = vor.u32 4788187, %v2686_v8 }
 0x411   : > { %v2795_v25 = vmul.f32 %v2794_v32, %v2792_v11  ;;  %v2896_v48 = vand.u32 2147483647, %v2895_v34  ;;  %v2994_v50 = vshrl.u32 %v2976_v55, %v2992_v54  ;;  %v2577_v13 = vshll.u32 %v6433_v33, %v6571_v40 }
 0x412   : > { %v2583_v27 = vor.u32 4788187, %v2582_v22  ;;  %v2998_v51 = vshll.u32 %v2997_v12, 23  ;;  %v3087_v2 = vshll.u32 %v6638_v58, 30  ;;  %v2380_v19 = vxor.u32 2147483648, %v6556_v44 }
 0x413   : > { %v2683_v59 = vor.u32 %v2682_v10, %v2681_v38  ;;  %v2898_v46 = vcvt.s32.f32 %v2891_v30  ;;  %v2993_v39 = vshll.u32 %v6600_v63, %v2991_v20  ;;  %v7843_v17 = vsub.s32 32, %v6497_v43 }
 0x414   : > { %v2579_v37 = vor.u32 %v2578_v52, %v2577_v13  ;;  %v2999_v31 = vor.u32 4788187, %v2998_v51  ;;  %v6648_v28 = vsub.s32 %v3084_v42, %v3087_v2  ;;  %v2688_v36 = vand.u32 2147483647, %v2687_v9 }
 0x415   : > { %v2474_v1 = vshrl.u32 %v6505_v0, %v7843_v17  ;;  %v2796_v33 = vxor.u32 2147483648, %v2795_v25  ;;  %v2899_v40 = vmul.f32 %v2898_v46, %v2896_v48  ;;  %v2995_v23 = vor.u32 %v2994_v50, %v2993_v39 }
 0x416   : > { %v2473_v5 = vshll.u32 %v6359_v15, %v6497_v43  ;;  %v2479_v16 = vor.u32 4788187, %v2478_v57  ;;  %v2584_v62 = vand.u32 2147483647, %v2583_v27  ;;  %v3090_v63 = vsub.s32 0, %v6648_v28 }
 0x417   : > { %v7844_v8 = vand.u32 2147483647, %v6074_v41  ;;  %v2381_v42 = vsel %vm2298_vm6, %v2380_v19, %v6556_v44  ;;  %v2690_v11 = vcvt.s32.f32 %v2683_v59  ;;  %v3000_v49 = vand.u32 2147483647, %v2999_v31 }
 0x418   : > { %v2475_v34 = vor.u32 %v2474_v1, %v2473_v5  ;;  %v2586_v15 = vcvt.s32.f32 %v2579_v37  ;;  %vm2714_vm15 = vcmp.lt.s32.totalorder %v6290_v3, 0  ;;  %v4366_v43 = vmin.u32 %v3090_v63, %v6648_v28 }
 0x419   : > { %vm6657_vm14 = vcmp.le.f32.partialorder %v7844_v8, 0.7853982  ;;  %v2691_v56 = vmul.f32 %v2690_v11, %v2688_v36  ;;  %v2797_v57 = vsel %vm2714_vm15, %v2796_v33, %v2795_v25  ;;  %v2900_v20 = vxor.u32 2147483648, %v2899_v40 }
 0x41a   : > { %v3002_v22 = vcvt.s32.f32 %v2995_v23  ;;  %v2384_v54 = vsel %vm6657_vm14, %v6074_v41, %v2381_v42  ;;  %v2480_v47 = vand.u32 2147483647, %v2479_v16  ;;  %v2587_v44 = vmul.f32 %v2586_v15, %v2584_v62 }
 0x41b   : > { %v3092_v45 = vclz %v4366_v43  ;;  %vm2506_vm11 = vcmp.lt.s32.totalorder %v6085_v18, 0  ;;  %v7847_v10 = vand.u32 2147483647, %v6290_v3  ;;  %v2482_v55 = vcvt.s32.f32 %v2475_v34 }
 0x41c   : > { %v3003_v30 = vmul.f32 %v3002_v22, %v3000_v49  ;;  %vm2818_vm3 = vcmp.lt.s32.totalorder %v6343_v35, 0  ;;  %4643 = vcosq.f32 %v2384_v54  ;;  %vm2610_vm5 = vcmp.lt.s32.totalorder %v6139_v61, 0 }
 0x41d   : > { %vm6674_vm1 = vcmp.le.f32.partialorder %v7847_v10, 0.7853982  ;;  %v4367_v38 = vadd.s32 4294967294, %v3092_v45  ;;  %v2692_v12 = vxor.u32 2147483648, %v2691_v56  ;;  %v2901_v9 = vsel %vm2818_vm3, %v2900_v20, %v2899_v40 }
 0x41e   : > { %v2800_v52 = vsel %vm6674_vm1, %v6290_v3, %v2797_v57  ;;  %vm2402_vm0 = vcmp.lt.s32.totalorder %v6077_v29, 0  ;;  %v2483_v25 = vmul.f32 %v2482_v55, %v2480_v47  ;;  %v7850_v48 = vand.u32 2147483647, %v6085_v18 }
 0x41f   : > { %v2588_v13 = vxor.u32 2147483648, %v2587_v44  ;;  %vm2922_vm7 = vcmp.lt.s32.totalorder %v6453_v26, 0  ;;  %vm4368_vm8 = vcmp.lt.s32.totalorder %v4367_v38, 0  ;;  %4645 = vcosq.f32 %v2800_v52 }
 0x420   : > { %vm6688_vm4 = vcmp.le.f32.partialorder %v7850_v48, 0.7853982  ;;  %v3004_v27 = vxor.u32 2147483648, %v3003_v30  ;;  %v3095_v51 = vsel %vm4368_vm8, 0, %v4367_v38  ;;  %v7853_v2 = vand.u32 2147483647, %v6343_v35 }
 0x421   : > { %v3080_v59 = vadd.s32 %v6606_v7, %v6613_v53  ;;  %v3096_v46 = vsub.s32 32, %v3095_v51  ;;  %v3100_v39 = vsub.s32 4294967266, %v3095_v51  ;;  %v2693_v1 = vsel %vm2610_vm5, %v2692_v12, %v2691_v56 }
 0x422   : > { %vm6695_vm9 = vcmp.le.f32.partialorder %v7853_v2, 0.7853982  ;;  %4647 = vsinq.f32 %v2800_v52  ;;  %v3006_v37 = vsub.s32 4, %v6595_v24  ;;  %v2798_v31 = vsub.s32 4, %v6456_v14 }
 0x423   : > { %v2904_v17 = vsel %vm6695_vm9, %v6343_v35, %v2901_v9  ;;  %v3097_v36 = vshll.u32 %v6648_v28, %v3095_v51  ;;  %v3098_v33 = vshrl.u32 %v3080_v59, %v3096_v46  ;;  %v3101_v40 = vadd.s32 127, %v3100_v39 }
 0x424   : > { %v2902_v7 = vsub.s32 4, %v6511_v6  ;;  %v2484_v53 = vxor.u32 2147483648, %v2483_v25  ;;  %v2589_v23 = vsel %vm2506_vm11, %v2588_v13, %v2587_v44  ;;  %v3005_v5 = vsel %vm2922_vm7, %v3004_v27, %v3003_v30 }
 0x425   : > { %4649 = vcosq.f32 %v2904_v17  ;;  %v3099_v16 = vor.u32 %v3098_v33, %v3097_v36  ;;  %v3102_v62 = vshll.u32 %v3101_v40, 23  ;;  %v7856_v63 = vand.u32 2147483647, %v6139_v61  ;;  %v7869_v36 = vld [vmem:[#allocation6_spill] sm:$0xff] }
 0x426   : > { %4651 = vsinq.f32 %v2904_v17  ;;  %v7859_v28 = vand.u32 2147483647, %v6453_v26  ;;  %v3007_v11 = vsel %vm2922_vm7, %v3006_v37, %v6595_v24  ;;  %v2903_v43 = vsel %vm2818_vm3, %v2902_v7, %v6511_v6  ;;  %v7868_v17 = vld [vmem:[#allocation5_spill] sm:$0xff] }
 0x427   : > { %vm6716_vm10 = vcmp.le.f32.partialorder %v7856_v63, 0.7853982  ;;  %4653 = vsinq.f32 %v2384_v54  ;;  %v3103_v15 = vor.u32 4788187, %v3102_v62  ;;  %v2799_v56 = vsel %vm2714_vm15, %v2798_v31, %v6456_v14 }
 0x428   : > { %vm6722_vm13 = vcmp.le.f32.partialorder %v7859_v28, 0.7853982  ;;  %v2696_v49 = vsel %vm6716_vm10, %v6139_v61, %v2693_v1  ;;  %v2485_v24 = vsel %vm2402_vm0, %v2484_v53, %v2483_v25  ;;  %v2592_v57 = vsel %vm6688_vm4, %v6085_v18, %v2589_v23 }
 0x429   : > { %v3008_v34 = vsel %vm6722_vm13, %v6453_v26, %v3005_v5  ;;  %vm3026_vm12 = vcmp.lt.s32.totalorder %v6462_v60, 0  ;;  %v3110_v20 = vsub.s32 4, %v6638_v58  ;;  %v3104_v22 = vand.u32 2147483647, %v3103_v15  ;;  %v6755_v45 = vpop.eup %4643 }
 0x42a   : > { %v3106_v54 = vcvt.s32.f32 %v3099_v16  ;;  %v3009_v6 = vsel %vm6722_vm13, 0, %v3007_v11  ;;  %4655 = vcosq.f32 %v2696_v49  ;;  %v2905_v14 = vsel %vm6695_vm9, 0, %v2903_v43 }
 0x42b   : > { %4657 = vcosq.f32 %v3008_v34  ;;  %v2801_v47 = vsel %vm6674_vm1, 0, %v2799_v56  ;;  %v2694_v44 = vsub.s32 4, %v6437_v4  ;;  %v2590_v30 = vsub.s32 4, %v6393_v21 }
 0x42c   : > { %4659 = vsinq.f32 %v3008_v34  ;;  %v3107_v10 = vmul.f32 %v3106_v54, %v3104_v22  ;;  %v7862_v55 = vand.u32 2147483647, %v6077_v29  ;;  %v3111_v32 = vsel %vm3026_vm12, %v3110_v20, %v6638_v58  ;;  %v4646_v12 = vpop.eup %4645 }
 0x42d   : > { %4661 = vsinq.f32 %v2592_v57  ;;  %v7865_v25 = vand.u32 2147483647, %v6462_v60  ;;  %v3013_v13 = vadd.s32 3, %v3009_v6  ;;  %v2909_v27 = vadd.s32 3, %v2905_v14 }
 0x42e   : > { %vm6760_vm15 = vcmp.le.f32.partialorder %v7862_v55, 0.7853982  ;;  %4663 = vcosq.f32 %v2592_v57  ;;  %v3108_v9 = vxor.u32 2147483648, %v3107_v10  ;;  %v2805_v51 = vadd.s32 3, %v2801_v47 }
 0x42f   : > { %v2488_v38 = vsel %vm6760_vm15, %v6077_v29, %v2485_v24  ;;  %vm6772_vm1 = vcmp.le.f32.partialorder %v7865_v25, 0.7853982  ;;  %v2695_v58 = vsel %vm2610_vm5, %v2694_v44, %v6437_v4  ;;  %4665 = vsinq.f32 %v2696_v49  ;;  %v4648_v2 = vpop.eup %4647 }
 0x430   : > { %v3109_v19 = vsel %vm3026_vm12, %v3108_v9, %v3107_v10  ;;  %v3113_v59 = vsel %vm6772_vm1, 0, %v3111_v32  ;;  %v2591_v46 = vsel %vm2506_vm11, %v2590_v30, %v6393_v21  ;;  %4667 = vcosq.f32 %v2488_v38 }
 0x431   : > { %v3112_v39 = vsel %vm6772_vm1, %v6462_v60, %v3109_v19  ;;  %v2486_v1 = vsub.s32 4, %v7868_v17  ;;  %4669 = vsinq.f32 %v2488_v38  ;;  %v6790_v37 = vand.u32 3, %v3013_v13 }
 0x432   : > { %v4650_v4 = vpop.eup %4649  ;;  %4671 = vcosq.f32 %v3112_v39  ;;  %v2697_v31 = vsel %vm6716_vm10, 0, %v2695_v58  ;;  %v2382_v33 = vsub.s32 4, %v7869_v36  ;;  %v3117_v21 = vadd.s32 3, %v3113_v59 }
 0x433   : > { %v4652_v40 = vpop.eup %4651  ;;  %4673 = vsinq.f32 %v3112_v39  ;;  %v2806_v7 = vand.u32 3, %v2805_v51  ;;  %v2593_v53 = vsel %vm6688_vm4, 0, %v2591_v46  ;;  %v2910_v5 = vand.u32 3, %v2909_v27 }
 0x434   : > { %v6797_v23 = vpop.eup %4653  ;;  %v2809_v16 = vxor.u32 2147483648, %v4648_v2  ;;  %v2812_v62 = vxor.u32 2147483648, %v4646_v12  ;;  %v2701_v63 = vadd.s32 3, %v2697_v31  ;;  %v2487_v8 = vsel %vm2402_vm0, %v2486_v1, %v7868_v17 }
 0x435   : > { %v2913_v28 = vxor.u32 2147483648, %v4652_v40  ;;  %v2916_v42 = vxor.u32 2147483648, %v4650_v4  ;;  %v2597_v11 = vadd.s32 3, %v2593_v53  ;;  %v2383_v49 = vsel %vm2298_vm6, %v2382_v33, %v7869_v36 }
 0x436   : > { %v6807_v50 = vand.u32 3, %v3117_v21  ;;  %vm3016_vm11 = vcmp.eq.s32.totalorder %v6790_v37, 0  ;;  %vm3019_vm3 = vcmp.eq.s32.totalorder %v6790_v37, 2  ;;  %vm2808_vm5 = vcmp.eq.s32.totalorder %v2806_v7, 0 }
 0x437   : > { %v6805_v34 = vpop.eup %4655  ;;  %vm2811_vm4 = vcmp.eq.s32.totalorder %v2806_v7, 2  ;;  %vm2911_vm7 = vcmp.lt.s32.totalorder %v2910_v5, 2  ;;  %v2810_v43 = vsel %vm2808_vm5, %v4646_v12, %v2809_v16  ;;  %v2489_v24 = vsel %vm6760_vm15, 0, %v2487_v8 }
 0x438   : > { %v4658_v15 = vpop.eup %4657  ;;  %v2813_v56 = vsel %vm2811_vm4, %v2812_v62, %v4648_v2  ;;  %vm2912_vm0 = vcmp.eq.s32.totalorder %v2910_v5, 0  ;;  %vm2915_vm6 = vcmp.eq.s32.totalorder %v2910_v5, 2  ;;  %v6813_v20 = vand.u32 3, %v2701_v63 }
 0x439   : > { %v4660_v57 = vpop.eup %4659  ;;  %v2385_v22 = vsel %vm6657_vm14, 0, %v2383_v49  ;;  %vm3015_vm8 = vcmp.lt.s32.totalorder %v6790_v37, 2  ;;  %v2914_v6 = vsel %vm2912_vm0, %v4650_v4, %v2913_v28  ;;  %v2917_v14 = vsel %vm2915_vm6, %v2916_v42, %v4652_v40 }
 0x43a   : > { %v4662_v54 = vpop.eup %4661  ;;  %vm2807_vm9 = vcmp.lt.s32.totalorder %v2806_v7, 2  ;;  %v6818_v47 = vand.u32 3, %v2597_v11  ;;  %vm3119_vm10 = vcmp.lt.s32.totalorder %v6807_v50, 2  ;;  %v2708_v30 = vxor.u32 2147483648, %v6805_v34 }
 0x43b   : > { %v4664_v44 = vpop.eup %4663  ;;  %v2814_v10 = vsel %vm2807_vm9, %v2810_v43, %v2813_v56  ;;  %v2493_v55 = vadd.s32 3, %v2489_v24  ;;  %vm3116_vm13 = vweird.f32 %v6462_v60  ;;  %vm3120_vm14 = vcmp.eq.s32.totalorder %v6807_v50, 0  ;;  %v6887_v56 = vpop.permute.xlu1 %3150 }
 0x43c   : > { %v4666_v52 = vpop.eup %4665  ;;  %v3017_v0 = vxor.u32 2147483648, %v4660_v57  ;;  %v3020_v32 = vxor.u32 2147483648, %v4658_v15  ;;  %v2389_v38 = vadd.s32 3, %v2385_v22  ;;  %vm3123_vm12 = vcmp.eq.s32.totalorder %v6807_v50, 2 }
 0x43d   : > { %v4668_v12 = vpop.eup %4667  ;;  %vm3012_vm15 = vweird.f32 %v6453_v26  ;;  %v2918_v9 = vsel %vm2911_vm7, %v2914_v6, %v2917_v14  ;;  %vm2703_vm1 = vcmp.lt.s32.totalorder %v6813_v20, 2  ;;  %v2601_v25 = vxor.u32 2147483648, %v4662_v54 }
 0x43e   : > { %v4670_v48 = vpop.eup %4669  ;;  %vm2908_vm5 = vweird.f32 %v6343_v35  ;;  %vm2704_vm4 = vcmp.eq.s32.totalorder %v6813_v20, 0  ;;  %vm2707_vm0 = vcmp.eq.s32.totalorder %v6813_v20, 2  ;;  %vm2599_vm6 = vcmp.lt.s32.totalorder %v6818_v47, 2 }
 0x43f   : > { %v2604_v13 = vxor.u32 2147483648, %v4664_v44  ;;  %v4672_v27 = vpop.eup %4671  ;;  %v2705_v51 = vxor.u32 2147483648, %v4666_v52  ;;  %v2709_v58 = vsel %vm2707_vm0, %v2708_v30, %v4666_v52  ;;  %vm2600_vm9 = vcmp.eq.s32.totalorder %v6818_v47, 0  ;;  %v3141_v24 = vpop.permute.xlu1 %3140 }
 0x440   : > { %v2494_v2 = vand.u32 3, %v2493_v55  ;;  %v4674_v19 = vpop.eup %4673  ;;  %v3124_v59 = vxor.u32 2147483648, %v4672_v27  ;;  %v3018_v46 = vsel %vm3016_vm11, %v4658_v15, %v3017_v0  ;;  %v3021_v39 = vsel %vm3019_vm3, %v3020_v32, %v4660_v57  ;;  %v4369_v15 = vld [vmem:[%s7725_s4 + $0x20] sm:$0xff] }
 0x441   : > { %v2390_v17 = vand.u32 3, %v2389_v38  ;;  %v3121_v1 = vxor.u32 2147483648, %v4674_v19  ;;  %v2602_v4 = vsel %vm2600_vm9, %v4664_v44, %v2601_v25  ;;  %v2497_v31 = vxor.u32 2147483648, %v4670_v48 }
 0x442   : > { %v2500_v36 = vxor.u32 2147483648, %v4668_v12  ;;  %v3125_v33 = vsel %vm3123_vm12, %v3124_v59, %v4674_v19  ;;  %vm2603_vm7 = vcmp.eq.s32.totalorder %v6818_v47, 2  ;;  %v2393_v40 = vxor.u32 2147483648, %v6797_v23 }
 0x443   : > { %v2396_v21 = vxor.u32 2147483648, %v6755_v45  ;;  %v3122_v7 = vsel %vm3120_vm14, %v4672_v27, %v3121_v1  ;;  %v3022_v53 = vsel %vm3015_vm8, %v3018_v46, %v3021_v39  ;;  %v2706_v5 = vsel %vm2704_vm4, %v6805_v34, %v2705_v51 }
 0x444   : > { %v2605_v16 = vsel %vm2603_vm7, %v2604_v13, %v4662_v54  ;;  %v3126_v62 = vsel %vm3119_vm10, %v3122_v7, %v3125_v33  ;;  %vm2496_vm11 = vcmp.eq.s32.totalorder %v2494_v2, 0  ;;  %vm2499_vm3 = vcmp.eq.s32.totalorder %v2494_v2, 2 }
 0x445   : > { %vm2392_vm12 = vcmp.eq.s32.totalorder %v2390_v17, 0  ;;  %v3127_v63 = vsel %vm3116_vm13, nan, %v3126_v62  ;;  %v2498_v8 = vsel %vm2496_vm11, %v4668_v12, %v2497_v31  ;;  %v2501_v28 = vsel %vm2499_vm3, %v2500_v36, %v4670_v48 }
 0x446   : > { %vm2395_vm14 = vcmp.eq.s32.totalorder %v2390_v17, 2  ;;  %3194 = vmatprep.subr.mxu0 %v3127_v63  ;;  %v3023_v37 = vsel %vm3012_vm15, nan, %v3022_v53  ;;  %v2710_v42 = vsel %vm2703_vm1, %v2706_v5, %v2709_v58  ;;  %v2394_v11 = vsel %vm2392_vm12, %v6755_v45, %v2393_v40 }
 0x447   : > { %v2397_v49 = vsel %vm2395_vm14, %v2396_v21, %v6797_v23  ;;  %3195 = vmatpush1.msra.mxu0 %v3023_v37  ;;  %v2919_v34 = vsel %vm2908_vm5, nan, %v2918_v9  ;;  %vm2804_vm8 = vweird.f32 %v6290_v3  ;;  %v2606_v60 = vsel %vm2599_vm6, %v2602_v4, %v2605_v16 }
 0x448   : > { %vm2495_vm10 = vcmp.lt.s32.totalorder %v2494_v2, 2  ;;  %3196 = vmatprep.subr.mxu0 %v2919_v34  ;;  %v2815_v26 = vsel %vm2804_vm8, nan, %v2814_v10  ;;  %vm2700_vm13 = vweird.f32 %v6139_v61  ;;  %vm2391_vm15 = vcmp.lt.s32.totalorder %v2390_v17, 2  ;;  %v6895_v10 = vpop.permute.xlu0 %3155 }
 0x449   : > { %v2502_v50 = vsel %vm2495_vm10, %v2498_v8, %v2501_v28  ;;  %3197 = vmatpush1.msra.mxu0 %v2815_v26  ;;  %v2711_v45 = vsel %vm2700_vm13, nan, %v2710_v42  ;;  %vm2596_vm1 = vweird.f32 %v6085_v18  ;;  %v2398_v23 = vsel %vm2391_vm15, %v2394_v11, %v2397_v49  ;;  %v4370_v18 = vld [vmem:[%s7725_s4 + $0x28] sm:$0xff] }
 0x44a   : > { %3198 = vmatprep.subr.mxu0 %v2711_v45  ;;  %v2607_v35 = vsel %vm2596_vm1, nan, %v2606_v60  ;;  %vm2492_vm5 = vweird.f32 %v6077_v29  ;;  %vm2388_vm4 = vweird.f32 %v6074_v41  ;;  %v7870_v43 = vmov 0.0   ;;  %v4371_v41 = vld [vmem:[%s7725_s4 + $0x30] sm:$0xff]  ;;  %v4372_v29 = vld [vmem:[%s7725_s4 + $0x38] sm:$0xff] }
 0x44b   : > { %3199 = vmatpush1.msra.mxu0 %v2607_v35  ;;  %v2503_v3 = vsel %vm2492_vm5, nan, %v2502_v50  ;;  %v2399_v61 = vsel %vm2388_vm4, nan, %v2398_v23  ;;  %v7871_v58 = vmov 683565275   ;;  %v7872_v19 = vmov 2475754826  }
 0x44c   : > { %3200 = vmatprep.subr.mxu0 %v2503_v3  ;;  %v3146_v25 = vpop.permute.xlu0 %3145  ;;  %v7873_v39 = vmov 2131351028   ;;  %v7874_v4 = vmov 2102212464   ;;  %v7875_v33 = vmov 920167782  }
 0x44d   : > { %3201 = vmatpush1.msra.mxu0 %v2399_v61  ;;  %v7876_v7 = vmov 1326507024  }
 0x44e   : > { %4377 = vmatmul.mubr.msk.f32.vlgmr.msra.gmra.mxu0 %vm1233_vm2, %v4369_v15 }
 0x44f   : > { %3240 = vmatprep.mubr.f32.mxu0 %v7870_v43 }
 0x452   : > { %4378 = vmatmul.mubr.msk.f32.gmra.mxu0 %vm1233_vm2, %v4370_v18 }
 0x453   : > { %3246 = vmatprep.mubr.f32.mxu0 %v7870_v43 }
 0x456   : > { %4379 = vmatmul.mubr.msk.f32.gmra.mxu0 %vm1233_vm2, %v4371_v41 }
 0x457   : > { %3252 = vmatprep.mubr.f32.mxu0 %v7870_v43 }
 0x45a   : > { %4380 = vmatmul.mubr.msk.f32.gmra.mxu0 %vm1233_vm2, %v4372_v29 }
 0x50e   : > { %v3236_v57 = vpop.f32.mrf.mxu0 }
 0x50f   : > { %v6889_v20 = vadd.f32 %v3236_v57, %v3141_v24 }
 0x510   : > { %v3238_v22 = vpop.f32.mrf.mxu0 }
 0x511   : > { %v3262_v54 = vand.u32 2139095040, %v6889_v20  ;;  %v6892_v6 = vadd.f32 %v3238_v22, %v3141_v24  ;;  %v7783_v0 = vand.u32 2147483647, %v6889_v20 }
 0x512   : > { %v3242_v12 = vpop.f32.mrf.mxu0 }
 0x513   : > { %v3263_v14 = vshrl.u32 %v3262_v54, 23  ;;  %v3366_v47 = vand.u32 2139095040, %v6892_v6  ;;  %v3266_v48 = vand.u32 8388607, %v7783_v0  ;;  %v6900_v27 = vadd.f32 %v3242_v12, %v3146_v25 }
 0x514   : > { %v3244_v24 = vpop.f32.mrf.mxu0  ;;  %v7778_v57 = vand.u32 2147483647, %v6892_v6 }
 0x515   : > { %v4381_v44 = vadd.s32 4294967169, %v3263_v14  ;;  %v3367_v30 = vshrl.u32 %v3366_v47, 23  ;;  %v3267_v8 = vor.u32 8388608, %v3266_v48  ;;  %v3470_v11 = vand.u32 2139095040, %v6900_v27 }
 0x517   : > { %v3269_v55 = vadd.s32 1, %v4381_v44  ;;  %v4385_v52 = vadd.s32 4294967169, %v3367_v30  ;;  %v3307_v3 = vshll.u32 %v3267_v8, 8  ;;  %v3471_v15 = vshrl.u32 %v3470_v11, 23 }
 0x519   : > { %vm3270_vm0 = vcmp.gt.s32.totalorder %v3269_v55, 0  ;;  %v3373_v38 = vadd.s32 1, %v4385_v52  ;;  %v4389_v22 = vadd.s32 4294967169, %v3471_v15 }
 0x51a   : > { %v3271_v32 = vsel %vm3270_vm0, %v3269_v55, 0  ;;  %v6954_v55 = vadd.f32 %v3244_v24, %v3146_v25 }
 0x51b   : > { %v3273_v9 = vand.u32 31, %v3271_v32  ;;  %v6902_v51 = vshrl.u32 %v3271_v32, 5  ;;  %vm3374_vm6 = vcmp.gt.s32.totalorder %v3373_v38, 0 }
 0x51c   : > { %v3375_v63 = vsel %vm3374_vm6, %v3373_v38, 0 }
 0x51d   : > { %v3274_v13 = vsub.s32 32, %v3273_v9  ;;  %v3276_v2 = vshll.u32 %v7871_v58, %v3273_v9  ;;  %v3279_v59 = vshll.u32 %v7872_v19, %v3273_v9  ;;  %v3282_v1 = vshll.u32 %v7873_v39, %v3273_v9 }
 0x51e   : > { %v3285_v36 = vshll.u32 %v7874_v4, %v3273_v9  ;;  %v3288_v21 = vshll.u32 %v7875_v33, %v3273_v9  ;;  %vm3291_vm9 = vcmp.lt.s32.totalorder %v6902_v51, 1  ;;  %vm3293_vm7 = vcmp.lt.s32.totalorder %v6902_v51, 3 }
 0x51f   : > { %v3277_v46 = vshrl.u32 %v7872_v19, %v3274_v13  ;;  %v3280_v17 = vshrl.u32 %v7873_v39, %v3274_v13  ;;  %v3283_v31 = vshrl.u32 %v7874_v4, %v3274_v13  ;;  %v3286_v40 = vshrl.u32 %v7875_v33, %v3274_v13 }
 0x520   : > { %v3289_v53 = vshrl.u32 %v7876_v7, %v3274_v13  ;;  %vm3294_vm11 = vcmp.lt.s32.totalorder %v6902_v51, 4  ;;  %v3377_v26 = vand.u32 31, %v3375_v63  ;;  %vm3292_vm3 = vcmp.lt.s32.totalorder %v6902_v51, 2 }
 0x521   : > { %v3278_v5 = vor.u32 %v3277_v46, %v3276_v2  ;;  %v3281_v16 = vor.u32 %v3280_v17, %v3279_v59  ;;  %v3284_v62 = vor.u32 %v3283_v31, %v3282_v1  ;;  %v3287_v28 = vor.u32 %v3286_v40, %v3285_v36 }
 0x522   : > { %v3290_v37 = vor.u32 %v3289_v53, %v3288_v21  ;;  %v6935_v61 = vsub.s32 32, %v3377_v26  ;;  %v3275_v54 = vshrl.u32 %v7871_v58, %v3274_v13  ;;  %v6952_v30 = vshrl.u32 %v3375_v63, 5 }
 0x523   : > { %v3299_v42 = vsel %vm3291_vm9, %v3278_v5, %v3281_v16  ;;  %v3300_v49 = vsel %vm3294_vm11, %v3287_v28, 920167782  ;;  %v3303_v34 = vsel %vm3291_vm9, %v3281_v16, %v3284_v62  ;;  %v3296_v14 = vsel %vm3294_vm11, %v3284_v62, 2102212464 }
 0x524   : > { %v3304_v60 = vsel %vm3294_vm11, %v3290_v37, 1326507024  ;;  %v3301_v50 = vsel %vm3293_vm7, %v3284_v62, %v3300_v49  ;;  %v3390_v47 = vshrl.u32 %v7875_v33, %v6935_v61  ;;  %v3393_v44 = vshrl.u32 %v7876_v7, %v6935_v61 }
 0x525   : > { %v3305_v45 = vsel %vm3293_vm7, %v3287_v28, %v3304_v60  ;;  %v3302_v23 = vsel %vm3292_vm3, %v3299_v42, %v3301_v50  ;;  %v3295_v52 = vsel %vm3291_vm9, %v3275_v54, %v3278_v5  ;;  %v3381_v32 = vshrl.u32 %v7872_v19, %v6935_v61 }
 0x526   : > { %v3306_v35 = vsel %vm3292_vm3, %v3303_v34, %v3305_v45  ;;  %v6937_v43 = vmul.u32.u64.low %v3307_v3, %v3302_v23  ;;  %v6938_v18 = vmul.u32.u64.high %v3307_v3, %v3302_v23, %v6937_v43  ;;  %v3389_v38 = vshll.u32 %v7874_v4, %v3377_v26 }
 0x527   : > { %v6941_v41 = vmul.u32.u64.low %v3307_v3, %v3306_v35  ;;  %v6942_v29 = vmul.u32.u64.high %v3307_v3, %v3306_v35, %v6941_v41  ;;  %v3392_v12 = vshll.u32 %v7875_v33, %v3377_v26  ;;  %v3297_v9 = vsel %vm3293_vm7, %v3281_v16, %v3296_v14 }
 0x528   : > { %v3384_v48 = vshrl.u32 %v7873_v39, %v6935_v61  ;;  %v3387_v25 = vshrl.u32 %v7874_v4, %v6935_v61  ;;  %v3477_v13 = vadd.s32 1, %v4389_v22  ;;  %v3370_v2 = vand.u32 8388607, %v7778_v57 }
 0x529   : > { %v3380_v59 = vshll.u32 %v7871_v58, %v3377_v26  ;;  %v3391_v46 = vor.u32 %v3390_v47, %v3389_v38  ;;  %v3394_v17 = vor.u32 %v3393_v44, %v3392_v12  ;;  %v3317_v1 = vadd.s32 1, %v6938_v18 }
 0x52a   : > { %v3383_v31 = vshll.u32 %v7872_v19, %v3377_v26  ;;  %v3386_v36 = vshll.u32 %v7873_v39, %v3377_v26  ;;  %v3574_v40 = vand.u32 2139095040, %v6954_v55  ;;  %v3298_v21 = vsel %vm3292_vm3, %v3295_v52, %v3297_v9 }
 0x52b   : > { %vm3316_vm12 = vc.u32 %v6942_v29, %v6937_v43  ;;  %v3382_v53 = vor.u32 %v3381_v32, %v3380_v59  ;;  %vm3478_vm14 = vcmp.gt.s32.totalorder %v3477_v13, 0  ;;  %vm3398_vm8 = vcmp.lt.s32.totalorder %v6952_v30, 4 }
 0x52c   : > { %v3385_v5 = vor.u32 %v3384_v48, %v3383_v31  ;;  %v3388_v16 = vor.u32 %v3387_v25, %v3386_v36  ;;  %v3479_v62 = vsel %vm3478_vm14, %v3477_v13, 0  ;;  %v3404_v63 = vsel %vm3398_vm8, %v3391_v46, 920167782 }
 0x52d   : > { %v3408_v8 = vsel %vm3398_vm8, %v3394_v17, 1326507024  ;;  %v3481_v28 = vand.u32 31, %v3479_v62  ;;  %v3318_v51 = vsel %vm3316_vm12, %v3317_v1, %v6938_v18  ;;  %v3371_v37 = vor.u32 8388608, %v3370_v2 }
 0x52e   : > { %v3314_v42 = vmul.u32 %v3307_v3, %v3298_v21  ;;  %vm3395_vm10 = vcmp.lt.s32.totalorder %v6952_v30, 1  ;;  %vm3397_vm13 = vcmp.lt.s32.totalorder %v6952_v30, 3  ;;  %v3575_v11 = vshrl.u32 %v3574_v40, 23 }
 0x52f   : > { %v3403_v49 = vsel %vm3395_vm10, %v3382_v53, %v3385_v5  ;;  %v3405_v34 = vsel %vm3397_vm13, %v3388_v16, %v3404_v63  ;;  %v3407_v60 = vsel %vm3395_vm10, %v3385_v5, %v3388_v16  ;;  %v3409_v26 = vsel %vm3397_vm13, %v3391_v46, %v3408_v8 }
 0x530   : > { %v3319_v50 = vadd.s32 %v3318_v51, %v3314_v42  ;;  %v6995_v45 = vsub.s32 32, %v3481_v28  ;;  %vm3396_vm15 = vcmp.lt.s32.totalorder %v6952_v30, 2  ;;  %v3411_v3 = vshll.u32 %v3371_v37, 8 }
 0x531   : > { %v3406_v23 = vsel %vm3396_vm15, %v3403_v49, %v3405_v34  ;;  %v3410_v35 = vsel %vm3396_vm15, %v3407_v60, %v3409_v26  ;;  %v4393_v15 = vadd.s32 4294967169, %v3575_v11  ;;  %v7781_v41 = vand.u32 2147483647, %v6900_v27 }
 0x532   : > { %v3320_v18 = vadd.s32 536870912, %v3319_v50  ;;  %v3494_v24 = vshrl.u32 %v7875_v33, %v6995_v45  ;;  %v7005_v22 = vmul.u32.u64.low %v3411_v3, %v3410_v35  ;;  %v7006_v54 = vmul.u32.u64.high %v3411_v3, %v3410_v35, %v7005_v22 }
 0x533   : > { %v7008_v14 = vmul.u32.u64.low %v3411_v3, %v3406_v23  ;;  %v7009_v47 = vmul.u32.u64.high %v3411_v3, %v3406_v23, %v7008_v14  ;;  %v3379_v44 = vshrl.u32 %v7871_v58, %v6935_v61  ;;  %v3485_v52 = vshrl.u32 %v7872_v19, %v6995_v45 }
 0x534   : > { %v3488_v32 = vshrl.u32 %v7873_v39, %v6995_v45  ;;  %v3493_v38 = vshll.u32 %v7874_v4, %v3481_v28  ;;  %v7019_v12 = vshrl.u32 %v3479_v62, 5  ;;  %v3491_v9 = vshrl.u32 %v7874_v4, %v6995_v45 }
 0x535   : > { %v3497_v48 = vshrl.u32 %v7876_v7, %v6995_v45  ;;  %v3581_v25 = vadd.s32 1, %v4393_v15  ;;  %v7025_v13 = vshrl.u32 %v3320_v18, 30  ;;  %v3484_v61 = vshll.u32 %v7871_v58, %v3481_v28 }
 0x536   : > { %v3487_v2 = vshll.u32 %v7872_v19, %v3481_v28  ;;  %v3495_v59 = vor.u32 %v3494_v24, %v3493_v38  ;;  %v3400_v46 = vsel %vm3398_vm8, %v3388_v16, 2102212464  ;;  %v3490_v17 = vshll.u32 %v7873_v39, %v3481_v28 }
 0x537   : > { %7877 = vst [vmem:[#allocation5_spill] sm:$0xff] %v7025_v13  ;;  %v3496_v1 = vshll.u32 %v7875_v33, %v3481_v28  ;;  %v3399_v31 = vsel %vm3395_vm10, %v3379_v44, %v3382_v53  ;;  %v3474_v36 = vand.u32 8388607, %v7781_v41  ;;  %v7037_v40 = vor.u32 %v3485_v52, %v3484_v61 }
 0x538   : > { %v7039_v21 = vor.u32 %v3488_v32, %v3487_v2  ;;  %v3492_v62 = vor.u32 %v3491_v9, %v3490_v17  ;;  %vm3502_vm1 = vcmp.lt.s32.totalorder %v7019_v12, 4  ;;  %vm3582_vm5 = vcmp.gt.s32.totalorder %v3581_v25, 0 }
 0x539   : > { %v3498_v63 = vor.u32 %v3497_v48, %v3496_v1  ;;  %v3322_v16 = vshll.u32 %v7025_v13, 30  ;;  %v3401_v8 = vsel %vm3397_vm13, %v3385_v5, %v3400_v46  ;;  %v3508_v53 = vsel %vm3502_vm1, %v3495_v59, 920167782 }
 0x53a   : > { %v3583_v28 = vsel %vm3582_vm5, %v3581_v25, 0  ;;  %v3421_v51 = vadd.s32 1, %v7009_v47  ;;  %vm3420_vm4 = vc.u32 %v7006_v54, %v7008_v14  ;;  %v3475_v42 = vor.u32 8388608, %v3474_v36 }
 0x53b   : > { %v3585_v37 = vand.u32 31, %v3583_v28  ;;  %vm3499_vm0 = vcmp.lt.s32.totalorder %v7019_v12, 1  ;;  %vm3501_vm6 = vcmp.lt.s32.totalorder %v7019_v12, 3  ;;  %v3402_v11 = vsel %vm3396_vm15, %v3399_v31, %v3401_v8 }
 0x53c   : > { %v3507_v5 = vsel %vm3499_vm0, %v7037_v40, %v7039_v21  ;;  %v3509_v49 = vsel %vm3501_vm6, %v3492_v62, %v3508_v53  ;;  %v3512_v34 = vsel %vm3502_vm1, %v3498_v63, 1326507024  ;;  %v7062_v60 = vsub.s32 %v3319_v50, %v3322_v16 }
 0x53d   : > { %v7779_v26 = vand.u32 2147483647, %v6954_v55  ;;  %v3422_v23 = vsel %vm3420_vm4, %v3421_v51, %v7009_v47  ;;  %vm3500_vm9 = vcmp.lt.s32.totalorder %v7019_v12, 2  ;;  %v7067_v30 = vsub.s32 32, %v3585_v37 }
 0x53e   : > { %v3418_v35 = vmul.u32 %v3411_v3, %v3402_v11  ;;  %v3510_v15 = vsel %vm3500_vm9, %v3507_v5, %v3509_v49  ;;  %v3511_v18 = vsel %vm3499_vm0, %v7039_v21, %v3492_v62  ;;  %v3513_v50 = vsel %vm3501_vm6, %v3495_v59, %v3512_v34  ;;  %v3248_v3 = vpop.f32.mrf.mxu0 }
 0x53f   : > { %v7076_v24 = vshll.u32 %v3475_v42, 8  ;;  %v3325_v22 = vsub.s32 0, %v7062_v60  ;;  %v3578_v44 = vand.u32 8388607, %v7779_v26  ;;  %v3514_v52 = vsel %vm3500_vm9, %v3511_v18, %v3513_v50 }
 0x540   : > { %v7079_v47 = vadd.s32 %v3422_v23, %v3418_v35  ;;  %v3589_v9 = vshrl.u32 %v7872_v19, %v7067_v30  ;;  %v3592_v48 = vshrl.u32 %v7873_v39, %v7067_v30  ;;  %v3595_v25 = vshrl.u32 %v7874_v4, %v7067_v30 }
 0x541   : > { %v7086_v32 = vmul.u32.u64.low %v7076_v24, %v3510_v15  ;;  %v7087_v38 = vmul.u32.u64.high %v7076_v24, %v3510_v15, %v7086_v32  ;;  %v3597_v61 = vshll.u32 %v7874_v4, %v3585_v37  ;;  %v3598_v2 = vshrl.u32 %v7875_v33, %v7067_v30 }
 0x542   : > { %v7099_v59 = vshrl.u32 %v3583_v28, 5  ;;  %v3588_v46 = vshll.u32 %v7871_v58, %v3585_v37  ;;  %v3601_v17 = vshrl.u32 %v7876_v7, %v7067_v30  ;;  %v7105_v1 = vadd.f32 %v3248_v3, %v6887_v56 }
 0x543   : > { %v3591_v31 = vshll.u32 %v7872_v19, %v3585_v37  ;;  %v3594_v36 = vshll.u32 %v7873_v39, %v3585_v37  ;;  %v3599_v63 = vor.u32 %v3598_v2, %v3597_v61  ;;  %v3600_v16 = vshll.u32 %v7875_v33, %v3585_v37  ;;  %v3250_v61 = vpop.f32.mrf.mxu0 }
 0x544   : > { %v4382_v8 = vmin.u32 %v3325_v22, %v7062_v60  ;;  %v3424_v53 = vadd.s32 536870912, %v7079_v47  ;;  %v7113_v28 = vmul.u32.u64.low %v7076_v24, %v3514_v52  ;;  %v7114_v51 = vmul.u32.u64.high %v7076_v24, %v3514_v52, %v7113_v28 }
 0x545   : > { %v3590_v42 = vor.u32 %v3589_v9, %v3588_v46  ;;  %v3593_v11 = vor.u32 %v3592_v48, %v3591_v31  ;;  %v3596_v5 = vor.u32 %v3595_v25, %v3594_v36  ;;  %v3602_v49 = vor.u32 %v3601_v17, %v3600_v16 }
 0x546   : > { %vm3606_vm7 = vcmp.lt.s32.totalorder %v7099_v59, 4  ;;  %v3504_v34 = vsel %vm3502_vm1, %v3492_v62, 2102212464  ;;  %v3579_v23 = vor.u32 8388608, %v3578_v44  ;;  %v3678_v35 = vand.u32 2139095040, %v7105_v1 }
 0x547   : > { %v3612_v37 = vsel %vm3606_vm7, %v3599_v63, 920167782  ;;  %v3327_v15 = vclz %v4382_v8  ;;  %v3483_v18 = vshrl.u32 %v7871_v58, %v6995_v45  ;;  %vm3603_vm11 = vcmp.lt.s32.totalorder %v7099_v59, 1 }
 0x548   : > { %vm3605_vm3 = vcmp.lt.s32.totalorder %v7099_v59, 3  ;;  %v7126_v50 = vshrl.u32 %v3424_v53, 30  ;;  %v3611_v22 = vsel %vm3603_vm11, %v3590_v42, %v3593_v11  ;;  %v3616_v44 = vsel %vm3606_vm7, %v3602_v49, 1326507024 }
 0x549   : > { %v3613_v62 = vsel %vm3605_vm3, %v3596_v5, %v3612_v37  ;;  %v3503_v3 = vsel %vm3499_vm0, %v3483_v18, %v7037_v40  ;;  %v3505_v45 = vsel %vm3501_vm6, %v7039_v21, %v3504_v34  ;;  %v3615_v52 = vsel %vm3603_vm11, %v3593_v11, %v3596_v5 }
 0x54a   : > { %7878 = vst [vmem:[#allocation6_spill] sm:$0xff] %v7126_v50  ;;  %v3617_v9 = vsel %vm3605_vm3, %v3599_v63, %v3616_v44  ;;  %v3525_v48 = vadd.s32 1, %v7087_v38  ;;  %vm3604_vm12 = vcmp.lt.s32.totalorder %v7099_v59, 2  ;;  %v3679_v25 = vshrl.u32 %v3678_v35, 23 }
 0x54b   : > { %v4383_v2 = vadd.s32 4294967294, %v3327_v15  ;;  %vm3524_vm14 = vc.u32 %v7114_v51, %v7086_v32  ;;  %v3614_v40 = vsel %vm3604_vm12, %v3611_v22, %v3613_v62  ;;  %v3506_v21 = vsel %vm3500_vm9, %v3503_v3, %v3505_v45 }
 0x54c   : > { %v3618_v46 = vsel %vm3604_vm12, %v3615_v52, %v3617_v9  ;;  %v7154_v17 = vshll.u32 %v3579_v23, 8  ;;  %v4397_v31 = vadd.s32 4294967169, %v3679_v25  ;;  %v3426_v36 = vshll.u32 %v7126_v50, 30 }
 0x54d   : > { %v7158_v63 = vadd.f32 %v3250_v61, %v6887_v56  ;;  %v3526_v16 = vsel %vm3524_vm14, %v3525_v48, %v7087_v38  ;;  %vm4384_vm8 = vcmp.lt.s32.totalorder %v4383_v2, 0  ;;  %v3522_v28 = vmul.u32 %v7076_v24, %v3506_v21 }
 0x54e   : > { %v7162_v8 = vmul.u32.u64.low %v7154_v17, %v3614_v40  ;;  %v7163_v53 = vmul.u32.u64.high %v7154_v17, %v3614_v40, %v7162_v8  ;;  %v3685_v12 = vadd.s32 1, %v4397_v31  ;;  %v3608_v23 = vsel %vm3606_vm7, %v3596_v5, 2102212464 }
 0x54f   : > { %v7168_v49 = vmul.u32.u64.low %v7154_v17, %v3618_v46  ;;  %v7169_v34 = vmul.u32.u64.high %v7154_v17, %v3618_v46, %v7168_v49  ;;  %v7174_v56 = vsub.s32 %v7079_v47, %v3426_v36  ;;  %v7176_v38 = vadd.s32 %v3526_v16, %v3522_v28 }
 0x550   : > { %vm3686_vm10 = vcmp.gt.s32.totalorder %v3685_v12, 0  ;;  %v3587_v37 = vshrl.u32 %v7871_v58, %v7067_v30  ;;  %v3782_v35 = vand.u32 2139095040, %v7158_v63  ;;  %v7181_v15 = vsel %vm4384_vm8, 0, %v4383_v2 }
 0x551   : > { %v7782_v24 = vand.u32 2147483647, %v7105_v1  ;;  %v3687_v18 = vsel %vm3686_vm10, %v3685_v12, 0  ;;  %v3609_v5 = vsel %vm3605_vm3, %v3593_v11, %v3608_v23  ;;  %v3335_v62 = vsub.s32 4294967266, %v7181_v15 }
 0x552   : > { %v3607_v22 = vsel %vm3603_vm11, %v3587_v37, %v3590_v42  ;;  %v3689_v47 = vand.u32 31, %v3687_v18  ;;  %v3429_v44 = vsub.s32 0, %v7174_v56  ;;  %v3528_v30 = vadd.s32 536870912, %v7176_v38 }
 0x553   : > { %v3783_v3 = vshrl.u32 %v3782_v35, 23  ;;  %v3610_v45 = vsel %vm3604_vm12, %v3607_v22, %v3609_v5  ;;  %v3629_v52 = vadd.s32 1, %v7163_v53  ;;  %v3682_v9 = vand.u32 8388607, %v7782_v24 }
 0x554   : > { %v3690_v42 = vsub.s32 32, %v3689_v47  ;;  %vm3628_vm13 = vc.u32 %v7169_v34, %v7162_v8  ;;  %v3688_v11 = vshrl.u32 %v3687_v18, 5  ;;  %v3692_v48 = vshll.u32 %v7871_v58, %v3689_v47 }
 0x555   : > { %v3695_v25 = vshll.u32 %v7872_v19, %v3689_v47  ;;  %v3698_v59 = vshll.u32 %v7873_v39, %v3689_v47  ;;  %v3701_v21 = vshll.u32 %v7874_v4, %v3689_v47  ;;  %v3704_v31 = vshll.u32 %v7875_v33, %v3689_v47 }
 0x556   : > { %v3693_v61 = vshrl.u32 %v7872_v19, %v3690_v42  ;;  %v3696_v2 = vshrl.u32 %v7873_v39, %v3690_v42  ;;  %v3699_v40 = vshrl.u32 %v7874_v4, %v3690_v42  ;;  %v3702_v46 = vshrl.u32 %v7875_v33, %v3690_v42 }
 0x557   : > { %v4401_v36 = vadd.s32 4294967169, %v3783_v3  ;;  %v3705_v49 = vshrl.u32 %v7876_v7, %v3690_v42  ;;  %v7208_v23 = vshrl.u32 %v3528_v30, 30  ;;  %v3626_v37 = vmul.u32 %v7154_v17, %v3610_v45 }
 0x558   : > { %v3694_v16 = vor.u32 %v3693_v61, %v3692_v48  ;;  %v3697_v12 = vor.u32 %v3696_v2, %v3695_v25  ;;  %v3700_v28 = vor.u32 %v3699_v40, %v3698_v59  ;;  %v3683_v35 = vor.u32 8388608, %v3682_v9 }
 0x559   : > { %v3703_v18 = vor.u32 %v3702_v46, %v3701_v21  ;;  %v3630_v22 = vsel %vm3628_vm13, %v3629_v52, %v7163_v53  ;;  %v3706_v5 = vor.u32 %v3705_v49, %v3704_v31  ;;  %vm3707_vm15 = vcmp.lt.s32.totalorder %v3688_v11, 1 }
 0x55a   : > { %v7780_v47 = vand.u32 2147483647, %v7158_v63  ;;  %vm3709_vm1 = vcmp.lt.s32.totalorder %v3688_v11, 3  ;;  %vm3710_vm5 = vcmp.lt.s32.totalorder %v3688_v11, 4  ;;  %v3715_v3 = vsel %vm3707_vm15, %v3694_v16, %v3697_v12 }
 0x55b   : > { %v3789_v48 = vadd.s32 1, %v4401_v36  ;;  %v3712_v30 = vsel %vm3710_vm5, %v3700_v28, 2102212464  ;;  %v3716_v25 = vsel %vm3710_vm5, %v3703_v18, 920167782  ;;  %v3719_v17 = vsel %vm3707_vm15, %v3697_v12, %v3700_v28 }
 0x55c   : > { %v3720_v45 = vsel %vm3710_vm5, %v3706_v5, 1326507024  ;;  %v7218_v9 = vadd.s32 %v3630_v22, %v3626_v37  ;;  %v3691_v61 = vshrl.u32 %v7871_v58, %v3690_v42  ;;  %vm3708_vm4 = vcmp.lt.s32.totalorder %v3688_v11, 2 }
 0x55d   : > { %v3717_v53 = vsel %vm3709_vm1, %v3700_v28, %v3716_v25  ;;  %v4386_v52 = vmin.u32 %v3429_v44, %v7174_v56  ;;  %v3721_v59 = vsel %vm3709_vm1, %v3703_v18, %v3720_v45  ;;  %v3723_v40 = vshll.u32 %v3683_v35, 8 }
 0x55e   : > { %v3718_v2 = vsel %vm3708_vm4, %v3715_v3, %v3717_v53  ;;  %v3711_v21 = vsel %vm3707_vm15, %v3691_v61, %v3694_v16  ;;  %v3713_v46 = vsel %vm3709_vm1, %v3697_v12, %v3712_v30  ;;  %v3722_v31 = vsel %vm3708_vm4, %v3719_v17, %v3721_v59 }
 0x55f   : > { %vm3790_vm0 = vcmp.gt.s32.totalorder %v3789_v48, 0  ;;  %v3530_v36 = vshll.u32 %v7208_v23, 30  ;;  %v7229_v42 = vmul.u32.u64.low %v3723_v40, %v3722_v31  ;;  %v7230_v49 = vmul.u32.u64.high %v3723_v40, %v3722_v31, %v7229_v42 }
 0x560   : > { %v3791_v28 = vsel %vm3790_vm0, %v3789_v48, 0  ;;  %v3632_v44 = vadd.s32 536870912, %v7218_v9  ;;  %v7233_v37 = vmul.u32.u64.low %v3723_v40, %v3718_v2  ;;  %v7234_v22 = vmul.u32.u64.high %v3723_v40, %v3718_v2, %v7233_v37 }
 0x561   : > { %v3786_v16 = vand.u32 8388607, %v7780_v47  ;;  %v3714_v12 = vsel %vm3708_vm4, %v3711_v21, %v3713_v46  ;;  %v3793_v35 = vand.u32 31, %v3791_v28  ;;  %v7242_v18 = vadd.s32 %v6937_v43, %v6942_v29  ;;  %v3254_v21 = vpop.f32.mrf.mxu0 }
 0x562   : > { %v3331_v5 = vsub.s32 32, %v7181_v15  ;;  %v7245_v3 = vadd.s32 127, %v3335_v62  ;;  %v3431_v48 = vclz %v4386_v52  ;;  %v7248_v30 = vsub.s32 %v7176_v38, %v3530_v36 }
 0x563   : > { %vm3732_vm6 = vc.u32 %v7230_v49, %v7233_v37  ;;  %v3794_v25 = vsub.s32 32, %v3793_v35  ;;  %v7252_v17 = vshrl.u32 %v3632_v44, 30  ;;  %v3730_v11 = vmul.u32 %v3723_v40, %v3714_v12 }
 0x564   : > { %v3733_v45 = vadd.s32 1, %v7234_v22  ;;  %v3787_v61 = vor.u32 8388608, %v3786_v16  ;;  %v3792_v43 = vshrl.u32 %v3791_v28, 5  ;;  %v3796_v29 = vshll.u32 %v7871_v58, %v3793_v35 }
 0x565   : > { %v3797_v62 = vshrl.u32 %v7872_v19, %v3794_v25  ;;  %v3800_v53 = vshrl.u32 %v7873_v39, %v3794_v25  ;;  %v3799_v52 = vshll.u32 %v7872_v19, %v3793_v35  ;;  %v3802_v2 = vshll.u32 %v7873_v39, %v3793_v35 }
 0x566   : > { %v3734_v38 = vsel %vm3732_vm6, %v3733_v45, %v7234_v22  ;;  %v3803_v59 = vshrl.u32 %v7874_v4, %v3794_v25  ;;  %v4387_v40 = vadd.s32 4294967294, %v3431_v48  ;;  %v3533_v46 = vsub.s32 0, %v7248_v30 }
 0x567   : > { %v3735_v31 = vadd.s32 %v3734_v38, %v3730_v11  ;;  %v3798_v36 = vor.u32 %v3797_v62, %v3796_v29  ;;  %v3801_v42 = vor.u32 %v3800_v53, %v3799_v52  ;;  %v3805_v44 = vshll.u32 %v7874_v4, %v3793_v35  ;;  %v3256_v38 = vpop.f32.mrf.mxu0 }
 0x568   : > { %v3804_v28 = vor.u32 %v3803_v59, %v3802_v2  ;;  %v3806_v16 = vshrl.u32 %v7875_v33, %v3794_v25  ;;  %v3808_v22 = vshll.u32 %v7875_v33, %v3793_v35  ;;  %v3809_v45 = vshrl.u32 %v7876_v7, %v3794_v25 }
 0x569   : > { %v3736_v12 = vadd.s32 536870912, %v3735_v31  ;;  %v7268_v57 = vadd.f32 %v3254_v21, %v6895_v10  ;;  %v3634_v48 = vshll.u32 %v7252_v17, 30  ;;  %vm3811_vm9 = vcmp.lt.s32.totalorder %v3792_v43, 1 }
 0x56a   : > { %v3807_v26 = vor.u32 %v3806_v16, %v3805_v44  ;;  %v3827_v11 = vshll.u32 %v3787_v61, 8  ;;  %v3795_v62 = vshrl.u32 %v7871_v58, %v3794_v25  ;;  %v3810_v53 = vor.u32 %v3809_v45, %v3808_v22 }
 0x56b   : > { %v7271_v29 = vshrl.u32 %v3736_v12, 30  ;;  %vm3814_vm7 = vcmp.lt.s32.totalorder %v3792_v43, 4  ;;  %vm3813_vm11 = vcmp.lt.s32.totalorder %v3792_v43, 3  ;;  %v3819_v35 = vsel %vm3811_vm9, %v3798_v36, %v3801_v42 }
 0x56c   : > { %v3816_v52 = vsel %vm3814_vm7, %v3804_v28, 2102212464  ;;  %v3820_v2 = vsel %vm3814_vm7, %v3807_v26, 920167782  ;;  %vm3812_vm3 = vcmp.lt.s32.totalorder %v3792_v43, 2  ;;  %v3823_v47 = vsel %vm3811_vm9, %v3801_v42, %v3804_v28 }
 0x56d   : > { %v3738_v59 = vshll.u32 %v7271_v29, 30  ;;  %v3821_v21 = vsel %vm3813_vm11, %v3804_v28, %v3820_v2  ;;  %v3815_v41 = vsel %vm3811_vm9, %v3795_v62, %v3798_v36  ;;  %v3824_v61 = vsel %vm3814_vm7, %v3810_v53, 1326507024 }
 0x56e   : > { %v3822_v44 = vsel %vm3812_vm3, %v3819_v35, %v3821_v21  ;;  %v7277_v16 = vadd.f32 %v3256_v38, %v6895_v10  ;;  %v3817_v25 = vsel %vm3813_vm11, %v3801_v42, %v3816_v52  ;;  %v3825_v12 = vsel %vm3813_vm11, %v3807_v26, %v3824_v61 }
 0x56f   : > { %v7279_v22 = vmul.u32.u64.low %v3827_v11, %v3822_v44  ;;  %v7280_v45 = vmul.u32.u64.high %v3827_v11, %v3822_v44, %v7279_v22  ;;  %v7284_v24 = vsub.s32 %v7218_v9, %v3634_v48  ;;  %v7286_v0 = vsub.s32 %v3735_v31, %v3738_v59 }
 0x570   : > { %v3826_v28 = vsel %vm3812_vm3, %v3823_v47, %v3825_v12  ;;  %v3886_v36 = vand.u32 2139095040, %v7268_v57  ;;  %v3333_v10 = vshrl.u32 %v7242_v18, %v3331_v5  ;;  %v3818_v26 = vsel %vm3812_vm3, %v3815_v41, %v3817_v25 }
 0x571   : > { %v7290_v62 = vmul.u32.u64.low %v3827_v11, %v3826_v28  ;;  %v7291_v53 = vmul.u32.u64.high %v3827_v11, %v3826_v28, %v7290_v62  ;;  %v3990_v38 = vand.u32 2139095040, %v7277_v16  ;;  %v3332_v9 = vshll.u32 %v7062_v60, %v7181_v15 }
 0x572   : > { %v3887_v42 = vshrl.u32 %v3886_v36, 23  ;;  %v3337_v31 = vshll.u32 %v7245_v3, 23  ;;  %v4390_v47 = vmin.u32 %v3533_v46, %v7248_v30  ;;  %v3837_v48 = vadd.s32 1, %v7280_v45 }
 0x573   : > { %vm4388_vm12 = vcmp.lt.s32.totalorder %v4387_v40, 0  ;;  %v3637_v52 = vsub.s32 0, %v7284_v24  ;;  %v3741_v35 = vsub.s32 0, %v7286_v0  ;;  %v3834_v5 = vmul.u32 %v3827_v11, %v3818_v26 }
 0x574   : > { %v4405_v18 = vadd.s32 4294967169, %v3887_v42  ;;  %vm3836_vm14 = vc.u32 %v7291_v53, %v7279_v22  ;;  %v3991_v41 = vshrl.u32 %v3990_v38, 23  ;;  %v7307_v43 = vor.u32 %v3333_v10, %v3332_v9 }
 0x575   : > { %v3838_v60 = vsel %vm3836_vm14, %v3837_v48, %v7280_v45  ;;  %v7310_v3 = vor.u32 4788187, %v3337_v31  ;;  %v7312_v46 = vsel %vm4388_vm12, 0, %v4387_v40  ;;  %v3535_v2 = vclz %v4390_v47 }
 0x576   : > { %v3893_v15 = vadd.s32 1, %v4405_v18  ;;  %v3839_v59 = vadd.s32 %v3838_v60, %v3834_v5  ;;  %v4394_v21 = vmin.u32 %v3637_v52, %v7284_v24  ;;  %v4398_v44 = vmin.u32 %v3741_v35, %v7286_v0 }
 0x577   : > { %v7784_v11 = vand.u32 2147483647, %v7268_v57  ;;  %v4409_v12 = vadd.s32 4294967169, %v3991_v41  ;;  %v7320_v45 = vadd.s32 %v7008_v14, %v7006_v54  ;;  %v7324_v10 = vadd.s32 4294967294, %v3535_v2 }
 0x578   : > { %vm3894_vm8 = vcmp.gt.s32.totalorder %v3893_v15, 0  ;;  %v3840_v61 = vadd.s32 536870912, %v3839_v59  ;;  %v3639_v42 = vclz %v4394_v21  ;;  %v3743_v38 = vclz %v4398_v44 }
 0x579   : > { %v3895_v25 = vsel %vm3894_vm8, %v3893_v15, 0  ;;  %v3890_v9 = vand.u32 8388607, %v7784_v11  ;;  %v3997_v48 = vadd.s32 1, %v4409_v12  ;;  %v7789_v36 = vand.u32 2147483647, %v7277_v16 }
 0x57a   : > { %v3897_v40 = vand.u32 31, %v3895_v25  ;;  %v7326_v26 = vshrl.u32 %v3840_v61, 30  ;;  %v3896_v60 = vshrl.u32 %v3895_v25, 5  ;;  %v4395_v21 = vadd.s32 4294967294, %v3639_v42 }
 0x57b   : > { %v3891_v62 = vor.u32 8388608, %v3890_v9  ;;  %v4399_v13 = vadd.s32 4294967294, %v3743_v38  ;;  %vm3998_vm10 = vcmp.gt.s32.totalorder %v3997_v48, 0  ;;  %vm4392_vm0 = vcmp.lt.s32.totalorder %v7324_v10, 0 }
 0x57c   : > { %v3898_v31 = vsub.s32 32, %v3897_v40  ;;  %v3842_v47 = vshll.u32 %v7326_v26, 30  ;;  %v3900_v54 = vshll.u32 %v7871_v58, %v3897_v40  ;;  %v3903_v14 = vshll.u32 %v7872_v19, %v3897_v40 }
 0x57d   : > { %v3906_v18 = vshll.u32 %v7873_v39, %v3897_v40  ;;  %v3909_v15 = vshll.u32 %v7874_v4, %v3897_v40  ;;  %v3912_v50 = vshll.u32 %v7875_v33, %v3897_v40  ;;  %vm3915_vm13 = vcmp.lt.s32.totalorder %v3896_v60, 1 }
 0x57e   : > { %v3901_v52 = vshrl.u32 %v7872_v19, %v3898_v31  ;;  %v3904_v35 = vshrl.u32 %v7873_v39, %v3898_v31  ;;  %v3907_v5 = vshrl.u32 %v7874_v4, %v3898_v31  ;;  %v7337_v41 = vsub.s32 %v3839_v59, %v3842_v47 }
 0x57f   : > { %v3910_v2 = vshrl.u32 %v7875_v33, %v3898_v31  ;;  %v3913_v59 = vshrl.u32 %v7876_v7, %v3898_v31  ;;  %vm3917_vm15 = vcmp.lt.s32.totalorder %v3896_v60, 3  ;;  %vm3918_vm1 = vcmp.lt.s32.totalorder %v3896_v60, 4 }
 0x580   : > { %v3902_v44 = vor.u32 %v3901_v52, %v3900_v54  ;;  %v3905_v61 = vor.u32 %v3904_v35, %v3903_v14  ;;  %v3908_v11 = vor.u32 %v3907_v5, %v3906_v18  ;;  %v3845_v12 = vsub.s32 0, %v7337_v41 }
 0x581   : > { %v3911_v28 = vor.u32 %v3910_v2, %v3909_v15  ;;  %v3914_v42 = vor.u32 %v3913_v59, %v3912_v50  ;;  %v3899_v52 = vshrl.u32 %v7871_v58, %v3898_v31  ;;  %vm3916_vm5 = vcmp.lt.s32.totalorder %v3896_v60, 2 }
 0x582   : > { %v4402_v25 = vmin.u32 %v3845_v12, %v7337_v41  ;;  %v3920_v47 = vsel %vm3918_vm1, %v3908_v11, 2102212464  ;;  %v3923_v54 = vsel %vm3915_vm13, %v3902_v44, %v3905_v61  ;;  %v3927_v35 = vsel %vm3915_vm13, %v3905_v61, %v3908_v11 }
 0x583   : > { %v3924_v14 = vsel %vm3918_vm1, %v3911_v28, 920167782  ;;  %v3928_v18 = vsel %vm3918_vm1, %v3914_v42, 1326507024  ;;  %v3931_v5 = vshll.u32 %v3891_v62, 8  ;;  %vm4400_vm4 = vcmp.lt.s32.totalorder %v4399_v13, 0 }
 0x584   : > { %v3847_v9 = vclz %v4402_v25  ;;  %v3925_v38 = vsel %vm3917_vm15, %v3908_v11, %v3924_v14  ;;  %v3919_v15 = vsel %vm3915_vm13, %v3899_v52, %v3902_v44  ;;  %v3921_v50 = vsel %vm3917_vm15, %v3905_v61, %v3920_v47 }
 0x585   : > { %v3926_v40 = vsel %vm3916_vm5, %v3923_v54, %v3925_v38  ;;  %v3929_v2 = vsel %vm3917_vm15, %v3911_v28, %v3928_v18  ;;  %v3999_v25 = vsel %vm3998_vm10, %v3997_v48, 0  ;;  %vm4396_vm6 = vcmp.lt.s32.totalorder %v4395_v21, 0 }
 0x586   : > { %v3930_v12 = vsel %vm3916_vm5, %v3927_v35, %v3929_v2  ;;  %v7355_v59 = vmul.u32.u64.low %v3931_v5, %v3926_v40  ;;  %v7356_v31 = vmul.u32.u64.high %v3931_v5, %v3926_v40, %v7355_v59  ;;  %v4403_v11 = vadd.s32 4294967294, %v3847_v9 }
 0x587   : > { %v7361_v42 = vmul.u32.u64.low %v3931_v5, %v3930_v12  ;;  %v7362_v62 = vmul.u32.u64.high %v3931_v5, %v3930_v12, %v7361_v42  ;;  %v3922_v44 = vsel %vm3916_vm5, %v3919_v15, %v3921_v50  ;;  %v3994_v28 = vand.u32 8388607, %v7789_v36 }
 0x588   : > { %v4001_v61 = vand.u32 31, %v3999_v25  ;;  %v7879_v47 = vand.u32 2147483647, %v7310_v3  ;;  %v7880_v54 = vcvt.s32.f32 %v7307_v43  ;;  %v7376_v9 = vadd.s32 %v7086_v32, %v7114_v51 }
 0x589   : > { %v7379_v52 = vsel %vm4400_vm4, 0, %v4399_v13  ;;  %v7881_v60 = vsub.s32 4294967266, %v7312_v46  ;;  %v7386_v40 = vsel %vm4392_vm0, 0, %v7324_v10  ;;  %v3941_v43 = vadd.s32 1, %v7356_v31 }
 0x58a   : > { %v7371_v14 = vmul.f32 %v7880_v54, %v7879_v47  ;;  %v4002_v3 = vsub.s32 32, %v4001_v61  ;;  %v7389_v35 = vsel %vm4396_vm6, 0, %v4395_v21  ;;  %vm4404_vm9 = vcmp.lt.s32.totalorder %v4403_v11, 0 }
 0x58b   : > { %v7383_v38 = vadd.s32 127, %v7881_v60  ;;  %v3938_v18 = vmul.u32 %v3931_v5, %v3922_v44  ;;  %vm3940_vm7 = vc.u32 %v7362_v62, %v7355_v59  ;;  %v3751_v13 = vsub.s32 4294967266, %v7379_v52 }
 0x58c   : > { %v3942_v32 = vsel %vm3940_vm7, %v3941_v43, %v7356_v31  ;;  %v3995_v51 = vor.u32 8388608, %v3994_v28  ;;  %v4005_v15 = vshrl.u32 %v7872_v19, %v4002_v3  ;;  %v4004_v10 = vshll.u32 %v7871_v58, %v4001_v61 }
 0x58d   : > { %v3943_v50 = vadd.s32 %v3942_v32, %v3938_v18  ;;  %v4007_v2 = vshll.u32 %v7872_v19, %v4001_v61  ;;  %v4008_v21 = vshrl.u32 %v7873_v39, %v4002_v3  ;;  %v7399_v12 = vsel %vm4404_vm9, 0, %v4403_v11 }
 0x58e   : > { %v4000_v5 = vshrl.u32 %v3999_v25, 5  ;;  %v4010_v42 = vshll.u32 %v7873_v39, %v4001_v61  ;;  %v4011_v44 = vshrl.u32 %v7874_v4, %v4002_v3  ;;  %v4006_v54 = vor.u32 %v4005_v15, %v4004_v10 }
 0x58f   : > { %v3944_v47 = vadd.s32 536870912, %v3943_v50  ;;  %v4009_v31 = vor.u32 %v4008_v21, %v4007_v2  ;;  %v4013_v28 = vshll.u32 %v7874_v4, %v4001_v61  ;;  %v4014_v43 = vshrl.u32 %v7875_v33, %v4002_v3 }
 0x590   : > { %v4012_v60 = vor.u32 %v4011_v44, %v4010_v42  ;;  %v4016_v18 = vshll.u32 %v7875_v33, %v4001_v61  ;;  %v4017_v19 = vshrl.u32 %v7876_v7, %v4002_v3  ;;  %v3647_v11 = vsub.s32 4294967266, %v7389_v35 }
 0x591   : > { %v3731_v25 = vadd.s32 %v7233_v37, %v7230_v49  ;;  %v7410_v39 = vshrl.u32 %v3944_v47, 30  ;;  %v4035_v32 = vshll.u32 %v3995_v51, 8  ;;  %v3752_v36 = vadd.s32 127, %v3751_v13 }
 0x592   : > { %v3855_v15 = vsub.s32 4294967266, %v7399_v12  ;;  %v4015_v10 = vor.u32 %v4014_v43, %v4013_v28  ;;  %v4018_v4 = vor.u32 %v4017_v19, %v4016_v18  ;;  %v4003_v21 = vshrl.u32 %v7871_v58, %v4002_v3 }
 0x593   : > { %v3946_v2 = vshll.u32 %v7410_v39, 30  ;;  %vm4019_vm11 = vcmp.lt.s32.totalorder %v4000_v5, 1  ;;  %vm4022_vm3 = vcmp.lt.s32.totalorder %v4000_v5, 4  ;;  %vm4021_vm12 = vcmp.lt.s32.totalorder %v4000_v5, 3 }
 0x594   : > { %v4024_v33 = vsel %vm4022_vm3, %v4012_v60, 2102212464  ;;  %v4027_v7 = vsel %vm4019_vm11, %v4006_v54, %v4009_v31  ;;  %v4028_v61 = vsel %vm4022_vm3, %v4015_v10, 920167782  ;;  %vm4020_vm14 = vcmp.lt.s32.totalorder %v4000_v5, 2 }
 0x595   : > { %v7415_v42 = vsub.s32 %v3943_v50, %v3946_v2  ;;  %v4029_v49 = vsel %vm4021_vm12, %v4012_v60, %v4028_v61  ;;  %v4031_v37 = vsel %vm4019_vm11, %v4009_v31, %v4012_v60  ;;  %v3747_v13 = vsub.s32 32, %v7379_v52 }
 0x596   : > { %v3753_v51 = vshll.u32 %v3752_v36, 23  ;;  %v4030_v44 = vsel %vm4020_vm14, %v4027_v7, %v4029_v49  ;;  %v4032_v47 = vsel %vm4022_vm3, %v4018_v4, 1326507024  ;;  %v4023_v58 = vsel %vm4019_vm11, %v4003_v21, %v4006_v54 }
 0x597   : > { %v3949_v28 = vsub.s32 0, %v7415_v42  ;;  %v4025_v3 = vsel %vm4021_vm12, %v4009_v31, %v4024_v33  ;;  %v4033_v43 = vsel %vm4021_vm12, %v4015_v10, %v4032_v47  ;;  %v3856_v18 = vadd.s32 127, %v3855_v15 }
 0x598   : > { %v4034_v19 = vsel %vm4020_vm14, %v4031_v37, %v4033_v43  ;;  %v7421_v48 = vmul.u32.u64.low %v4035_v32, %v4030_v44  ;;  %v7422_v50 = vmul.u32.u64.high %v4035_v32, %v4030_v44, %v7421_v48  ;;  %v3543_v60 = vsub.s32 4294967266, %v7386_v40 }
 0x599   : > { %v4406_v2 = vmin.u32 %v3949_v28, %v7415_v42  ;;  %v7427_v36 = vmul.u32.u64.low %v4035_v32, %v4034_v19  ;;  %v7428_v61 = vmul.u32.u64.high %v4035_v32, %v4034_v19, %v7427_v36  ;;  %v3441_v4 = vshll.u32 %v7383_v38, 23 }
 0x59a   : > { %v3749_v7 = vshrl.u32 %v3731_v25, %v3747_v13  ;;  %v3851_v54 = vsub.s32 32, %v7399_v12  ;;  %v4026_v31 = vsel %vm4020_vm14, %v4023_v58, %v4025_v3  ;;  %v3627_v15 = vadd.s32 %v7162_v8, %v7169_v34 }
 0x59b   : > { %v3648_v10 = vadd.s32 127, %v3647_v11  ;;  %v3835_v21 = vadd.s32 %v7279_v22, %v7291_v53  ;;  %v3951_v33 = vclz %v4406_v2  ;;  %v3748_v49 = vshll.u32 %v7286_v0, %v7379_v52 }
 0x59c   : > { %v3754_v37 = vor.u32 4788187, %v3753_v51  ;;  %v3857_v44 = vshll.u32 %v3856_v18, 23  ;;  %v4045_v47 = vadd.s32 1, %v7422_v50  ;;  %v3544_v25 = vadd.s32 127, %v3543_v60 }
 0x59d   : > { %v4407_v13 = vadd.s32 4294967294, %v3951_v33  ;;  %v4042_v28 = vmul.u32 %v4035_v32, %v4026_v31  ;;  %vm4044_vm8 = vc.u32 %v7428_v61, %v7421_v48  ;;  %v3643_v8 = vsub.s32 32, %v7389_v35 }
 0x59e   : > { %v3750_v34 = vor.u32 %v3749_v7, %v3748_v49  ;;  %v3853_v5 = vshrl.u32 %v3835_v21, %v3851_v54  ;;  %v4046_v22 = vsel %vm4044_vm8, %v4045_v47, %v7422_v50  ;;  %v3539_v53 = vsub.s32 32, %v7386_v40 }
 0x59f   : > { %v3649_v11 = vshll.u32 %v3648_v10, 23  ;;  %vm4408_vm10 = vcmp.lt.s32.totalorder %v4407_v13, 0  ;;  %v4047_v0 = vadd.s32 %v4046_v22, %v4042_v28  ;;  %v3755_v52 = vand.u32 2147483647, %v3754_v37 }
 0x5a0   : > { %v3852_v51 = vshll.u32 %v7337_v41, %v7399_v12  ;;  %v3858_v58 = vor.u32 4788187, %v3857_v44  ;;  %v3954_v32 = vsel %vm4408_vm10, 0, %v4407_v13  ;;  %vm3261_vm13 = vcmp.lt.s32.totalorder %v6889_v20, 0 }
 0x5a1   : > { %v3545_v3 = vshll.u32 %v3544_v25, 23  ;;  %v3955_v43 = vsub.s32 32, %v3954_v32  ;;  %v3959_v18 = vsub.s32 4294967266, %v3954_v32  ;;  %v4048_v19 = vadd.s32 536870912, %v4047_v0 }
 0x5a2   : > { %v3645_v60 = vshrl.u32 %v3627_v15, %v3643_v8  ;;  %v3757_v2 = vcvt.s32.f32 %v3750_v34  ;;  %v3854_v50 = vor.u32 %v3853_v5, %v3852_v51  ;;  %v3939_v36 = vadd.s32 %v7355_v59, %v7362_v62 }
 0x5a3   : > { %v3541_v7 = vshrl.u32 %v7376_v9, %v3539_v53  ;;  %v3644_v54 = vshll.u32 %v7284_v24, %v7389_v35  ;;  %v3960_v41 = vadd.s32 127, %v3959_v18  ;;  %v7453_v12 = vshrl.u32 %v4048_v19, 30 }
 0x5a4   : > { %v3650_v31 = vor.u32 4788187, %v3649_v11  ;;  %v3758_v10 = vmul.f32 %v3757_v2, %v3755_v52  ;;  %v3859_v21 = vand.u32 2147483647, %v3858_v58  ;;  %v3957_v33 = vshrl.u32 %v3939_v36, %v3955_v43 }
 0x5a5   : > { %v3540_v15 = vshll.u32 %v7248_v30, %v7386_v40  ;;  %v3546_v49 = vor.u32 4788187, %v3545_v3  ;;  %v3961_v37 = vshll.u32 %v3960_v41, 23  ;;  %v4050_v44 = vshll.u32 %v7453_v12, 30 }
 0x5a6   : > { %v3343_v59 = vxor.u32 2147483648, %v7371_v14  ;;  %v3646_v62 = vor.u32 %v3645_v60, %v3644_v54  ;;  %v3861_v9 = vcvt.s32.f32 %v3854_v50  ;;  %v3956_v24 = vshll.u32 %v7415_v42, %v3954_v32 }
 0x5a7   : > { %v7882_v35 = vsub.s32 32, %v7312_v46  ;;  %v3542_v25 = vor.u32 %v3541_v7, %v3540_v15  ;;  %v3962_v13 = vor.u32 4788187, %v3961_v37  ;;  %v7463_v28 = vsub.s32 %v4047_v0, %v4050_v44 }
 0x5a8   : > { %v3651_v8 = vand.u32 2147483647, %v3650_v31  ;;  %v3759_v30 = vxor.u32 2147483648, %v3758_v10  ;;  %v3862_v40 = vmul.f32 %v3861_v9, %v3859_v21  ;;  %v3958_v34 = vor.u32 %v3957_v33, %v3956_v24 }
 0x5a9   : > { %v3437_v47 = vshrl.u32 %v7320_v45, %v7882_v35  ;;  %v3436_v5 = vshll.u32 %v7174_v56, %v7312_v46  ;;  %v3442_v22 = vor.u32 4788187, %v3441_v4  ;;  %v3547_v53 = vand.u32 2147483647, %v3546_v49 }
 0x5aa   : > { %v4053_v42 = vsub.s32 0, %v7463_v28  ;;  %v7883_v11 = vand.u32 2147483647, %v6889_v20  ;;  %v3344_v0 = vsel %vm3261_vm13, %v3343_v59, %v7371_v14  ;;  %v3653_v52 = vcvt.s32.f32 %v3646_v62 }
 0x5ab   : > { %v3963_v51 = vand.u32 2147483647, %v3962_v13  ;;  %v3438_v58 = vor.u32 %v3437_v47, %v3436_v5  ;;  %v3549_v56 = vcvt.s32.f32 %v3542_v25  ;;  %vm3677_vm1 = vcmp.lt.s32.totalorder %v7105_v1, 0 }
 0x5ac   : > { %vm7472_vm15 = vcmp.le.f32.partialorder %v7883_v11, 0.7853982  ;;  %v4410_v46 = vmin.u32 %v4053_v42, %v7463_v28  ;;  %v3654_v38 = vmul.f32 %v3653_v52, %v3651_v8  ;;  %v3760_v4 = vsel %vm3677_vm1, %v3759_v30, %v3758_v10 }
 0x5ad   : > { %v3863_v32 = vxor.u32 2147483648, %v3862_v40  ;;  %v3965_v3 = vcvt.s32.f32 %v3958_v34  ;;  %v3347_v43 = vsel %vm7472_vm15, %v6889_v20, %v3344_v0  ;;  %v3443_v18 = vand.u32 2147483647, %v3442_v22 }
 0x5ae   : > { %v3550_v14 = vmul.f32 %v3549_v56, %v3547_v53  ;;  %v4055_v19 = vclz %v4410_v46  ;;  %vm3469_vm5 = vcmp.lt.s32.totalorder %v6900_v27, 0  ;;  %v7886_v60 = vand.u32 2147483647, %v7105_v1 }
 0x5af   : > { %v3966_v50 = vmul.f32 %v3965_v3, %v3963_v51  ;;  %v3445_v36 = vcvt.s32.f32 %v3438_v58  ;;  %vm3781_vm0 = vcmp.lt.s32.totalorder %v7158_v63, 0  ;;  %4675 = vcosq.f32 %v3347_v43 }
 0x5b0   : > { %vm7489_vm4 = vcmp.le.f32.partialorder %v7886_v60, 0.7853982  ;;  %v4411_v54 = vadd.s32 4294967294, %v4055_v19  ;;  %vm3573_vm6 = vcmp.lt.s32.totalorder %v6954_v55, 0  ;;  %v3655_v41 = vxor.u32 2147483648, %v3654_v38 }
 0x5b1   : > { %v3763_v7 = vsel %vm7489_vm4, %v7105_v1, %v3760_v4  ;;  %v3864_v31 = vsel %vm3781_vm0, %v3863_v32, %v3862_v40  ;;  %vm3365_vm9 = vcmp.lt.s32.totalorder %v6892_v6, 0  ;;  %v3446_v10 = vmul.f32 %v3445_v36, %v3443_v18 }
 0x5b2   : > { %v7889_v21 = vand.u32 2147483647, %v6900_v27  ;;  %v3551_v15 = vxor.u32 2147483648, %v3550_v14  ;;  %vm3885_vm11 = vcmp.lt.s32.totalorder %v7268_v57, 0  ;;  %vm4412_vm3 = vcmp.lt.s32.totalorder %v4411_v54, 0 }
 0x5b3   : > { %4677 = vcosq.f32 %v3763_v7  ;;  %v3967_v49 = vxor.u32 2147483648, %v3966_v50  ;;  %v4058_v37 = vsel %vm4412_vm3, 0, %v4411_v54  ;;  %v7892_v44 = vand.u32 2147483647, %v7158_v63 }
 0x5b4   : > { %vm7503_vm7 = vcmp.le.f32.partialorder %v7889_v21, 0.7853982  ;;  %v4043_v62 = vadd.s32 %v7421_v48, %v7428_v61  ;;  %v4059_v9 = vsub.s32 32, %v4058_v37  ;;  %v4063_v24 = vsub.s32 4294967266, %v4058_v37 }
 0x5b5   : > { %vm7510_vm12 = vcmp.le.f32.partialorder %v7892_v44, 0.7853982  ;;  %v3656_v47 = vsel %vm3573_vm6, %v3655_v41, %v3654_v38  ;;  %4679 = vsinq.f32 %v3763_v7  ;;  %v3969_v25 = vsub.s32 4, %v7410_v39 }
 0x5b6   : > { %v3867_v35 = vsel %vm7510_vm12, %v7158_v63, %v3864_v31  ;;  %v3761_v13 = vsub.s32 4, %v7271_v29  ;;  %v4060_v8 = vshll.u32 %v7463_v28, %v4058_v37  ;;  %v4061_v30 = vshrl.u32 %v4043_v62, %v4059_v9 }
 0x5b7   : > { %v4064_v40 = vadd.s32 127, %v4063_v24  ;;  %v3865_v48 = vsub.s32 4, %v7326_v26  ;;  %v3447_v61 = vxor.u32 2147483648, %v3446_v10  ;;  %v3552_v34 = vsel %vm3469_vm5, %v3551_v15, %v3550_v14 }
 0x5b8   : > { %v3968_v5 = vsel %vm3885_vm11, %v3967_v49, %v3966_v50  ;;  %4681 = vcosq.f32 %v3867_v35  ;;  %v4062_v22 = vor.u32 %v4061_v30, %v4060_v8  ;;  %v7895_v42 = vand.u32 2147483647, %v6954_v55  ;;  %v7908_v8 = vld [vmem:[#allocation5_spill] sm:$0xff] }
 0x5b9   : > { %v4065_v53 = vshll.u32 %v4064_v40, 23  ;;  %4683 = vsinq.f32 %v3867_v35  ;;  %v7898_v28 = vand.u32 2147483647, %v7268_v57  ;;  %v3970_v52 = vsel %vm3885_vm11, %v3969_v25, %v7410_v39  ;;  %v7907_v35 = vld [vmem:[#allocation6_spill] sm:$0xff] }
 0x5ba   : > { %vm7531_vm14 = vcmp.le.f32.partialorder %v7895_v42, 0.7853982  ;;  %4685 = vsinq.f32 %v3347_v43  ;;  %v3866_v46 = vsel %vm3781_vm0, %v3865_v48, %v7326_v26  ;;  %v3762_v38 = vsel %vm3677_vm1, %v3761_v13, %v7271_v29 }
 0x5bb   : > { %vm7537_vm8 = vcmp.le.f32.partialorder %v7898_v28, 0.7853982  ;;  %v3659_v51 = vsel %vm7531_vm14, %v6954_v55, %v3656_v47  ;;  %v4066_v56 = vor.u32 4788187, %v4065_v53  ;;  %v3448_v39 = vsel %vm3365_vm9, %v3447_v61, %v3446_v10 }
 0x5bc   : > { %v3971_v58 = vsel %vm7537_vm8, %v7268_v57, %v3968_v5  ;;  %v3555_v4 = vsel %vm7503_vm7, %v6900_v27, %v3552_v34  ;;  %vm3989_vm10 = vcmp.lt.s32.totalorder %v7277_v16, 0  ;;  %v4073_v32 = vsub.s32 4, %v7453_v12  ;;  %v7570_v19 = vpop.eup %4675 }
 0x5bd   : > { %v4067_v3 = vand.u32 2147483647, %v4066_v56  ;;  %v4069_v43 = vcvt.s32.f32 %v4062_v22  ;;  %v3972_v26 = vsel %vm7537_vm8, 0, %v3970_v52  ;;  %4687 = vcosq.f32 %v3659_v51 }
 0x5be   : > { %4689 = vcosq.f32 %v3971_v58  ;;  %v3868_v29 = vsel %vm7510_vm12, 0, %v3866_v46  ;;  %v3764_v18 = vsel %vm7489_vm4, 0, %v3762_v38  ;;  %v3657_v14 = vsub.s32 4, %v7252_v17 }
 0x5bf   : > { %4691 = vsinq.f32 %v3971_v58  ;;  %v4070_v60 = vmul.f32 %v4069_v43, %v4067_v3  ;;  %v3553_v50 = vsub.s32 4, %v7208_v23  ;;  %v7901_v36 = vand.u32 2147483647, %v6892_v6 }
 0x5c0   : > { %4693 = vsinq.f32 %v3555_v4  ;;  %v4074_v2 = vsel %vm3989_vm10, %v4073_v32, %v7453_v12  ;;  %v4678_v41 = vpop.eup %4677  ;;  %v7904_v10 = vand.u32 2147483647, %v7277_v16  ;;  %v3976_v15 = vadd.s32 3, %v3972_v26 }
 0x5c1   : > { %vm7575_vm1 = vcmp.le.f32.partialorder %v7901_v36, 0.7853982  ;;  %4695 = vcosq.f32 %v3555_v4  ;;  %v4071_v31 = vxor.u32 2147483648, %v4070_v60  ;;  %v3872_v49 = vadd.s32 3, %v3868_v29 }
 0x5c2   : > { %v3451_v54 = vsel %vm7575_vm1, %v6892_v6, %v3448_v39  ;;  %vm7587_vm4 = vcmp.le.f32.partialorder %v7904_v10, 0.7853982  ;;  %v3768_v37 = vadd.s32 3, %v3764_v18  ;;  %v3658_v12 = vsel %vm3573_vm6, %v3657_v14, %v7252_v17  ;;  %v4680_v44 = vpop.eup %4679 }
 0x5c3   : > { %4697 = vsinq.f32 %v3659_v51  ;;  %v4072_v59 = vsel %vm3989_vm10, %v4071_v31, %v4070_v60  ;;  %v4076_v62 = vsel %vm7587_vm4, 0, %v4074_v2  ;;  %v3554_v9 = vsel %vm3469_vm5, %v3553_v50, %v7208_v23 }
 0x5c4   : > { %4699 = vcosq.f32 %v3451_v54  ;;  %v4075_v24 = vsel %vm7587_vm4, %v7277_v16, %v4072_v59  ;;  %v3449_v47 = vsub.s32 4, %v7907_v35  ;;  %v7605_v25 = vand.u32 3, %v3976_v15 }
 0x5c5   : > { %4701 = vsinq.f32 %v3451_v54  ;;  %v4682_v17 = vpop.eup %4681  ;;  %v3660_v13 = vsel %vm7531_vm14, 0, %v3658_v12  ;;  %v3345_v30 = vsub.s32 4, %v7908_v8  ;;  %v4080_v23 = vadd.s32 3, %v4076_v62 }
 0x5c6   : > { %4703 = vcosq.f32 %v4075_v24  ;;  %v4684_v40 = vpop.eup %4683  ;;  %v3769_v48 = vand.u32 3, %v3768_v37  ;;  %v3556_v61 = vsel %vm7503_vm7, 0, %v3554_v9  ;;  %v3873_v5 = vand.u32 3, %v3872_v49 }
 0x5c7   : > { %4705 = vsinq.f32 %v4075_v24  ;;  %v7612_v34 = vpop.eup %4685  ;;  %v3772_v22 = vxor.u32 2147483648, %v4680_v44  ;;  %v3775_v53 = vxor.u32 2147483648, %v4678_v41  ;;  %v3664_v42 = vadd.s32 3, %v3660_v13 }
 0x5c8   : > { %v3450_v11 = vsel %vm3365_vm9, %v3449_v47, %v7907_v35  ;;  %v3876_v28 = vxor.u32 2147483648, %v4684_v40  ;;  %v3879_v0 = vxor.u32 2147483648, %v4682_v17  ;;  %v3560_v52 = vadd.s32 3, %v3556_v61 }
 0x5c9   : > { %v3346_v51 = vsel %vm3261_vm13, %v3345_v30, %v7908_v8  ;;  %v7622_v33 = vand.u32 3, %v4080_v23  ;;  %vm3979_vm5 = vcmp.eq.s32.totalorder %v7605_v25, 0  ;;  %vm3982_vm0 = vcmp.eq.s32.totalorder %v7605_v25, 2 }
 0x5ca   : > { %v7620_v58 = vpop.eup %4687  ;;  %vm3771_vm6 = vcmp.eq.s32.totalorder %v3769_v48, 0  ;;  %vm3774_vm7 = vcmp.eq.s32.totalorder %v3769_v48, 2  ;;  %vm3874_vm11 = vcmp.lt.s32.totalorder %v3873_v5, 2  ;;  %v3452_v39 = vsel %vm7575_vm1, 0, %v3450_v11 }
 0x5cb   : > { %v4690_v56 = vpop.eup %4689  ;;  %v3773_v46 = vsel %vm3771_vm6, %v4678_v41, %v3772_v22  ;;  %v3776_v38 = vsel %vm3774_vm7, %v3775_v53, %v4680_v44  ;;  %vm3875_vm9 = vcmp.eq.s32.totalorder %v3873_v5, 0  ;;  %vm3878_vm13 = vcmp.eq.s32.totalorder %v3873_v5, 2 }
 0x5cc   : > { %v4692_v4 = vpop.eup %4691  ;;  %v7628_v32 = vand.u32 3, %v3664_v42  ;;  %v3348_v3 = vsel %vm7472_vm15, 0, %v3346_v51  ;;  %vm3978_vm3 = vcmp.lt.s32.totalorder %v7605_v25, 2  ;;  %v3877_v26 = vsel %vm3875_vm9, %v4682_v17, %v3876_v28 }
 0x5cd   : > { %v4694_v43 = vpop.eup %4693  ;;  %v3880_v29 = vsel %vm3878_vm13, %v3879_v0, %v4684_v40  ;;  %vm3770_vm12 = vcmp.lt.s32.totalorder %v3769_v48, 2  ;;  %v7633_v18 = vand.u32 3, %v3560_v52  ;;  %vm4082_vm14 = vcmp.lt.s32.totalorder %v7622_v33, 2 }
 0x5ce   : > { %v4696_v14 = vpop.eup %4695  ;;  %v3777_v60 = vsel %vm3770_vm12, %v3773_v46, %v3776_v38  ;;  %v3671_v50 = vxor.u32 2147483648, %v7620_v58  ;;  %v3456_v36 = vadd.s32 3, %v3452_v39  ;;  %vm4079_vm8 = vweird.f32 %v7277_v16  ;;  %v4096_v46 = vpop.permute.xlu0 %4095 }
 0x5cf   : > { %vm4083_vm15 = vcmp.eq.s32.totalorder %v7622_v33, 0  ;;  %v3980_v45 = vxor.u32 2147483648, %v4692_v4  ;;  %v3983_v2 = vxor.u32 2147483648, %v4690_v56  ;;  %v3352_v54 = vadd.s32 3, %v3348_v3 }
 0x5d0   : > { %v4698_v7 = vpop.eup %4697  ;;  %vm4086_vm10 = vcmp.eq.s32.totalorder %v7622_v33, 2  ;;  %vm3975_vm1 = vweird.f32 %v7268_v57  ;;  %v3881_v31 = vsel %vm3874_vm11, %v3877_v26, %v3880_v29  ;;  %vm3666_vm4 = vcmp.lt.s32.totalorder %v7628_v32, 2 }
 0x5d1   : > { %v4700_v41 = vpop.eup %4699  ;;  %v3564_v10 = vxor.u32 2147483648, %v4694_v43  ;;  %vm3871_vm6 = vweird.f32 %v7158_v63  ;;  %vm3667_vm7 = vcmp.eq.s32.totalorder %v7628_v32, 0  ;;  %vm3670_vm9 = vcmp.eq.s32.totalorder %v7628_v32, 2 }
 0x5d2   : > { %v4702_v21 = vpop.eup %4701  ;;  %vm3562_vm13 = vcmp.lt.s32.totalorder %v7633_v18, 2  ;;  %v3567_v15 = vxor.u32 2147483648, %v4696_v14  ;;  %v3668_v37 = vxor.u32 2147483648, %v4698_v7  ;;  %v3672_v12 = vsel %vm3670_vm9, %v3671_v50, %v4698_v7 }
 0x5d3   : > { %v4704_v49 = vpop.eup %4703  ;;  %vm3563_vm12 = vcmp.eq.s32.totalorder %v7633_v18, 0  ;;  %v3457_v44 = vand.u32 3, %v3456_v36  ;;  %v3981_v9 = vsel %vm3979_vm5, %v4690_v56, %v3980_v45  ;;  %v3984_v24 = vsel %vm3982_vm0, %v3983_v2, %v4692_v4 }
 0x5d4   : > { %v4706_v59 = vpop.eup %4705  ;;  %v4087_v62 = vxor.u32 2147483648, %v4704_v49  ;;  %v3353_v35 = vand.u32 3, %v3352_v54  ;;  %v3565_v17 = vsel %vm3563_vm12, %v4696_v14, %v3564_v10  ;;  %v3460_v13 = vxor.u32 2147483648, %v4702_v21 }
 0x5d5   : > { %v4084_v47 = vxor.u32 2147483648, %v4706_v59  ;;  %v3463_v8 = vxor.u32 2147483648, %v4700_v41  ;;  %vm3566_vm11 = vcmp.eq.s32.totalorder %v7633_v18, 2  ;;  %v3356_v40 = vxor.u32 2147483648, %v7612_v34 }
 0x5d6   : > { %v4088_v30 = vsel %vm4086_vm10, %v4087_v62, %v4706_v59  ;;  %v3359_v23 = vxor.u32 2147483648, %v7570_v19  ;;  %v3985_v61 = vsel %vm3978_vm3, %v3981_v9, %v3984_v24  ;;  %v3669_v5 = vsel %vm3667_vm7, %v7620_v58, %v3668_v37 }
 0x5d7   : > { %v4085_v48 = vsel %vm4083_vm15, %v4704_v49, %v4084_v47  ;;  %v3568_v22 = vsel %vm3566_vm11, %v3567_v15, %v4694_v43  ;;  %vm3459_vm5 = vcmp.eq.s32.totalorder %v3457_v44, 0  ;;  %vm3462_vm0 = vcmp.eq.s32.totalorder %v3457_v44, 2 }
 0x5d8   : > { %v4089_v53 = vsel %vm4082_vm14, %v4085_v48, %v4088_v30  ;;  %vm3355_vm10 = vcmp.eq.s32.totalorder %v3353_v35, 0  ;;  %v3461_v11 = vsel %vm3459_vm5, %v4700_v41, %v3460_v13  ;;  %v3464_v28 = vsel %vm3462_vm0, %v3463_v8, %v4702_v21 }
 0x5d9   : > { %v4090_v42 = vsel %vm4079_vm8, nan, %v4089_v53  ;;  %vm3358_vm15 = vcmp.eq.s32.totalorder %v3353_v35, 2  ;;  %v3986_v25 = vsel %vm3975_vm1, nan, %v3985_v61  ;;  %v3673_v0 = vsel %vm3666_vm4, %v3669_v5, %v3672_v12 }
 0x5da   : > { %4125 = vmatprep.subr.mxu1 %v4090_v42  ;;  %v3357_v52 = vsel %vm3355_vm10, %v7570_v19, %v3356_v40  ;;  %v3360_v51 = vsel %vm3358_vm15, %v3359_v23, %v7612_v34  ;;  %v3882_v58 = vsel %vm3871_vm6, nan, %v3881_v31  ;;  %vm3767_vm3 = vweird.f32 %v7105_v1 }
 0x5db   : > { %4126 = vmatpush1.msra.mxu1 %v3986_v25  ;;  %v3569_v16 = vsel %vm3562_vm13, %v3565_v17, %v3568_v22  ;;  %vm3458_vm14 = vcmp.lt.s32.totalorder %v3457_v44, 2  ;;  %v3778_v57 = vsel %vm3767_vm3, nan, %v3777_v60  ;;  %vm3663_vm8 = vweird.f32 %v6954_v55  ;;  %v4091_v55 = vld [vmem:[%s7727_s6] sm:$0x3] }
 0x5dc   : > { %4127 = vmatprep.subr.mxu1 %v3882_v58  ;;  %v3465_v33 = vsel %vm3458_vm14, %v3461_v11, %v3464_v28  ;;  %vm3354_vm1 = vcmp.lt.s32.totalorder %v3353_v35, 2  ;;  %v3674_v19 = vsel %vm3663_vm8, nan, %v3673_v0  ;;  %vm3559_vm4 = vweird.f32 %v6900_v27 }
 0x5dd   : > { %4128 = vmatpush1.msra.mxu1 %v3778_v57  ;;  %v3361_v34 = vsel %vm3354_vm1, %v3357_v52, %v3360_v51  ;;  %v3570_v63 = vsel %vm3559_vm4, nan, %v3569_v16  ;;  %vm3455_vm6 = vweird.f32 %v6892_v6  ;;  %vm3351_vm7 = vweird.f32 %v6889_v20 }
 0x5de   : > { %4129 = vmatprep.subr.mxu1 %v3674_v19  ;;  %v3466_v1 = vsel %vm3455_vm6, nan, %v3465_v33  ;;  %v3362_v56 = vsel %vm3351_vm7, nan, %v3361_v34 }
 0x5df   : > { %4130 = vmatpush1.msra.mxu1 %v3570_v63 }
 0x5e0   : > { %4131 = vmatprep.subr.mxu1 %v3466_v1 }
 0x5e1   : > { %4132 = vmatpush1.msra.mxu1 %v3362_v56 }
 0x5e2   : > { %4413 = vmatmul.mubr.msk.f32.vlgmr.msra.gmra.mxu1 %vm1233_vm2, %v4091_v55 }
 0x6a2   : > { %v4167_v27 = vpop.f32.mrf.mxu1 }
 0x6a3   : > { %v4168_v6 = vadd.f32 %v4167_v27, %v4096_v46 }
 0x6a4   : > { %v4169_v38 = vpop.f32.mrf.mxu1 }
 0x6a5   : > { %v4170_v20 = vadd.f32 %v4169_v38, %v4096_v46 }
 0x6a7   : > { %v4174_v39 = vcombine.low %v4168_v6, %v4170_v20 }
 0x6a9   : > { %4414 = vst.sshfl [vmem:[%s299_s13] sm:$0x33 pattern:$0x76325410] %v4174_v39 }
 0x6aa   : > { %4720 = shalt.err (!%p4717_p3)
}
 0x6ab   : > { %s4721_s25 = scalar_lea.hbm %s4197_s20, 64  ;;  %s4725_s12 = scalar_lea.hbm %s7729_s8, 256 }
 0x6ac   : > { %p4722_p4 = scmp.ne.s32.totalorder %s4197_s20, %s4721_s25  ;;  %p4726_p9 = scmp.lt.s32.totalorder %s4197_s20, %s7729_s8 }
 0x6ad   : > { %p4727_p10 = scmp.lt.s32.totalorder %s4725_s12, %s4721_s25 }
 0x6ae   : > { %p4723_p7 = pnand %p4722_p4, %p4862_p5 }
 0x6af   : > { %p4728_p11 = por %p4727_p10, %p4726_p9 }
 0x6b0   : > { %p4724_p8 = pneg %p4723_p7 }
 0x6b2   : > { %p4729_p12 = pnand %p4728_p11, %p4724_p8 }
 0x6b4   : > { %4732 = shalt.err (!%p4729_p12)
}
 0x6b5   : > { %4541 = dma.vmem_to_hbm [thread:$0]  (%p4862_p5), %s4200_s17, 64, %s4197_s20, %s4185_s21  }
 0x6b6 PF: > { %p4547_p13 = scmp.ge.s32.totalorder %s4767_s30, 2  ;;  %s4211_s19 = sand.u32 1, %s4755_s27  }
 0x6b7   : > { %s4212_s22 = scalar_lea.sflag [#allocation3], %s4211_s19 }
 0x6b8   : > { %p4544_p0 = pnand %p4547_p13, %p4866_p6 }
 0x6ba   : > { %p4545_p1 = pneg %p4544_p0 }
 0x6bc   : > { %4750 = dma.done.wait (%p4545_p1), %s4212_s22, 64  }
 0x6bd   : > { %4752 = vsyncadd (%p4545_p1), %s4212_s22, 4294967232  ;;  %p18_p2 = scmp.ge.s32.totalorder %s4849_s11, 6   ;;  %s7909_s27 = smov %s4759_s28 }
 0x6be   : > { %s7910_s28 = smov %s4763_s29  ;;  %s7911_s29 = smov %s4860_s14 }
 0x6bf   : > { %s7912_s30 = smov %s4849_s11  ;;  %20 = sbr.rel (!%p18_p2) target bundleno = 3 (0x3), region = 89 }
 0x6c4   :  { %4217 = vsyncpa [#allocation3], 1 }
 0x6c5   :  { %4219 = vsyncpa [#allocation3 + $0x1], 1 }

</bundles_post_ra>
